<compile_context>
chip_gen: v7x
topology: tpu7x:2x2x1
jax: 0.10.0
libtpu: 0.0.40
codegen_flags: <defaults>
</compile_context>

<pallas_src>
import math

import jax
import jax.numpy as jnp
from jax.experimental import pallas as pl
from jax.experimental.pallas import tpu as pltpu


def _round_up(n, m):
    return ((n + m - 1) // m) * m


def _decoder_kernel(x_ref, w_in_ref, b_in_ref, w0_ref, b0_ref, w1_ref, b1_ref,
                    w_out_ref, b_out_ref, out_ref):
    """Full DecoderResNet forward for one tile of rows.

    Activations stay VMEM-resident in f32 for the whole network; matmul operands
    are cast to the weight dtype (bf16) right before each dot, accumulation is f32.
    """
    cdt = w0_ref.dtype                      # compute dtype for MXU operands (bf16)

    # --- net = fc_in(x) ---------------------------------------------------
    net = jnp.dot(x_ref[...], w_in_ref[...],
                  preferred_element_type=jnp.float32) + b_in_ref[...]

    # --- ResnetBlockFC x num_layers (identity shortcut: plain add) --------
    num_layers = w0_ref.shape[0]
    for l in range(num_layers):             # static unroll, num_layers is small
        h = jnp.dot(jnp.maximum(net, 0.0).astype(cdt), w0_ref[l],
                    preferred_element_type=jnp.float32) + b0_ref[l]
        dx = jnp.dot(jnp.maximum(h, 0.0).astype(cdt), w1_ref[l],
                     preferred_element_type=jnp.float32) + b1_ref[l]
        net = net + dx                      # shortcut == identity (no matmul)

    # --- out = fc_out(relu(net)) ------------------------------------------
    h = jnp.maximum(net, 0.0)
    out_dim = out_ref.shape[-1]
    if out_dim >= 128:
        # Wide head: use the MXU (w_out stored as [out_dim, h_dim], contract on h).
        out = jax.lax.dot_general(
            h.astype(cdt), w_out_ref[...],
            dimension_numbers=(((1,), (1,)), ((), ())),
            preferred_element_type=jnp.float32)
    else:
        # Narrow head (DecoderResNet default out_dim=1): VPU mul + XLU lane-reduce.
        cols = [jnp.sum(h * w_out_ref[j:j + 1, :].astype(jnp.float32),
                        axis=-1, keepdims=True)
                for j in range(out_dim)]
        out = cols[0] if out_dim == 1 else jnp.concatenate(cols, axis=-1)

    out_ref[...] = (out + b_out_ref[...]).astype(out_ref.dtype)


def decoder_resnet_forward(x, params, *, tm=512, compute_dtype=jnp.bfloat16):
    """DecoderResNet forward.

    x: (..., in_dim) float array.
    params: dict of f32 arrays in PyTorch nn.Linear layout ([out_features, in_features]):
       w_in  (h_dim, in_dim),  b_in  (h_dim,)
       w0,w1 (L, h_dim, h_dim), b0,b1 (L, h_dim)      # stacked ResnetBlockFC params
       w_out (out_dim, h_dim), b_out (out_dim,)
    Returns (..., out_dim) float32.
    """
    *lead, in_dim = x.shape
    M = int(math.prod(lead)) if lead else 1
    h_dim = params["w_in"].shape[0]
    out_dim = params["w_out"].shape[0]
    L = params["w0"].shape[0]

    # Activations streamed through HBM as bf16 (matmul accumulation stays f32).
    x2 = x.reshape(M, in_dim).astype(compute_dtype)

    # Row tiling: big tiles to amortize per-step overhead; keep >= 2 grid steps
    # when possible (v7x megacore); pad rows instead of asserting divisibility.
    tm = _round_up(min(tm, max(M, 8)), 8)
    if pl.cdiv(M, tm) < 2 and M > 8:
        tm = _round_up(pl.cdiv(M, 2), 8)
    m_pad = _round_up(M, tm)
    if m_pad != M:
        x2 = jnp.pad(x2, ((0, m_pad - M), (0, 0)))
    grid = (m_pad // tm,)

    # One-time parameter prep (done by XLA outside the kernel; for inference this
    # would be cached). Weights pre-transposed to [fan_in, fan_out] and cast to
    # bf16; biases kept f32 and reshaped to broadcast-friendly (.., 1, C).
    w_in = params["w_in"].T.astype(compute_dtype)                        # (in_dim, h)
    w0 = jnp.transpose(params["w0"], (0, 2, 1)).astype(compute_dtype)    # (L, h, h)
    w1 = jnp.transpose(params["w1"], (0, 2, 1)).astype(compute_dtype)    # (L, h, h)
    w_out = params["w_out"].astype(compute_dtype)                        # (out_dim, h)
    b_in = params["b_in"].reshape(1, h_dim).astype(jnp.float32)
    b0 = params["b0"].reshape(L, 1, h_dim).astype(jnp.float32)
    b1 = params["b1"].reshape(L, 1, h_dim).astype(jnp.float32)
    b_out = params["b_out"].reshape(1, out_dim).astype(jnp.float32)

    out2 = pl.pallas_call(
        _decoder_kernel,
        out_shape=jax.ShapeDtypeStruct((m_pad, out_dim), jnp.float32),
        grid_spec=pltpu.PrefetchScalarGridSpec(
            num_scalar_prefetch=0,
            grid=grid,
            in_specs=[
                pl.BlockSpec((tm, in_dim), lambda i: (i, 0)),             # x rows
                pl.BlockSpec((in_dim, h_dim), lambda i: (0, 0)),          # fc_in W
                pl.BlockSpec((1, h_dim), lambda i: (0, 0)),               # fc_in b
                pl.BlockSpec((L, h_dim, h_dim), lambda i: (0, 0, 0)),     # fc_0 W (stacked)
                pl.BlockSpec((L, 1, h_dim), lambda i: (0, 0, 0)),         # fc_0 b
                pl.BlockSpec((L, h_dim, h_dim), lambda i: (0, 0, 0)),     # fc_1 W (stacked)
                pl.BlockSpec((L, 1, h_dim), lambda i: (0, 0, 0)),         # fc_1 b
                pl.BlockSpec((out_dim, h_dim), lambda i: (0, 0)),         # fc_out W
                pl.BlockSpec((1, out_dim), lambda i: (0, 0)),             # fc_out b
            ],
            out_specs=pl.BlockSpec((tm, out_dim), lambda i: (i, 0)),
        ),
        compiler_params=pltpu.CompilerParams(
            dimension_semantics=("parallel",),
        ),
    )(x2, w_in, b_in, w0, b0, w1, b1, w_out, b_out)

    return out2[:M].reshape(tuple(lead) + (out_dim,))


def _reference(x2, p):
    """Pure-JAX f32 reference matching the PyTorch module (y = x @ W.T + b)."""
    hp = jax.lax.Precision.HIGHEST
    net = jnp.dot(x2, p["w_in"].T, precision=hp) + p["b_in"]
    for l in range(p["w0"].shape[0]):
        h = jnp.dot(jnp.maximum(net, 0.0), p["w0"][l].T, precision=hp) + p["b0"][l]
        dx = jnp.dot(jnp.maximum(h, 0.0), p["w1"][l].T, precision=hp) + p["b1"][l]
        net = net + dx
    return jnp.dot(jnp.maximum(net, 0.0), p["w_out"].T, precision=hp) + p["b_out"]


if __name__ == "__main__":
    # DecoderResNet defaults: in_dim=3, out_dim=1, h_dim=128, num_layers=5, leaky=False.
    in_dim, out_dim, h_dim, num_layers = 3, 1, 128, 5
    batch, n_points = 2, 1024
    M = batch * n_points

    key = jax.random.PRNGKey(0)
    ks = jax.random.split(key, 9)

    def init(k, shape, scale):
        return jax.random.normal(k, shape, dtype=jnp.float32) * scale

    # NOTE: the module zero-inits fc_1.weight; here we use small random values so
    # the numerical check exercises the full datapath (forward semantics are the
    # same either way).
    params = {
        "w_in": init(ks[0], (h_dim, in_dim), 1.0 / math.sqrt(in_dim)),
        "b_in": init(ks[1], (h_dim,), 0.1),
        "w0": init(ks[2], (num_layers, h_dim, h_dim), 1.0 / math.sqrt(h_dim)),
        "b0": init(ks[3], (num_layers, h_dim), 0.1),
        "w1": init(ks[4], (num_layers, h_dim, h_dim), 0.5 / math.sqrt(h_dim)),
        "b1": init(ks[5], (num_layers, h_dim), 0.1),
        "w_out": init(ks[6], (out_dim, h_dim), 1.0 / math.sqrt(h_dim)),
        "b_out": init(ks[7], (out_dim,), 0.1),
    }
    x = jax.random.normal(ks[8], (batch, n_points, in_dim), dtype=jnp.float32)

    out = decoder_resnet_forward(x, params, tm=512)
    out = jax.block_until_ready(out)
    assert out.shape == (batch, n_points, out_dim)

    ref = _reference(x.reshape(M, in_dim), params).reshape(batch, n_points, out_dim)
    rel_err = float(jnp.max(jnp.abs(out - ref)) / (jnp.max(jnp.abs(ref)) + 1e-6))
    assert rel_err < 5e-2, f"mismatch vs reference: rel err {rel_err:.3e}"

    print("KERNEL_OK")
</pallas_src>

<mosaic_0001>
module attributes {stable_mosaic.version = 11 : i64} {
  func.func @_decoder_kernel(%arg0: i32, %arg1: memref<512x3xbf16, #tpu.memory_space<vmem>>, %arg2: memref<3x128xbf16, #tpu.memory_space<vmem>>, %arg3: memref<1x128xf32, #tpu.memory_space<vmem>>, %arg4: memref<5x128x128xbf16, #tpu.memory_space<vmem>>, %arg5: memref<5x1x128xf32, #tpu.memory_space<vmem>>, %arg6: memref<5x128x128xbf16, #tpu.memory_space<vmem>>, %arg7: memref<5x1x128xf32, #tpu.memory_space<vmem>>, %arg8: memref<1x128xbf16, #tpu.memory_space<vmem>>, %arg9: memref<1x1xf32, #tpu.memory_space<vmem>>, %arg10: memref<512x1xf32, #tpu.memory_space<vmem>>) attributes {dimension_semantics = [#tpu.dimension_semantics<parallel>], iteration_bounds = array<i64: 4>, scalar_prefetch = 0 : i64, scratch_operands = 0 : i64, tpu.core_type = #tpu.core_type<tc>, window_params = [{transform_indices = @transform_0, window_bounds = array<i64: 512, 3>}, {pipeline_mode = #tpu.pipeline_mode<synchronous>, transform_indices = @transform_1, window_bounds = array<i64: 3, 128>}, {pipeline_mode = #tpu.pipeline_mode<synchronous>, transform_indices = @transform_2, window_bounds = array<i64: 1, 128>}, {pipeline_mode = #tpu.pipeline_mode<synchronous>, transform_indices = @transform_3, window_bounds = array<i64: 5, 128, 128>}, {pipeline_mode = #tpu.pipeline_mode<synchronous>, transform_indices = @transform_4, window_bounds = array<i64: 5, 1, 128>}, {pipeline_mode = #tpu.pipeline_mode<synchronous>, transform_indices = @transform_5, window_bounds = array<i64: 5, 128, 128>}, {pipeline_mode = #tpu.pipeline_mode<synchronous>, transform_indices = @transform_6, window_bounds = array<i64: 5, 1, 128>}, {pipeline_mode = #tpu.pipeline_mode<synchronous>, transform_indices = @transform_7, window_bounds = array<i64: 1, 128>}, {pipeline_mode = #tpu.pipeline_mode<synchronous>, transform_indices = @transform_8, window_bounds = array<i64: 1, 1>}, {transform_indices = @transform_9, window_bounds = array<i64: 512, 1>}]} {
    %c0 = arith.constant 0 : index
    %c0_0 = arith.constant 0 : index
    %0 = vector.load %arg1[%c0, %c0_0] : memref<512x3xbf16, #tpu.memory_space<vmem>>, vector<512x3xbf16>
    %c0_1 = arith.constant 0 : index
    %c0_2 = arith.constant 0 : index
    %1 = vector.load %arg2[%c0_1, %c0_2] : memref<3x128xbf16, #tpu.memory_space<vmem>>, vector<3x128xbf16>
    %cst = arith.constant dense<0.000000e+00> : vector<512x128xf32>
    %2 = tpu.matmul %0, %1, %cst {dimension_numbers = #tpu.dot_dimension_numbers<[1], [0], [0], [1], [0, 0, 1, 1], [], []>} : vector<512x3xbf16>, vector<3x128xbf16>, vector<512x128xf32> -> vector<512x128xf32>
    %c0_3 = arith.constant 0 : index
    %c0_4 = arith.constant 0 : index
    %3 = vector.load %arg3[%c0_3, %c0_4] : memref<1x128xf32, #tpu.memory_space<vmem>>, vector<1x128xf32>
    %4 = vector.broadcast %3 : vector<1x128xf32> to vector<512x128xf32>
    %5 = arith.addf %2, %4 : vector<512x128xf32>
    %cst_5 = arith.constant 0.000000e+00 : f32
    %6 = vector.broadcast %cst_5 : f32 to vector<512x128xf32>
    %7 = arith.maximumf %5, %6 : vector<512x128xf32>
    %8 = arith.truncf %7 : vector<512x128xf32> to vector<512x128xbf16>
    %c0_6 = arith.constant 0 : index
    %c0_7 = arith.constant 0 : index
    %c0_8 = arith.constant 0 : index
    %9 = vector.load %arg4[%c0_6, %c0_7, %c0_8] : memref<5x128x128xbf16, #tpu.memory_space<vmem>>, vector<1x128x128xbf16>
    %10 = vector.shape_cast %9 : vector<1x128x128xbf16> to vector<128x128xbf16>
    %cst_9 = arith.constant dense<0.000000e+00> : vector<512x128xf32>
    %11 = tpu.matmul %8, %10, %cst_9 {dimension_numbers = #tpu.dot_dimension_numbers<[1], [0], [0], [1], [0, 0, 1, 1], [], []>} : vector<512x128xbf16>, vector<128x128xbf16>, vector<512x128xf32> -> vector<512x128xf32>
    %c0_10 = arith.constant 0 : index
    %c0_11 = arith.constant 0 : index
    %c0_12 = arith.constant 0 : index
    %12 = vector.load %arg5[%c0_10, %c0_11, %c0_12] : memref<5x1x128xf32, #tpu.memory_space<vmem>>, vector<1x1x128xf32>
    %13 = vector.shape_cast %12 : vector<1x1x128xf32> to vector<1x128xf32>
    %14 = vector.broadcast %13 : vector<1x128xf32> to vector<512x128xf32>
    %15 = arith.addf %11, %14 : vector<512x128xf32>
    %cst_13 = arith.constant 0.000000e+00 : f32
    %16 = vector.broadcast %cst_13 : f32 to vector<512x128xf32>
    %17 = arith.maximumf %15, %16 : vector<512x128xf32>
    %18 = arith.truncf %17 : vector<512x128xf32> to vector<512x128xbf16>
    %c0_14 = arith.constant 0 : index
    %c0_15 = arith.constant 0 : index
    %c0_16 = arith.constant 0 : index
    %19 = vector.load %arg6[%c0_14, %c0_15, %c0_16] : memref<5x128x128xbf16, #tpu.memory_space<vmem>>, vector<1x128x128xbf16>
    %20 = vector.shape_cast %19 : vector<1x128x128xbf16> to vector<128x128xbf16>
    %cst_17 = arith.constant dense<0.000000e+00> : vector<512x128xf32>
    %21 = tpu.matmul %18, %20, %cst_17 {dimension_numbers = #tpu.dot_dimension_numbers<[1], [0], [0], [1], [0, 0, 1, 1], [], []>} : vector<512x128xbf16>, vector<128x128xbf16>, vector<512x128xf32> -> vector<512x128xf32>
    %c0_18 = arith.constant 0 : index
    %c0_19 = arith.constant 0 : index
    %c0_20 = arith.constant 0 : index
    %22 = vector.load %arg7[%c0_18, %c0_19, %c0_20] : memref<5x1x128xf32, #tpu.memory_space<vmem>>, vector<1x1x128xf32>
    %23 = vector.shape_cast %22 : vector<1x1x128xf32> to vector<1x128xf32>
    %24 = vector.broadcast %23 : vector<1x128xf32> to vector<512x128xf32>
    %25 = arith.addf %21, %24 : vector<512x128xf32>
    %26 = arith.addf %5, %25 : vector<512x128xf32>
    %cst_21 = arith.constant 0.000000e+00 : f32
    %27 = vector.broadcast %cst_21 : f32 to vector<512x128xf32>
    %28 = arith.maximumf %26, %27 : vector<512x128xf32>
    %29 = arith.truncf %28 : vector<512x128xf32> to vector<512x128xbf16>
    %c1 = arith.constant 1 : index
    %c0_22 = arith.constant 0 : index
    %c0_23 = arith.constant 0 : index
    %30 = vector.load %arg4[%c1, %c0_22, %c0_23] : memref<5x128x128xbf16, #tpu.memory_space<vmem>>, vector<1x128x128xbf16>
    %31 = vector.shape_cast %30 : vector<1x128x128xbf16> to vector<128x128xbf16>
    %cst_24 = arith.constant dense<0.000000e+00> : vector<512x128xf32>
    %32 = tpu.matmul %29, %31, %cst_24 {dimension_numbers = #tpu.dot_dimension_numbers<[1], [0], [0], [1], [0, 0, 1, 1], [], []>} : vector<512x128xbf16>, vector<128x128xbf16>, vector<512x128xf32> -> vector<512x128xf32>
    %c1_25 = arith.constant 1 : index
    %c0_26 = arith.constant 0 : index
    %c0_27 = arith.constant 0 : index
    %33 = vector.load %arg5[%c1_25, %c0_26, %c0_27] : memref<5x1x128xf32, #tpu.memory_space<vmem>>, vector<1x1x128xf32>
    %34 = vector.shape_cast %33 : vector<1x1x128xf32> to vector<1x128xf32>
    %35 = vector.broadcast %34 : vector<1x128xf32> to vector<512x128xf32>
    %36 = arith.addf %32, %35 : vector<512x128xf32>
    %cst_28 = arith.constant 0.000000e+00 : f32
    %37 = vector.broadcast %cst_28 : f32 to vector<512x128xf32>
    %38 = arith.maximumf %36, %37 : vector<512x128xf32>
    %39 = arith.truncf %38 : vector<512x128xf32> to vector<512x128xbf16>
    %c1_29 = arith.constant 1 : index
    %c0_30 = arith.constant 0 : index
    %c0_31 = arith.constant 0 : index
    %40 = vector.load %arg6[%c1_29, %c0_30, %c0_31] : memref<5x128x128xbf16, #tpu.memory_space<vmem>>, vector<1x128x128xbf16>
    %41 = vector.shape_cast %40 : vector<1x128x128xbf16> to vector<128x128xbf16>
    %cst_32 = arith.constant dense<0.000000e+00> : vector<512x128xf32>
    %42 = tpu.matmul %39, %41, %cst_32 {dimension_numbers = #tpu.dot_dimension_numbers<[1], [0], [0], [1], [0, 0, 1, 1], [], []>} : vector<512x128xbf16>, vector<128x128xbf16>, vector<512x128xf32> -> vector<512x128xf32>
    %c1_33 = arith.constant 1 : index
    %c0_34 = arith.constant 0 : index
    %c0_35 = arith.constant 0 : index
    %43 = vector.load %arg7[%c1_33, %c0_34, %c0_35] : memref<5x1x128xf32, #tpu.memory_space<vmem>>, vector<1x1x128xf32>
    %44 = vector.shape_cast %43 : vector<1x1x128xf32> to vector<1x128xf32>
    %45 = vector.broadcast %44 : vector<1x128xf32> to vector<512x128xf32>
    %46 = arith.addf %42, %45 : vector<512x128xf32>
    %47 = arith.addf %26, %46 : vector<512x128xf32>
    %cst_36 = arith.constant 0.000000e+00 : f32
    %48 = vector.broadcast %cst_36 : f32 to vector<512x128xf32>
    %49 = arith.maximumf %47, %48 : vector<512x128xf32>
    %50 = arith.truncf %49 : vector<512x128xf32> to vector<512x128xbf16>
    %c2 = arith.constant 2 : index
    %c0_37 = arith.constant 0 : index
    %c0_38 = arith.constant 0 : index
    %51 = vector.load %arg4[%c2, %c0_37, %c0_38] : memref<5x128x128xbf16, #tpu.memory_space<vmem>>, vector<1x128x128xbf16>
    %52 = vector.shape_cast %51 : vector<1x128x128xbf16> to vector<128x128xbf16>
    %cst_39 = arith.constant dense<0.000000e+00> : vector<512x128xf32>
    %53 = tpu.matmul %50, %52, %cst_39 {dimension_numbers = #tpu.dot_dimension_numbers<[1], [0], [0], [1], [0, 0, 1, 1], [], []>} : vector<512x128xbf16>, vector<128x128xbf16>, vector<512x128xf32> -> vector<512x128xf32>
    %c2_40 = arith.constant 2 : index
    %c0_41 = arith.constant 0 : index
    %c0_42 = arith.constant 0 : index
    %54 = vector.load %arg5[%c2_40, %c0_41, %c0_42] : memref<5x1x128xf32, #tpu.memory_space<vmem>>, vector<1x1x128xf32>
    %55 = vector.shape_cast %54 : vector<1x1x128xf32> to vector<1x128xf32>
    %56 = vector.broadcast %55 : vector<1x128xf32> to vector<512x128xf32>
    %57 = arith.addf %53, %56 : vector<512x128xf32>
    %cst_43 = arith.constant 0.000000e+00 : f32
    %58 = vector.broadcast %cst_43 : f32 to vector<512x128xf32>
    %59 = arith.maximumf %57, %58 : vector<512x128xf32>
    %60 = arith.truncf %59 : vector<512x128xf32> to vector<512x128xbf16>
    %c2_44 = arith.constant 2 : index
    %c0_45 = arith.constant 0 : index
    %c0_46 = arith.constant 0 : index
    %61 = vector.load %arg6[%c2_44, %c0_45, %c0_46] : memref<5x128x128xbf16, #tpu.memory_space<vmem>>, vector<1x128x128xbf16>
    %62 = vector.shape_cast %61 : vector<1x128x128xbf16> to vector<128x128xbf16>
    %cst_47 = arith.constant dense<0.000000e+00> : vector<512x128xf32>
    %63 = tpu.matmul %60, %62, %cst_47 {dimension_numbers = #tpu.dot_dimension_numbers<[1], [0], [0], [1], [0, 0, 1, 1], [], []>} : vector<512x128xbf16>, vector<128x128xbf16>, vector<512x128xf32> -> vector<512x128xf32>
    %c2_48 = arith.constant 2 : index
    %c0_49 = arith.constant 0 : index
    %c0_50 = arith.constant 0 : index
    %64 = vector.load %arg7[%c2_48, %c0_49, %c0_50] : memref<5x1x128xf32, #tpu.memory_space<vmem>>, vector<1x1x128xf32>
    %65 = vector.shape_cast %64 : vector<1x1x128xf32> to vector<1x128xf32>
    %66 = vector.broadcast %65 : vector<1x128xf32> to vector<512x128xf32>
    %67 = arith.addf %63, %66 : vector<512x128xf32>
    %68 = arith.addf %47, %67 : vector<512x128xf32>
    %cst_51 = arith.constant 0.000000e+00 : f32
    %69 = vector.broadcast %cst_51 : f32 to vector<512x128xf32>
    %70 = arith.maximumf %68, %69 : vector<512x128xf32>
    %71 = arith.truncf %70 : vector<512x128xf32> to vector<512x128xbf16>
    %c3 = arith.constant 3 : index
    %c0_52 = arith.constant 0 : index
    %c0_53 = arith.constant 0 : index
    %72 = vector.load %arg4[%c3, %c0_52, %c0_53] : memref<5x128x128xbf16, #tpu.memory_space<vmem>>, vector<1x128x128xbf16>
    %73 = vector.shape_cast %72 : vector<1x128x128xbf16> to vector<128x128xbf16>
    %cst_54 = arith.constant dense<0.000000e+00> : vector<512x128xf32>
    %74 = tpu.matmul %71, %73, %cst_54 {dimension_numbers = #tpu.dot_dimension_numbers<[1], [0], [0], [1], [0, 0, 1, 1], [], []>} : vector<512x128xbf16>, vector<128x128xbf16>, vector<512x128xf32> -> vector<512x128xf32>
    %c3_55 = arith.constant 3 : index
    %c0_56 = arith.constant 0 : index
    %c0_57 = arith.constant 0 : index
    %75 = vector.load %arg5[%c3_55, %c0_56, %c0_57] : memref<5x1x128xf32, #tpu.memory_space<vmem>>, vector<1x1x128xf32>
    %76 = vector.shape_cast %75 : vector<1x1x128xf32> to vector<1x128xf32>
    %77 = vector.broadcast %76 : vector<1x128xf32> to vector<512x128xf32>
    %78 = arith.addf %74, %77 : vector<512x128xf32>
    %cst_58 = arith.constant 0.000000e+00 : f32
    %79 = vector.broadcast %cst_58 : f32 to vector<512x128xf32>
    %80 = arith.maximumf %78, %79 : vector<512x128xf32>
    %81 = arith.truncf %80 : vector<512x128xf32> to vector<512x128xbf16>
    %c3_59 = arith.constant 3 : index
    %c0_60 = arith.constant 0 : index
    %c0_61 = arith.constant 0 : index
    %82 = vector.load %arg6[%c3_59, %c0_60, %c0_61] : memref<5x128x128xbf16, #tpu.memory_space<vmem>>, vector<1x128x128xbf16>
    %83 = vector.shape_cast %82 : vector<1x128x128xbf16> to vector<128x128xbf16>
    %cst_62 = arith.constant dense<0.000000e+00> : vector<512x128xf32>
    %84 = tpu.matmul %81, %83, %cst_62 {dimension_numbers = #tpu.dot_dimension_numbers<[1], [0], [0], [1], [0, 0, 1, 1], [], []>} : vector<512x128xbf16>, vector<128x128xbf16>, vector<512x128xf32> -> vector<512x128xf32>
    %c3_63 = arith.constant 3 : index
    %c0_64 = arith.constant 0 : index
    %c0_65 = arith.constant 0 : index
    %85 = vector.load %arg7[%c3_63, %c0_64, %c0_65] : memref<5x1x128xf32, #tpu.memory_space<vmem>>, vector<1x1x128xf32>
    %86 = vector.shape_cast %85 : vector<1x1x128xf32> to vector<1x128xf32>
    %87 = vector.broadcast %86 : vector<1x128xf32> to vector<512x128xf32>
    %88 = arith.addf %84, %87 : vector<512x128xf32>
    %89 = arith.addf %68, %88 : vector<512x128xf32>
    %cst_66 = arith.constant 0.000000e+00 : f32
    %90 = vector.broadcast %cst_66 : f32 to vector<512x128xf32>
    %91 = arith.maximumf %89, %90 : vector<512x128xf32>
    %92 = arith.truncf %91 : vector<512x128xf32> to vector<512x128xbf16>
    %c4 = arith.constant 4 : index
    %c0_67 = arith.constant 0 : index
    %c0_68 = arith.constant 0 : index
    %93 = vector.load %arg4[%c4, %c0_67, %c0_68] : memref<5x128x128xbf16, #tpu.memory_space<vmem>>, vector<1x128x128xbf16>
    %94 = vector.shape_cast %93 : vector<1x128x128xbf16> to vector<128x128xbf16>
    %cst_69 = arith.constant dense<0.000000e+00> : vector<512x128xf32>
    %95 = tpu.matmul %92, %94, %cst_69 {dimension_numbers = #tpu.dot_dimension_numbers<[1], [0], [0], [1], [0, 0, 1, 1], [], []>} : vector<512x128xbf16>, vector<128x128xbf16>, vector<512x128xf32> -> vector<512x128xf32>
    %c4_70 = arith.constant 4 : index
    %c0_71 = arith.constant 0 : index
    %c0_72 = arith.constant 0 : index
    %96 = vector.load %arg5[%c4_70, %c0_71, %c0_72] : memref<5x1x128xf32, #tpu.memory_space<vmem>>, vector<1x1x128xf32>
    %97 = vector.shape_cast %96 : vector<1x1x128xf32> to vector<1x128xf32>
    %98 = vector.broadcast %97 : vector<1x128xf32> to vector<512x128xf32>
    %99 = arith.addf %95, %98 : vector<512x128xf32>
    %cst_73 = arith.constant 0.000000e+00 : f32
    %100 = vector.broadcast %cst_73 : f32 to vector<512x128xf32>
    %101 = arith.maximumf %99, %100 : vector<512x128xf32>
    %102 = arith.truncf %101 : vector<512x128xf32> to vector<512x128xbf16>
    %c4_74 = arith.constant 4 : index
    %c0_75 = arith.constant 0 : index
    %c0_76 = arith.constant 0 : index
    %103 = vector.load %arg6[%c4_74, %c0_75, %c0_76] : memref<5x128x128xbf16, #tpu.memory_space<vmem>>, vector<1x128x128xbf16>
    %104 = vector.shape_cast %103 : vector<1x128x128xbf16> to vector<128x128xbf16>
    %cst_77 = arith.constant dense<0.000000e+00> : vector<512x128xf32>
    %105 = tpu.matmul %102, %104, %cst_77 {dimension_numbers = #tpu.dot_dimension_numbers<[1], [0], [0], [1], [0, 0, 1, 1], [], []>} : vector<512x128xbf16>, vector<128x128xbf16>, vector<512x128xf32> -> vector<512x128xf32>
    %c4_78 = arith.constant 4 : index
    %c0_79 = arith.constant 0 : index
    %c0_80 = arith.constant 0 : index
    %106 = vector.load %arg7[%c4_78, %c0_79, %c0_80] : memref<5x1x128xf32, #tpu.memory_space<vmem>>, vector<1x1x128xf32>
    %107 = vector.shape_cast %106 : vector<1x1x128xf32> to vector<1x128xf32>
    %108 = vector.broadcast %107 : vector<1x128xf32> to vector<512x128xf32>
    %109 = arith.addf %105, %108 : vector<512x128xf32>
    %110 = arith.addf %89, %109 : vector<512x128xf32>
    %cst_81 = arith.constant 0.000000e+00 : f32
    %111 = vector.broadcast %cst_81 : f32 to vector<512x128xf32>
    %112 = arith.maximumf %110, %111 : vector<512x128xf32>
    %c0_82 = arith.constant 0 : index
    %c0_83 = arith.constant 0 : index
    %113 = vector.load %arg8[%c0_82, %c0_83] : memref<1x128xbf16, #tpu.memory_space<vmem>>, vector<1x128xbf16>
    %114 = arith.extf %113 : vector<1x128xbf16> to vector<1x128xf32>
    %115 = vector.broadcast %114 : vector<1x128xf32> to vector<512x128xf32>
    %116 = arith.mulf %112, %115 : vector<512x128xf32>
    %cst_84 = arith.constant dense<0.000000e+00> : vector<512xf32>
    %117 = vector.multi_reduction <add>, %116, %cst_84 [1] : vector<512x128xf32> to vector<512xf32>
    %118 = vector.shape_cast %117 : vector<512xf32> to vector<512x1xf32>
    %c0_85 = arith.constant 0 : index
    %c0_86 = arith.constant 0 : index
    %119 = vector.load %arg9[%c0_85, %c0_86] : memref<1x1xf32, #tpu.memory_space<vmem>>, vector<1x1xf32>
    %120 = vector.broadcast %119 : vector<1x1xf32> to vector<512x1xf32>
    %121 = arith.addf %118, %120 : vector<512x1xf32>
    %c0_87 = arith.constant 0 : index
    %c0_88 = arith.constant 0 : index
    %122 = vector.load %arg10[%c0_87, %c0_88] : memref<512x1xf32, #tpu.memory_space<vmem>>, vector<512x1xf32>
    tpu.vector_store %arg10[%c0_87, %c0_88], %121 {strides = array<i32>} : memref<512x1xf32, #tpu.memory_space<vmem>>, vector<512x1xf32>,
    return
  }
  func.func @transform_0(%arg0: i32) -> (i32, i32) {
    %c0_i32 = arith.constant 0 : i32
    %c0_i32_0 = arith.constant 0 : i32
    return %arg0, %c0_i32 : i32, i32
  }
  func.func @transform_1(%arg0: i32) -> (i32, i32) {
    %c0_i32 = arith.constant 0 : i32
    %c0_i32_0 = arith.constant 0 : i32
    %c0_i32_1 = arith.constant 0 : i32
    return %c0_i32, %c0_i32_0 : i32, i32
  }
  func.func @transform_2(%arg0: i32) -> (i32, i32) {
    %c0_i32 = arith.constant 0 : i32
    %c0_i32_0 = arith.constant 0 : i32
    %c0_i32_1 = arith.constant 0 : i32
    return %c0_i32, %c0_i32_0 : i32, i32
  }
  func.func @transform_3(%arg0: i32) -> (i32, i32, i32) {
    %c0_i32 = arith.constant 0 : i32
    %c0_i32_0 = arith.constant 0 : i32
    %c0_i32_1 = arith.constant 0 : i32
    %c0_i32_2 = arith.constant 0 : i32
    return %c0_i32, %c0_i32_0, %c0_i32_1 : i32, i32, i32
  }
  func.func @transform_4(%arg0: i32) -> (i32, i32, i32) {
    %c0_i32 = arith.constant 0 : i32
    %c0_i32_0 = arith.constant 0 : i32
    %c0_i32_1 = arith.constant 0 : i32
    %c0_i32_2 = arith.constant 0 : i32
    return %c0_i32, %c0_i32_0, %c0_i32_1 : i32, i32, i32
  }
  func.func @transform_5(%arg0: i32) -> (i32, i32, i32) {
    %c0_i32 = arith.constant 0 : i32
    %c0_i32_0 = arith.constant 0 : i32
    %c0_i32_1 = arith.constant 0 : i32
    %c0_i32_2 = arith.constant 0 : i32
    return %c0_i32, %c0_i32_0, %c0_i32_1 : i32, i32, i32
  }
  func.func @transform_6(%arg0: i32) -> (i32, i32, i32) {
    %c0_i32 = arith.constant 0 : i32
    %c0_i32_0 = arith.constant 0 : i32
    %c0_i32_1 = arith.constant 0 : i32
    %c0_i32_2 = arith.constant 0 : i32
    return %c0_i32, %c0_i32_0, %c0_i32_1 : i32, i32, i32
  }
  func.func @transform_7(%arg0: i32) -> (i32, i32) {
    %c0_i32 = arith.constant 0 : i32
    %c0_i32_0 = arith.constant 0 : i32
    %c0_i32_1 = arith.constant 0 : i32
    return %c0_i32, %c0_i32_0 : i32, i32
  }
  func.func @transform_8(%arg0: i32) -> (i32, i32) {
    %c0_i32 = arith.constant 0 : i32
    %c0_i32_0 = arith.constant 0 : i32
    %c0_i32_1 = arith.constant 0 : i32
    return %c0_i32, %c0_i32_0 : i32, i32
  }
  func.func @transform_9(%arg0: i32) -> (i32, i32) {
    %c0_i32 = arith.constant 0 : i32
    %c0_i32_0 = arith.constant 0 : i32
    return %arg0, %c0_i32 : i32, i32
  }
}

</mosaic_0001>

<bundles_post_ra>
// kernel: tpu_custom_call.1
= control target key start
LH: loop header
LB: loop body
LE: loop exit
PB: predicated region body
PF: predicated region fallthrough
CT: control target
= control target key end

     0   :  { %s8101_s11 = smov 0   ;;  %s10825_s0 = inlined_call_operand.vmem [shape: bf16[2048,3], index: 0, kind: input, shape index: {}]   ;;  %s10826_s1 = inlined_call_operand.vmem [shape: bf16[3,128], index: 1, kind: input, shape index: {}]   ;;  %s10827_s2 = inlined_call_operand.vmem [shape: f32[1,128], index: 2, kind: input, shape index: {}]   ;;  %s10828_s3 = inlined_call_operand.vmem [shape: bf16[5,128,128], index: 3, kind: input, shape index: {}]   ;;  %s10829_s4 = inlined_call_operand.vmem [shape: f32[5,1,128], index: 4, kind: input, shape index: {}]   ;;  %s10830_s5 = inlined_call_operand.vmem [shape: bf16[5,128,128], index: 5, kind: input, shape index: {}]   ;;  %s10831_s6 = inlined_call_operand.vmem [shape: f32[5,1,128], index: 6, kind: input, shape index: {}]   ;;  %s10832_s7 = inlined_call_operand.vmem [shape: bf16[1,128], index: 7, kind: input, shape index: {}]   ;;  %s10833_s8 = inlined_call_operand.<no memory space> [shape: f32[1,1], index: 8, kind: input, shape index: {}]   ;;  %s10834_s9 = inlined_call_operand.vmem [shape: f32[2048,1], index: 9, kind: output, shape index: {}]  }
   0x1   :  { %v14_v0 = vstv %s10833_s8 }
   0x2   :  { %15 = vst [vmem:[#allocation2] sm:$0x1] %v14_v0 }
   0x3 LB: > { %s6314_s12 = sadd.s32 4294967295, %s8045_s11   ;;  %p6318_p0 = scmp.ge.s32.totalorder %s8045_s11, 1  ;;  %s8045_s11 = sphi %s8101_s11, %s21_s11  }
   0x4   : > { %p290_p1 = scmp.lt.s32.totalorder %s8045_s11, 5 }
   0x6   : > { %p291_p2 = pnand %p6318_p0, %p290_p1 }
   0x8   : > { %294 = sbr.rel (%p291_p2) target bundleno = 2744 (0xab8), region = 56 }
   0xf   : > { %v403_v1 = vld [vmem:[%s10826_s1] sm:$0x3]  ;;  %vm668_vm0 = vcmask 1040384   ;;  %vm669_vm1 = vcmask 1041408   ;;  %s6319_s8 = sshll.u32 %s6314_s12, 6  ;;  %v8047_v2 = vmov 65535  }
  0x10   : > { %v670_v3 = vsel %vm668_vm0, 4294967295, %v8047_v2  ;;  %p327_p3 = scmp.lt.s32.totalorder %s6319_s8, 255  ;;  %v7959_v6 = vld [vmem:[%s10828_s3] sm:$0xff]   ;;  %vm571_vm2 = vcmask 23552   ;;  %v7960_v15 = vld [vmem:[%s10828_s3 + $0x8] sm:$0xff]   ;;  %v7961_v18 = vld [vmem:[%s10828_s3 + $0x10] sm:$0xff]  }
  0x11   : > { %v671_v4 = vsel %vm669_vm1, %v670_v3, 0  ;;  %v7962_v23 = vld [vmem:[%s10828_s3 + $0x18] sm:$0xff]   ;;  %v7963_v24 = vld [vmem:[%s10828_s3 + $0x20] sm:$0xff]   ;;  %v7964_v29 = vld [vmem:[%s10828_s3 + $0x28] sm:$0xff]   ;;  %vm6193_vm3 = vcmask 7168  }
  0x12   : > { %v673_v5 = vand.u32 %v671_v4, %v403_v1  ;;  %s11136_s8 = smov (!%p327_p3, %s6319_s8), 255  ;;  %v7965_v30 = vld [vmem:[%s10828_s3 + $0x30] sm:$0xff]   ;;  %v7966_v45 = vld [vmem:[%s10828_s3 + $0x38] sm:$0xff]   ;;  %v8211_v46 = vld [vmem:[%s10827_s2] ss:$0 sm:$0xff] }
  0x13   : > { %s6320_s17 = sshll.u32 %s11136_s8, 2  ;;  %v7967_v54 = vld [vmem:[%s10830_s5] sm:$0xff]   ;;  %v7968_v55 = vld [vmem:[%s10830_s5 + $0x8] sm:$0xff]   ;;  %v7969_v61 = vld [vmem:[%s10830_s5 + $0x10] sm:$0xff]   ;;  %s6322_s23 = sshll.u32 %s11136_s8, 3 }
  0x14   : > { %7050 = vmatprep.subr.bf16.mxu0 %v673_v5  ;;  %7916 = vmatprep.subr.bf16.mxu1 %v673_v5  ;;  %s8121_s20 = scalar_lea.vmem %s10825_s0, %s6320_s17  ;;  %s10628_s26 = scalar_lea.vmem %s10834_s9, %s6322_s23 }
  0x15   : > { %7051 = vmatpush3.bf16.msra.mxu0 %v673_v5  ;;  %7917 = vmatpush3.bf16.msra.mxu1 %v673_v5  ;;  %v7927_v7 = vld [vmem:[%s8121_s20] sm:$0xff]   ;;  %v7928_v8 = vld [vmem:[%s8121_s20 + $0x8] sm:$0xff]   ;;  %v7929_v9 = vld [vmem:[%s8121_s20 + $0x10] sm:$0xff]  }
  0x16   : > { %7116 = vmatprep.subr.bf16.mxu1 %v7959_v6  ;;  %7052 = vmatprep.mubr.msk.bf16.mxu0 %vm571_vm2, %v7927_v7  ;;  %v7930_v10 = vld [vmem:[%s8121_s20 + $0x18] sm:$0xff]   ;;  %v7931_v11 = vld [vmem:[%s8121_s20 + $0x20] sm:$0xff]   ;;  %v7932_v12 = vld [vmem:[%s8121_s20 + $0x28] sm:$0xff]  }
  0x17   : > { %v7933_v13 = vld [vmem:[%s8121_s20 + $0x30] sm:$0xff]   ;;  %v7943_v14 = vld [vmem:[%s8121_s20 + $0x80] sm:$0xff]   ;;  %v7944_v16 = vld [vmem:[%s8121_s20 + $0x88] sm:$0xff]   ;;  %7196 = vmatprep.subr.bf16.mxu0 %v7967_v54 }
  0x18   : > { %7053 = vmatmul.mubr.msk.bf16.vlgmr.msra.gmra.mrb[0].mxu0 %vm571_vm2, %v7928_v8  ;;  %7084 = vmatprep.mubr.msk.bf16.mxu1 %vm571_vm2, %v7943_v14  ;;  %v7945_v17 = vld [vmem:[%s8121_s20 + $0x90] sm:$0xff]   ;;  %v7934_v19 = vld [vmem:[%s8121_s20 + $0x38] sm:$0xff]   ;;  %v7935_v20 = vld [vmem:[%s8121_s20 + $0x40] sm:$0xff]  }
  0x19   : > { %7056 = vmatprep.mubr.msk.bf16.mxu0 %vm571_vm2, %v7929_v9  ;;  %7085 = vmatmul.mubr.msk.bf16.vlgmr.msra.gmra.mrb[0].mxu1 %vm571_vm2, %v7944_v16  ;;  %v7946_v21 = vld [vmem:[%s8121_s20 + $0x98] sm:$0xff]   ;;  %v7947_v22 = vld [vmem:[%s8121_s20 + $0xa0] sm:$0xff]   ;;  %v7936_v25 = vld [vmem:[%s8121_s20 + $0x48] sm:$0xff]  }
  0x1a   : > { %7088 = vmatprep.mubr.msk.bf16.mxu1 %vm571_vm2, %v7945_v17  ;;  %7117 = vmatpush3.bf16.msra.mxu1 %v7959_v6  ;;  %v7937_v26 = vld [vmem:[%s8121_s20 + $0x50] sm:$0xff]   ;;  %v7948_v27 = vld [vmem:[%s8121_s20 + $0xa8] sm:$0xff]   ;;  %v7938_v31 = vld [vmem:[%s8121_s20 + $0x58] sm:$0xff]  }
  0x1b   : > { %7118 = vmatprep.subr.bf16.mxu1 %v7960_v15  ;;  %v7949_v28 = vld [vmem:[%s8121_s20 + $0xb0] sm:$0xff]   ;;  %v7950_v32 = vld [vmem:[%s8121_s20 + $0xb8] sm:$0xff]   ;;  %v7939_v33 = vld [vmem:[%s8121_s20 + $0x60] sm:$0xff]   ;;  %7197 = vmatpush3.bf16.msra.mxu0 %v7967_v54 }
  0x1c   : > { %v7951_v34 = vld [vmem:[%s8121_s20 + $0xc0] sm:$0xff]   ;;  %v7940_v35 = vld [vmem:[%s8121_s20 + $0x68] sm:$0xff]   ;;  %v7941_v37 = vld [vmem:[%s8121_s20 + $0x70] sm:$0xff]   ;;  %7198 = vmatprep.subr.bf16.mxu0 %v7968_v55 }
  0x1d   : > { %v7952_v36 = vld [vmem:[%s8121_s20 + $0xc8] sm:$0xff]   ;;  %v7953_v38 = vld [vmem:[%s8121_s20 + $0xd0] sm:$0xff]   ;;  %v7942_v39 = vld [vmem:[%s8121_s20 + $0x78] sm:$0xff]  }
  0x1e   : > { %7119 = vmatpush3.bf16.msra.mxu1 %v7960_v15  ;;  %v7954_v40 = vld [vmem:[%s8121_s20 + $0xd8] sm:$0xff]   ;;  %v7955_v41 = vld [vmem:[%s8121_s20 + $0xe0] sm:$0xff]   ;;  %v7956_v42 = vld [vmem:[%s8121_s20 + $0xe8] sm:$0xff]  }
  0x1f   : > { %7120 = vmatprep.subr.bf16.mxu1 %v7961_v18  ;;  %v7957_v43 = vld [vmem:[%s8121_s20 + $0xf0] sm:$0xff]   ;;  %v7958_v44 = vld [vmem:[%s8121_s20 + $0xf8] sm:$0xff]   ;;  %7199 = vmatpush3.bf16.msra.mxu0 %v7968_v55 }
  0x20   : > { %7057 = vmatmul.mubr.msk.bf16.gmra.mrb[4].mxu0 %vm571_vm2, %v7930_v10  ;;  %7200 = vmatprep.subr.bf16.mxu0 %v7969_v61  ;;  %v7970_v7 = vld [vmem:[%s10830_s5 + $0x18] sm:$0xff]  }
  0x21   : > { %7060 = vmatprep.mubr.msk.bf16.mxu0 %vm571_vm2, %v7931_v11  ;;  %7089 = vmatmul.mubr.msk.bf16.gmra.mrb[4].mxu1 %vm571_vm2, %v7946_v21 }
  0x22   : > { %7092 = vmatprep.mubr.msk.bf16.mxu1 %vm571_vm2, %v7947_v22  ;;  %7121 = vmatpush3.bf16.msra.mxu1 %v7961_v18 }
  0x23   : > { %7122 = vmatprep.subr.bf16.mxu1 %v7962_v23  ;;  %7201 = vmatpush3.bf16.msra.mxu0 %v7969_v61 }
  0x24   : > { %7202 = vmatprep.subr.bf16.mxu0 %v7970_v7 }
  0x26   : > { %7123 = vmatpush3.bf16.msra.mxu1 %v7962_v23 }
  0x27   : > { %7124 = vmatprep.subr.bf16.mxu1 %v7963_v24  ;;  %7203 = vmatpush3.bf16.msra.mxu0 %v7970_v7 }
  0x28   : > { %7061 = vmatmul.mubr.msk.bf16.gmra.mrb[8].mxu0 %vm571_vm2, %v7932_v12 }
  0x29   : > { %7064 = vmatprep.mubr.msk.bf16.mxu0 %vm571_vm2, %v7933_v13  ;;  %7093 = vmatmul.mubr.msk.bf16.gmra.mrb[8].mxu1 %vm571_vm2, %v7948_v27  ;;  %v7971_v13 = vld [vmem:[%s10830_s5 + $0x20] sm:$0xff]   ;;  %v7972_v27 = vld [vmem:[%s10830_s5 + $0x28] sm:$0xff]  }
  0x2a   : > { %7096 = vmatprep.mubr.msk.bf16.mxu1 %vm571_vm2, %v7949_v28  ;;  %7125 = vmatpush3.bf16.msra.mxu1 %v7963_v24 }
  0x2b   : > { %7126 = vmatprep.subr.bf16.mxu1 %v7964_v29  ;;  %7204 = vmatprep.subr.bf16.mxu0 %v7971_v13 }
  0x2c   : > { %7205 = vmatpush3.bf16.msra.mxu0 %v7971_v13 }
  0x2d   : > { %7206 = vmatprep.subr.bf16.mxu0 %v7972_v27 }
  0x2e   : > { %7127 = vmatpush3.bf16.msra.mxu1 %v7964_v29 }
  0x2f   : > { %7128 = vmatprep.subr.bf16.mxu1 %v7965_v30 }
  0x30   : > { %7065 = vmatmul.mubr.msk.bf16.gmra.mrb[12].mxu0 %vm571_vm2, %v7934_v19 }
  0x31   : > { %7068 = vmatprep.mubr.msk.bf16.mxu0 %vm571_vm2, %v7935_v20  ;;  %7097 = vmatmul.mubr.msk.bf16.gmra.mrb[12].mxu1 %vm571_vm2, %v7950_v32 }
  0x32   : > { %7100 = vmatprep.mubr.msk.bf16.mxu1 %vm571_vm2, %v7951_v34  ;;  %7129 = vmatpush3.bf16.msra.mxu1 %v7965_v30 }
  0x33   : > { %7130 = vmatprep.subr.bf16.mxu1 %v7966_v45  ;;  %7207 = vmatpush3.bf16.msra.mxu0 %v7972_v27 }
  0x36   : > { %7131 = vmatpush3.bf16.msra.mxu1 %v7966_v45 }
  0x38   : > { %7069 = vmatmul.mubr.msk.bf16.gmra.mrb[16].mxu0 %vm571_vm2, %v7936_v25 }
  0x39   : > { %7072 = vmatprep.mubr.msk.bf16.mxu0 %vm571_vm2, %v7937_v26  ;;  %7101 = vmatmul.mubr.msk.bf16.gmra.mrb[16].mxu1 %vm571_vm2, %v7952_v36 }
  0x3a   : > { %7104 = vmatprep.mubr.msk.bf16.mxu1 %vm571_vm2, %v7953_v38 }
  0x40   : > { %7073 = vmatmul.mubr.msk.bf16.gmra.mrb[20].mxu0 %vm571_vm2, %v7938_v31 }
  0x41   : > { %7076 = vmatprep.mubr.msk.bf16.mxu0 %vm571_vm2, %v7939_v33  ;;  %7105 = vmatmul.mubr.msk.bf16.gmra.mrb[20].mxu1 %vm571_vm2, %v7954_v40  ;;  %v7973_v33 = vld [vmem:[%s10830_s5 + $0x30] sm:$0xff]  }
  0x42   : > { %7108 = vmatprep.mubr.msk.bf16.mxu1 %vm571_vm2, %v7955_v41  ;;  %7208 = vmatprep.subr.bf16.mxu0 %v7973_v33 }
  0x43   : > { %7209 = vmatpush3.bf16.msra.mxu0 %v7973_v33 }
  0x48   : > { %7077 = vmatmul.mubr.msk.bf16.gmra.mrb[24].mxu0 %vm571_vm2, %v7940_v35 }
  0x49   : > { %7080 = vmatprep.mubr.msk.bf16.mxu0 %vm571_vm2, %v7941_v37  ;;  %7109 = vmatmul.mubr.msk.bf16.gmra.mrb[24].mxu1 %vm571_vm2, %v7956_v42 }
  0x4a   : > { %7112 = vmatprep.mubr.msk.bf16.mxu1 %vm571_vm2, %v7957_v43 }
  0x50   : > { %7081 = vmatmul.mubr.msk.bf16.gmra.mrb[28].mxu0 %vm571_vm2, %v7942_v39 }
  0x51   : > { %7113 = vmatmul.mubr.msk.bf16.gmra.mrb[28].mxu1 %vm571_vm2, %v7958_v44 }
  0xeb   : > { %v7054_v47 = vpop.f32.mrb[0].mxu0 }
  0xec   : > { %v709_v48 = vpop.f32.mrb[1].mxu0  ;;  %v8217_v51 = vadd.f32 %v7054_v47, %v8211_v46  ;;  %v8260_v16 = vpop.f32.mrb[0].mxu1 }
  0xed   : > { %v8214_v49 = vadd.f32 %v8211_v46, %v709_v48  ;;  %v7055_v50 = vpop.f32.mrb[2].mxu0  ;;  %v8262_v19 = vpop.f32.mrb[1].mxu1 }
  0xee   : > { %v8220_v52 = vadd.f32 %v7055_v50, %v8211_v46  ;;  %v712_v53 = vpop.f32.mrb[3].mxu0  ;;  %v966_v60 = vmax.f32 %v8217_v51, 0.0  ;;  %v8267_v22 = vpop.f32.mrb[2].mxu1 }
  0xef   : > { %v8229_v56 = vadd.f32 %v8211_v46, %v712_v53  ;;  %v964_v58 = vmax.f32 %v8214_v49, 0.0  ;;  %v8275_v26 = vpop.f32.mrb[3].mxu1 }
  0xf0   : > { %v967_v57 = vmax.f32 %v8220_v52, 0.0 }
  0xf1   : > { %v965_v59 = vmax.f32 %v8229_v56, 0.0 }
  0xf2   : > { %v1029_v0 = vpack.c.bf16 %v967_v57, %v966_v60 }
  0xf3   : > { %v7058_v62 = vpop.f32.mrb[4].mxu0  ;;  %v1028_v63 = vpack.c.bf16 %v965_v59, %v964_v58 }
  0xf4   : > { %v725_v1 = vpop.f32.mrb[5].mxu0  ;;  %v8242_v4 = vadd.f32 %v7058_v62, %v8211_v46  ;;  %v8290_v36 = vpop.f32.mrb[4].mxu1 }
  0xf5   : > { %v8239_v2 = vadd.f32 %v8211_v46, %v725_v1  ;;  %v7059_v3 = vpop.f32.mrb[6].mxu0  ;;  %7132 = vmatprep.mubr.bf16.mxu1 %v1028_v63  ;;  %v8292_v39 = vpop.f32.mrb[5].mxu1 }
  0xf6   : > { %v8245_v5 = vadd.f32 %v7059_v3, %v8211_v46  ;;  %v728_v6 = vpop.f32.mrb[7].mxu0  ;;  %7133 = vmatmul.mubr.bf16.vlgmr.msra.gmra.mrb[32].mxu1 %v1029_v0  ;;  %v970_v12 = vmax.f32 %v8242_v4, 0.0  ;;  %v8297_v42 = vpop.f32.mrb[6].mxu1 }
  0xf7   : > { %v8251_v8 = vadd.f32 %v8211_v46, %v728_v6  ;;  %v968_v10 = vmax.f32 %v8239_v2, 0.0  ;;  %v8305_v47 = vpop.f32.mrb[7].mxu1 }
  0xf8   : > { %v971_v9 = vmax.f32 %v8245_v5, 0.0 }
  0xf9   : > { %v969_v11 = vmax.f32 %v8251_v8, 0.0 }
  0xfa   : > { %v1031_v18 = vpack.c.bf16 %v971_v9, %v970_v12 }
  0xfb   : > { %v7062_v14 = vpop.f32.mrb[8].mxu0  ;;  %v1030_v15 = vpack.c.bf16 %v969_v11, %v968_v10 }
  0xfc   : > { %v741_v17 = vpop.f32.mrb[9].mxu0  ;;  %v8270_v23 = vadd.f32 %v7062_v14, %v8211_v46  ;;  %v8314_v59 = vpop.f32.mrb[8].mxu1 }
  0xfd   : > { %v8265_v20 = vadd.f32 %v8211_v46, %v741_v17  ;;  %v7063_v21 = vpop.f32.mrb[10].mxu0  ;;  %7136 = vmatprep.mubr.bf16.mxu1 %v1030_v15  ;;  %v8316_v62 = vpop.f32.mrb[9].mxu1 }
  0xfe   : > { %v8273_v24 = vadd.f32 %v7063_v21, %v8211_v46  ;;  %v744_v25 = vpop.f32.mrb[11].mxu0  ;;  %7137 = vmatmul.mubr.bf16.gmra.mrb[36].mxu1 %v1031_v18  ;;  %v974_v32 = vmax.f32 %v8270_v23, 0.0  ;;  %v8321_v1 = vpop.f32.mrb[10].mxu1 }
  0xff   : > { %v8281_v28 = vadd.f32 %v8211_v46, %v744_v25  ;;  %v972_v30 = vmax.f32 %v8265_v20, 0.0  ;;  %v8329_v9 = vpop.f32.mrb[11].mxu1 }
 0x100   : > { %v975_v29 = vmax.f32 %v8273_v24, 0.0 }
 0x101   : > { %v973_v31 = vmax.f32 %v8281_v28, 0.0 }
 0x102   : > { %v1033_v38 = vpack.c.bf16 %v975_v29, %v974_v32 }
 0x103   : > { %v7066_v34 = vpop.f32.mrb[12].mxu0  ;;  %v1032_v35 = vpack.c.bf16 %v973_v31, %v972_v30 }
 0x104   : > { %v757_v37 = vpop.f32.mrb[13].mxu0  ;;  %v8300_v43 = vadd.f32 %v7066_v34, %v8211_v46  ;;  %v8338_v18 = vpop.f32.mrb[12].mxu1 }
 0x105   : > { %v8295_v40 = vadd.f32 %v8211_v46, %v757_v37  ;;  %v7067_v41 = vpop.f32.mrb[14].mxu0  ;;  %7140 = vmatprep.mubr.bf16.mxu1 %v1032_v35  ;;  %v8340_v27 = vpop.f32.mrb[13].mxu1 }
 0x106   : > { %v8303_v44 = vadd.f32 %v7067_v41, %v8211_v46  ;;  %v760_v45 = vpop.f32.mrb[15].mxu0  ;;  %7141 = vmatmul.mubr.bf16.gmra.mrb[40].mxu1 %v1033_v38  ;;  %v978_v55 = vmax.f32 %v8300_v43, 0.0  ;;  %v8345_v31 = vpop.f32.mrb[14].mxu1 }
 0x107   : > { %v8308_v48 = vadd.f32 %v8211_v46, %v760_v45  ;;  %v976_v53 = vmax.f32 %v8295_v40, 0.0  ;;  %v8353_v35 = vpop.f32.mrb[15].mxu1 }
 0x108   : > { %v979_v50 = vmax.f32 %v8303_v44, 0.0 }
 0x109   : > { %v977_v54 = vmax.f32 %v8308_v48, 0.0 }
 0x10a   : > { %v1035_v61 = vpack.c.bf16 %v979_v50, %v978_v55 }
 0x10b   : > { %v7070_v57 = vpop.f32.mrb[16].mxu0  ;;  %v1034_v58 = vpack.c.bf16 %v977_v54, %v976_v53 }
 0x10c   : > { %v773_v60 = vpop.f32.mrb[17].mxu0  ;;  %v8324_v3 = vadd.f32 %v7070_v57, %v8211_v46  ;;  %v8362_v55 = vpop.f32.mrb[16].mxu1 }
 0x10d   : > { %v8319_v63 = vadd.f32 %v8211_v46, %v773_v60  ;;  %v7071_v0 = vpop.f32.mrb[18].mxu0  ;;  %7144 = vmatprep.mubr.bf16.mxu1 %v1034_v58  ;;  %v8364_v60 = vpop.f32.mrb[17].mxu1 }
 0x10e   : > { %v8327_v6 = vadd.f32 %v7071_v0, %v8211_v46  ;;  %v776_v7 = vpop.f32.mrb[19].mxu0  ;;  %7145 = vmatmul.mubr.bf16.gmra.mrb[44].mxu1 %v1035_v61  ;;  %v982_v14 = vmax.f32 %v8324_v3, 0.0 }
 0x10f   : > { %v8332_v10 = vadd.f32 %v8211_v46, %v776_v7  ;;  %v980_v12 = vmax.f32 %v8319_v63, 0.0  ;;  %v8369_v7 = vpop.f32.mrb[18].mxu1 }
 0x110   : > { %v983_v11 = vmax.f32 %v8327_v6, 0.0 }
 0x111   : > { %v981_v13 = vmax.f32 %v8332_v10, 0.0 }
 0x112   : > { %v1037_v25 = vpack.c.bf16 %v983_v11, %v982_v14  ;;  %v8377_v14 = vpop.f32.mrb[19].mxu1 }
 0x113   : > { %v7074_v15 = vpop.f32.mrb[20].mxu0  ;;  %v1036_v17 = vpack.c.bf16 %v981_v13, %v980_v12 }
 0x114   : > { %v789_v21 = vpop.f32.mrb[21].mxu0  ;;  %v8348_v32 = vadd.f32 %v7074_v15, %v8211_v46 }
 0x115   : > { %v8343_v29 = vadd.f32 %v8211_v46, %v789_v21  ;;  %v7075_v30 = vpop.f32.mrb[22].mxu0  ;;  %7148 = vmatprep.mubr.bf16.mxu1 %v1036_v17 }
 0x116   : > { %v8351_v33 = vadd.f32 %v7075_v30, %v8211_v46  ;;  %v792_v34 = vpop.f32.mrb[23].mxu0  ;;  %7149 = vmatmul.mubr.bf16.gmra.mrb[48].mxu1 %v1037_v25  ;;  %v986_v50 = vmax.f32 %v8348_v32, 0.0 }
 0x117   : > { %v8356_v37 = vadd.f32 %v8211_v46, %v792_v34  ;;  %v984_v41 = vmax.f32 %v8343_v29, 0.0 }
 0x118   : > { %v987_v38 = vmax.f32 %v8351_v33, 0.0 }
 0x119   : > { %v985_v45 = vmax.f32 %v8356_v37, 0.0 }
 0x11a   : > { %v1039_v58 = vpack.c.bf16 %v987_v38, %v986_v50  ;;  %v8394_v50 = vpop.f32.mrb[20].mxu1 }
 0x11b   : > { %v7078_v53 = vpop.f32.mrb[24].mxu0  ;;  %v1038_v54 = vpack.c.bf16 %v985_v45, %v984_v41  ;;  %v8388_v41 = vadd.f32 %v8211_v46, %v8262_v19  ;;  %v8392_v45 = vadd.f32 %v8211_v46, %v8275_v26 }
 0x11c   : > { %v805_v57 = vpop.f32.mrb[25].mxu0  ;;  %v8372_v11 = vadd.f32 %v7078_v53, %v8211_v46 }
 0x11d   : > { %v8367_v61 = vadd.f32 %v8211_v46, %v805_v57  ;;  %v7079_v0 = vpop.f32.mrb[26].mxu0  ;;  %7152 = vmatprep.mubr.bf16.mxu1 %v1038_v54  ;;  %10938 = vst [vmem:[#allocation6_spill] sm:$0xff] %v8388_v41  ;;  %10939 = vst [vmem:[#allocation7_spill] sm:$0xff] %v8392_v45  ;;  %v8396_v57 = vpop.f32.mrb[21].mxu1 }
 0x11e   : > { %10935 = vst [vmem:[#allocation3_spill] sm:$0xff] %v8372_v11  ;;  %v8375_v12 = vadd.f32 %v7079_v0, %v8211_v46  ;;  %v808_v13 = vpop.f32.mrb[27].mxu0  ;;  %7153 = vmatmul.mubr.bf16.gmra.mrb[52].mxu1 %v1039_v58  ;;  %v990_v30 = vmax.f32 %v8372_v11, 0.0 }
 0x11f   : > { %v8380_v15 = vadd.f32 %v8211_v46, %v808_v13  ;;  %v988_v21 = vmax.f32 %v8367_v61, 0.0  ;;  %v8401_v13 = vpop.f32.mrb[22].mxu1 }
 0x120   : > { %10936 = vst [vmem:[#allocation4_spill] sm:$0xff] %v8375_v12  ;;  %v991_v17 = vmax.f32 %v8375_v12, 0.0 }
 0x121   : > { %10937 = vst [vmem:[#allocation5_spill] sm:$0xff] %v8380_v15  ;;  %v989_v25 = vmax.f32 %v8380_v15, 0.0 }
 0x122   : > { %v1041_v54 = vpack.c.bf16 %v991_v17, %v990_v30  ;;  %v996_v30 = vmax.f32 %v8388_v41, 0.0 }
 0x123   : > { %v7082_v34 = vpop.f32.mrb[28].mxu0  ;;  %v1040_v38 = vpack.c.bf16 %v989_v25, %v988_v21  ;;  %v8409_v25 = vpop.f32.mrb[23].mxu1 }
 0x124   : > { %v821_v53 = vpop.f32.mrb[29].mxu0  ;;  %v8404_v19 = vadd.f32 %v7082_v34, %v8211_v46  ;;  %v8428_v41 = vpop.f32.mrb[24].mxu1 }
 0x125   : > { %v8399_v58 = vadd.f32 %v8211_v46, %v821_v53  ;;  %v7083_v0 = vpop.f32.mrb[30].mxu0  ;;  %7156 = vmatprep.mubr.bf16.mxu1 %v1040_v38  ;;  %v997_v53 = vmax.f32 %v8392_v45, 0.0  ;;  %v8432_v45 = vadd.f32 %v8260_v16, %v8211_v46 }
 0x126   : > { %v8407_v21 = vadd.f32 %v7083_v0, %v8211_v46  ;;  %v824_v26 = vpop.f32.mrb[31].mxu0  ;;  %7157 = vmatmul.mubr.bf16.gmra.mrb[56].mxu1 %v1041_v54  ;;  %v994_v0 = vmax.f32 %v8404_v19, 0.0  ;;  %v8422_v54 = vadd.f32 %v8211_v46, %v8292_v39 }
 0x127   : > { %v8412_v17 = vadd.f32 %v8211_v46, %v824_v26  ;;  %v992_v15 = vmax.f32 %v8399_v58, 0.0  ;;  %v1044_v11 = vpack.c.bf16 %v997_v53, %v996_v30  ;;  %v8426_v26 = vadd.f32 %v8211_v46, %v8305_v47  ;;  %10944 = vst [vmem:[#allocation12_spill] sm:$0xff] %v8432_v45 }
 0x128   : > { %10940 = vst [vmem:[#allocation8_spill] sm:$0xff] %v8407_v21  ;;  %v995_v38 = vmax.f32 %v8407_v21, 0.0  ;;  %10942 = vst [vmem:[#allocation10_spill] sm:$0xff] %v8422_v54  ;;  %v1000_v47 = vmax.f32 %v8422_v54, 0.0  ;;  %v998_v16 = vmax.f32 %v8432_v45, 0.0  ;;  %v8474_v45 = vadd.f32 %v8211_v46, %v8340_v27 }
 0x129   : > { %10941 = vst [vmem:[#allocation9_spill] sm:$0xff] %v8412_v17  ;;  %v993_v34 = vmax.f32 %v8412_v17, 0.0  ;;  %10943 = vst [vmem:[#allocation11_spill] sm:$0xff] %v8426_v26  ;;  %v8436_v17 = vadd.f32 %v8267_v22, %v8211_v46  ;;  %v1001_v53 = vmax.f32 %v8426_v26, 0.0  ;;  %v8450_v22 = vadd.f32 %v8211_v46, %v8316_v62 }
 0x12b   : > { %v1042_v12 = vpack.c.bf16 %v993_v34, %v992_v15  ;;  %10945 = vst [vmem:[#allocation13_spill] sm:$0xff] %v8436_v17  ;;  %v1043_v15 = vpack.c.bf16 %v995_v38, %v994_v0  ;;  %v8438_v34 = vpop.f32.mrb[25].mxu1  ;;  %v999_v21 = vmax.f32 %v8436_v17, 0.0  ;;  %v1046_v38 = vpack.c.bf16 %v1001_v53, %v1000_v47 }
 0x12c   : > { %v8440_v39 = vpop.f32.mrb[26].mxu1  ;;  %v1004_v47 = vmax.f32 %v8450_v22, 0.0 }
 0x12d   : > { %7160 = vmatprep.mubr.bf16.mxu1 %v1042_v12  ;;  %v8442_v30 = vpop.f32.mrb[27].mxu1  ;;  %v8454_v12 = vadd.f32 %v8211_v46, %v8329_v9  ;;  %v1045_v26 = vpack.c.bf16 %v999_v21, %v998_v16  ;;  %v8478_v21 = vadd.f32 %v8211_v46, %v8353_v35  ;;  %v8486_v16 = vadd.f32 %v8321_v1, %v8211_v46 }
 0x12e   : > { %7161 = vmatmul.mubr.bf16.gmra.mrb[60].mxu1 %v1043_v15  ;;  %v8456_v0 = vpop.f32.mrb[28].mxu1  ;;  %v8464_v15 = vadd.f32 %v8297_v42, %v8211_v46  ;;  %v8498_v1 = vadd.f32 %v8211_v46, %v8377_v14 }
 0x12f   : > { %7164 = vmatprep.mubr.bf16.mxu1 %v1044_v11  ;;  %10946 = vst [vmem:[#allocation14_spill] sm:$0xff] %v8454_v12  ;;  %v8460_v11 = vadd.f32 %v8290_v36, %v8211_v46  ;;  %v949_v54 = vpop.f32.mrb[29].mxu1  ;;  %v1005_v9 = vmax.f32 %v8454_v12, 0.0  ;;  %v1008_v12 = vmax.f32 %v8474_v45, 0.0  ;;  %v1009_v27 = vmax.f32 %v8478_v21, 0.0 }
 0x130   : > { %v8466_v17 = vpop.f32.mrb[30].mxu1  ;;  %v1003_v36 = vmax.f32 %v8464_v15, 0.0  ;;  %v1007_v35 = vmax.f32 %v8486_v16, 0.0 }
 0x131   : > { %v952_v62 = vpop.f32.mrb[31].mxu1  ;;  %v1002_v53 = vmax.f32 %v8460_v11, 0.0  ;;  %v1048_v42 = vpack.c.bf16 %v1005_v9, %v1004_v47  ;;  %v8494_v9 = vadd.f32 %v8211_v46, %v8364_v60  ;;  %v1013_v60 = vmax.f32 %v8498_v1, 0.0 }
 0x136   : > { %7165 = vmatmul.mubr.bf16.gmra.mrb[64].mxu1 %v1045_v26  ;;  %v8482_v26 = vadd.f32 %v8314_v59, %v8211_v46  ;;  %v1050_v59 = vpack.c.bf16 %v1009_v27, %v1008_v12  ;;  %v8514_v27 = vadd.f32 %v8211_v46, %v8396_v57  ;;  %v7974_v57 = vld [vmem:[%s10830_s5 + $0x38] sm:$0xff]  }
 0x137   : > { %7168 = vmatprep.mubr.bf16.mxu1 %v1046_v38  ;;  %v1047_v38 = vpack.c.bf16 %v1003_v36, %v1002_v53  ;;  %v8502_v53 = vadd.f32 %v8338_v18, %v8211_v46  ;;  %v8506_v36 = vadd.f32 %v8345_v31, %v8211_v46  ;;  %v8518_v31 = vadd.f32 %v8211_v46, %v8409_v25 }
 0x138   : > { %v1006_v47 = vmax.f32 %v8482_v26, 0.0  ;;  %7210 = vmatprep.subr.bf16.mxu0 %v7974_v57 }
 0x139   : > { %v1010_v12 = vmax.f32 %v8502_v53, 0.0  ;;  %v1011_v14 = vmax.f32 %v8506_v36, 0.0  ;;  %10947 = vst [vmem:[#allocation15_spill] sm:$0xff] %v8518_v31  ;;  %v1017_v25 = vmax.f32 %v8518_v31, 0.0  ;;  %7211 = vmatpush3.bf16.msra.mxu0 %v7974_v57  ;;  %v8559_v31 = vadd.f32 %v8211_v46, %v952_v62 }
 0x13b   : > { %10950 = vst [vmem:[#allocation18_spill] sm:$0xff] %v8559_v31 }
 0x13e   : > { %7169 = vmatmul.mubr.bf16.gmra.mrb[68].mxu1 %v1047_v38  ;;  %v1012_v38 = vmax.f32 %v8494_v9, 0.0 }
 0x13f   : > { %7172 = vmatprep.mubr.bf16.mxu1 %v1048_v42  ;;  %v1049_v42 = vpack.c.bf16 %v1007_v35, %v1006_v47  ;;  %v8522_v47 = vadd.f32 %v8362_v55, %v8211_v46  ;;  %v8526_v35 = vadd.f32 %v8369_v7, %v8211_v46  ;;  %v8537_v7 = vadd.f32 %v8211_v46, %v8438_v34 }
 0x140   : > { %v1052_v18 = vpack.c.bf16 %v1013_v60, %v1012_v38 }
 0x141   : > { %v1014_v38 = vmax.f32 %v8522_v47, 0.0  ;;  %v1015_v55 = vmax.f32 %v8526_v35, 0.0  ;;  %v1020_v57 = vmax.f32 %v8537_v7, 0.0 }
 0x146   : > { %7173 = vmatmul.mubr.bf16.gmra.mrb[72].mxu1 %v1049_v42  ;;  %v1016_v42 = vmax.f32 %v8514_v27, 0.0 }
 0x147   : > { %7176 = vmatprep.mubr.bf16.mxu1 %v1050_v59  ;;  %v1051_v59 = vpack.c.bf16 %v1011_v14, %v1010_v12  ;;  %v8541_v12 = vadd.f32 %v8211_v46, %v8442_v30  ;;  %v8545_v14 = vadd.f32 %v8394_v50, %v8211_v46 }
 0x148   : > { %v1054_v60 = vpack.c.bf16 %v1017_v25, %v1016_v42  ;;  %v8556_v25 = vadd.f32 %v8211_v46, %v949_v54  ;;  %v1025_v54 = vmax.f32 %v8559_v31, 0.0 }
 0x149   : > { %10948 = vst [vmem:[#allocation16_spill] sm:$0xff] %v8541_v12  ;;  %v1021_v34 = vmax.f32 %v8541_v12, 0.0  ;;  %v1018_v42 = vmax.f32 %v8545_v14, 0.0 }
 0x14a   : > { %10949 = vst [vmem:[#allocation17_spill] sm:$0xff] %v8556_v25 }
 0x14b   : > { %v1056_v50 = vpack.c.bf16 %v1021_v34, %v1020_v57 }
 0x14e   : > { %7177 = vmatmul.mubr.bf16.gmra.mrb[76].mxu1 %v1051_v59  ;;  %v1053_v59 = vpack.c.bf16 %v1015_v55, %v1014_v38  ;;  %v8567_v38 = vadd.f32 %v8440_v39, %v8211_v46  ;;  %v8579_v39 = vadd.f32 %v8466_v17, %v8211_v46  ;;  %v8592_v17 = vld [vmem:[%s10829_s4] ss:$0 sm:$0xff] }
 0x14f   : > { %7180 = vmatprep.mubr.bf16.mxu1 %v1052_v18  ;;  %v8549_v18 = vadd.f32 %v8401_v13, %v8211_v46  ;;  %v8563_v13 = vadd.f32 %v8428_v41, %v8211_v46  ;;  %v8575_v41 = vadd.f32 %v8456_v0, %v8211_v46  ;;  %v7976_v46 = vld [vmem:[%s10828_s3 + $0x48] sm:$0xff]  }
 0x150   : > { %10952 = vst [vmem:[#allocation20_spill] sm:$0xff] %v8567_v38  ;;  %v1023_v62 = vmax.f32 %v8567_v38, 0.0  ;;  %10954 = vst [vmem:[#allocation22_spill] sm:$0xff] %v8579_v39 }
 0x151   : > { %v1019_v30 = vmax.f32 %v8549_v18, 0.0  ;;  %10951 = vst [vmem:[#allocation19_spill] sm:$0xff] %v8563_v13  ;;  %10953 = vst [vmem:[#allocation21_spill] sm:$0xff] %v8575_v41 }
 0x153   : > { %v1055_v55 = vpack.c.bf16 %v1019_v30, %v1018_v42  ;;  %v1026_v42 = vmax.f32 %v8575_v41, 0.0  ;;  %v1027_v30 = vmax.f32 %v8579_v39, 0.0 }
 0x156   : > { %7181 = vmatmul.mubr.bf16.gmra.mrb[80].mxu1 %v1053_v59  ;;  %v1022_v59 = vmax.f32 %v8563_v13, 0.0 }
 0x157   : > { %7184 = vmatprep.mubr.bf16.mxu1 %v1054_v60  ;;  %v1024_v60 = vmax.f32 %v8556_v25, 0.0 }
 0x158   : > { %v1057_v34 = vpack.c.bf16 %v1023_v62, %v1022_v59 }
 0x159   : > { %v1058_v57 = vpack.c.bf16 %v1025_v54, %v1024_v60 }
 0x15e   : > { %7185 = vmatmul.mubr.bf16.gmra.mrb[84].mxu1 %v1055_v55  ;;  %v7975_v55 = vld [vmem:[%s10828_s3 + $0x40] sm:$0xff]  }
 0x15f   : > { %7188 = vmatprep.mubr.bf16.mxu1 %v1056_v50  ;;  %v1059_v50 = vpack.c.bf16 %v1027_v30, %v1026_v42  ;;  %7276 = vmatprep.subr.bf16.mxu1 %v7975_v55  ;;  %v7977_v42 = vld [vmem:[%s10828_s3 + $0x50] sm:$0xff]   ;;  %v7978_v30 = vld [vmem:[%s10828_s3 + $0x58] sm:$0xff]  }
 0x160   : > { %7277 = vmatpush3.bf16.msra.mxu1 %v7975_v55 }
 0x161   : > { %7278 = vmatprep.subr.bf16.mxu1 %v7976_v46 }
 0x164   : > { %7279 = vmatpush3.bf16.msra.mxu1 %v7976_v46 }
 0x165   : > { %7280 = vmatprep.subr.bf16.mxu1 %v7977_v42 }
 0x166   : > { %7189 = vmatmul.mubr.bf16.gmra.mrb[88].mxu1 %v1057_v34 }
 0x167   : > { %7192 = vmatprep.mubr.bf16.mxu1 %v1058_v57 }
 0x168   : > { %7281 = vmatpush3.bf16.msra.mxu1 %v7977_v42 }
 0x169   : > { %7282 = vmatprep.subr.bf16.mxu1 %v7978_v30 }
 0x16c   : > { %7283 = vmatpush3.bf16.msra.mxu1 %v7978_v30 }
 0x16e   : > { %7193 = vmatmul.mubr.bf16.gmra.mrb[92].mxu1 %v1059_v50 }
 0x1c9   : > { %v7134_v0 = vpop.f32.mrb[32].mxu1 }
 0x1ca   : > { %v1174_v60 = vadd.f32 %v7134_v0, %v8592_v17  ;;  %v1165_v54 = vpop.f32.mrb[33].mxu1 }
 0x1cb   : > { %v1166_v59 = vadd.f32 %v8592_v17, %v1165_v54  ;;  %v7135_v62 = vpop.f32.mrb[34].mxu1 }
 0x1cc   : > { %v1177_v57 = vadd.f32 %v7135_v62, %v8592_v17  ;;  %v1168_v34 = vpop.f32.mrb[35].mxu1  ;;  %v1422_v55 = vmax.f32 %v1174_v60, 0.0  ;;  %v7979_v62 = vld [vmem:[%s10828_s3 + $0x60] sm:$0xff]  }
 0x1cd   : > { %v1169_v50 = vadd.f32 %v8592_v17, %v1168_v34  ;;  %v1420_v0 = vmax.f32 %v1166_v59, 0.0  ;;  %7284 = vmatprep.subr.bf16.mxu1 %v7979_v62 }
 0x1ce   : > { %v1423_v46 = vmax.f32 %v1177_v57, 0.0  ;;  %v7980_v57 = vld [vmem:[%s10828_s3 + $0x68] sm:$0xff]   ;;  %7285 = vmatpush3.bf16.msra.mxu1 %v7979_v62  ;;  %v7982_v62 = vld [vmem:[%s10828_s3 + $0x78] sm:$0xff]  }
 0x1cf   : > { %v1421_v31 = vmax.f32 %v1169_v50, 0.0  ;;  %7286 = vmatprep.subr.bf16.mxu1 %v7980_v57 }
 0x1d0   : > { %v1485_v54 = vpack.c.bf16 %v1423_v46, %v1422_v55 }
 0x1d1   : > { %v7138_v39 = vpop.f32.mrb[36].mxu1  ;;  %v1484_v41 = vpack.c.bf16 %v1421_v31, %v1420_v0 }
 0x1d2   : > { %v1190_v25 = vadd.f32 %v7138_v39, %v8592_v17  ;;  %v1181_v12 = vpop.f32.mrb[37].mxu1  ;;  %7287 = vmatpush3.bf16.msra.mxu1 %v7980_v57 }
 0x1d3   : > { %v1182_v38 = vadd.f32 %v8592_v17, %v1181_v12  ;;  %v7139_v34 = vpop.f32.mrb[38].mxu1  ;;  %7212 = vmatprep.mubr.bf16.mxu0 %v1484_v41  ;;  %v7981_v41 = vld [vmem:[%s10828_s3 + $0x70] sm:$0xff]  }
 0x1d4   : > { %v1193_v60 = vadd.f32 %v7139_v34, %v8592_v17  ;;  %v1184_v59 = vpop.f32.mrb[39].mxu1  ;;  %7213 = vmatmul.mubr.bf16.vlgmr.msra.gmra.mrb[32].mxu0 %v1485_v54  ;;  %v1426_v31 = vmax.f32 %v1190_v25, 0.0  ;;  %7288 = vmatprep.subr.bf16.mxu1 %v7981_v41 }
 0x1d5   : > { %v1185_v42 = vadd.f32 %v8592_v17, %v1184_v59  ;;  %v1424_v39 = vmax.f32 %v1182_v38, 0.0 }
 0x1d6   : > { %v1427_v50 = vmax.f32 %v1193_v60, 0.0  ;;  %7289 = vmatpush3.bf16.msra.mxu1 %v7981_v41 }
 0x1d7   : > { %v1425_v55 = vmax.f32 %v1185_v42, 0.0  ;;  %7290 = vmatprep.subr.bf16.mxu1 %v7982_v62 }
 0x1d8   : > { %v1487_v12 = vpack.c.bf16 %v1427_v50, %v1426_v31 }
 0x1d9   : > { %v7142_v30 = vpop.f32.mrb[40].mxu1  ;;  %v1486_v46 = vpack.c.bf16 %v1425_v55, %v1424_v39 }
 0x1da   : > { %v1206_v0 = vadd.f32 %v7142_v30, %v8592_v17  ;;  %v1197_v54 = vpop.f32.mrb[41].mxu1  ;;  %7291 = vmatpush3.bf16.msra.mxu1 %v7982_v62 }
 0x1db   : > { %v1198_v34 = vadd.f32 %v8592_v17, %v1197_v54  ;;  %v7143_v13 = vpop.f32.mrb[42].mxu1  ;;  %7216 = vmatprep.mubr.bf16.mxu0 %v1486_v46 }
 0x1dc   : > { %v1209_v25 = vadd.f32 %v7143_v13, %v8592_v17  ;;  %v1200_v38 = vpop.f32.mrb[43].mxu1  ;;  %7217 = vmatmul.mubr.bf16.gmra.mrb[36].mxu0 %v1487_v12  ;;  %v1430_v59 = vmax.f32 %v1206_v0, 0.0 }
 0x1dd   : > { %v1201_v60 = vadd.f32 %v8592_v17, %v1200_v38  ;;  %v1428_v31 = vmax.f32 %v1198_v34, 0.0 }
 0x1de   : > { %v1431_v42 = vmax.f32 %v1209_v25, 0.0 }
 0x1df   : > { %v1429_v50 = vmax.f32 %v1201_v60, 0.0 }
 0x1e0   : > { %v1489_v39 = vpack.c.bf16 %v1431_v42, %v1430_v59 }
 0x1e1   : > { %v7146_v55 = vpop.f32.mrb[44].mxu1  ;;  %v1488_v57 = vpack.c.bf16 %v1429_v50, %v1428_v31 }
 0x1e2   : > { %v1222_v13 = vadd.f32 %v7146_v55, %v8592_v17  ;;  %v1213_v30 = vpop.f32.mrb[45].mxu1 }
 0x1e3   : > { %v1214_v12 = vadd.f32 %v8592_v17, %v1213_v30  ;;  %v7147_v46 = vpop.f32.mrb[46].mxu1  ;;  %7220 = vmatprep.mubr.bf16.mxu0 %v1488_v57 }
 0x1e4   : > { %v1225_v54 = vadd.f32 %v7147_v46, %v8592_v17  ;;  %v1216_v38 = vpop.f32.mrb[47].mxu1  ;;  %7221 = vmatmul.mubr.bf16.gmra.mrb[40].mxu0 %v1489_v39  ;;  %v1434_v34 = vmax.f32 %v1222_v13, 0.0 }
 0x1e5   : > { %v1217_v0 = vadd.f32 %v8592_v17, %v1216_v38  ;;  %v1432_v25 = vmax.f32 %v1214_v12, 0.0 }
 0x1e6   : > { %v1435_v41 = vmax.f32 %v1225_v54, 0.0 }
 0x1e7   : > { %v1433_v60 = vmax.f32 %v1217_v0, 0.0 }
 0x1e8   : > { %v1491_v59 = vpack.c.bf16 %v1435_v41, %v1434_v34 }
 0x1e9   : > { %v7150_v42 = vpop.f32.mrb[48].mxu1  ;;  %v1490_v31 = vpack.c.bf16 %v1433_v60, %v1432_v25 }
 0x1ea   : > { %v1238_v50 = vadd.f32 %v7150_v42, %v8592_v17  ;;  %v1229_v55 = vpop.f32.mrb[49].mxu1 }
 0x1eb   : > { %v1230_v30 = vadd.f32 %v8592_v17, %v1229_v55  ;;  %v7151_v57 = vpop.f32.mrb[50].mxu1  ;;  %7224 = vmatprep.mubr.bf16.mxu0 %v1490_v31 }
 0x1ec   : > { %v1241_v62 = vadd.f32 %v7151_v57, %v8592_v17  ;;  %v1232_v46 = vpop.f32.mrb[51].mxu1  ;;  %7225 = vmatmul.mubr.bf16.gmra.mrb[44].mxu0 %v1491_v59  ;;  %v1438_v13 = vmax.f32 %v1238_v50, 0.0 }
 0x1ed   : > { %v1233_v39 = vadd.f32 %v8592_v17, %v1232_v46  ;;  %v1436_v12 = vmax.f32 %v1230_v30, 0.0 }
 0x1ee   : > { %v1439_v54 = vmax.f32 %v1241_v62, 0.0 }
 0x1ef   : > { %v1437_v38 = vmax.f32 %v1233_v39, 0.0 }
 0x1f0   : > { %v1493_v0 = vpack.c.bf16 %v1439_v54, %v1438_v13 }
 0x1f1   : > { %v7154_v34 = vpop.f32.mrb[52].mxu1  ;;  %v1492_v41 = vpack.c.bf16 %v1437_v38, %v1436_v12 }
 0x1f2   : > { %v1254_v25 = vadd.f32 %v7154_v34, %v8592_v17  ;;  %v1245_v60 = vpop.f32.mrb[53].mxu1 }
 0x1f3   : > { %v1246_v42 = vadd.f32 %v8592_v17, %v1245_v60  ;;  %v7155_v55 = vpop.f32.mrb[54].mxu1  ;;  %7228 = vmatprep.mubr.bf16.mxu0 %v1492_v41 }
 0x1f4   : > { %v1257_v31 = vadd.f32 %v7155_v55, %v8592_v17  ;;  %v1248_v57 = vpop.f32.mrb[55].mxu1  ;;  %7229 = vmatmul.mubr.bf16.gmra.mrb[48].mxu0 %v1493_v0  ;;  %v1442_v50 = vmax.f32 %v1254_v25, 0.0 }
 0x1f5   : > { %v1249_v59 = vadd.f32 %v8592_v17, %v1248_v57  ;;  %v1440_v30 = vmax.f32 %v1246_v42, 0.0 }
 0x1f6   : > { %v1443_v62 = vmax.f32 %v1257_v31, 0.0 }
 0x1f7   : > { %v1441_v46 = vmax.f32 %v1249_v59, 0.0 }
 0x1f8   : > { %v1495_v39 = vpack.c.bf16 %v1443_v62, %v1442_v50 }
 0x1f9   : > { %v7158_v13 = vpop.f32.mrb[56].mxu1  ;;  %v1494_v54 = vpack.c.bf16 %v1441_v46, %v1440_v30 }
 0x1fa   : > { %v1270_v12 = vadd.f32 %v7158_v13, %v8592_v17  ;;  %v1261_v38 = vpop.f32.mrb[57].mxu1 }
 0x1fb   : > { %v1262_v34 = vadd.f32 %v8592_v17, %v1261_v38  ;;  %v7159_v60 = vpop.f32.mrb[58].mxu1  ;;  %7232 = vmatprep.mubr.bf16.mxu0 %v1494_v54 }
 0x1fc   : > { %v1273_v41 = vadd.f32 %v7159_v60, %v8592_v17  ;;  %v1264_v55 = vpop.f32.mrb[59].mxu1  ;;  %7233 = vmatmul.mubr.bf16.gmra.mrb[52].mxu0 %v1495_v39  ;;  %v1446_v25 = vmax.f32 %v1270_v12, 0.0 }
 0x1fd   : > { %v1265_v0 = vadd.f32 %v8592_v17, %v1264_v55  ;;  %v1444_v42 = vmax.f32 %v1262_v34, 0.0 }
 0x1fe   : > { %v1447_v31 = vmax.f32 %v1273_v41, 0.0 }
 0x1ff   : > { %v1445_v57 = vmax.f32 %v1265_v0, 0.0 }
 0x200   : > { %v1497_v59 = vpack.c.bf16 %v1447_v31, %v1446_v25 }
 0x201   : > { %v7162_v50 = vpop.f32.mrb[60].mxu1  ;;  %v1496_v62 = vpack.c.bf16 %v1445_v57, %v1444_v42 }
 0x202   : > { %v1286_v30 = vadd.f32 %v7162_v50, %v8592_v17  ;;  %v1277_v46 = vpop.f32.mrb[61].mxu1 }
 0x203   : > { %v1278_v13 = vadd.f32 %v8592_v17, %v1277_v46  ;;  %v7163_v38 = vpop.f32.mrb[62].mxu1  ;;  %7236 = vmatprep.mubr.bf16.mxu0 %v1496_v62 }
 0x204   : > { %v1289_v54 = vadd.f32 %v7163_v38, %v8592_v17  ;;  %v1280_v60 = vpop.f32.mrb[63].mxu1  ;;  %7237 = vmatmul.mubr.bf16.gmra.mrb[56].mxu0 %v1497_v59  ;;  %v1450_v12 = vmax.f32 %v1286_v30, 0.0 }
 0x205   : > { %v1281_v39 = vadd.f32 %v8592_v17, %v1280_v60  ;;  %v1448_v34 = vmax.f32 %v1278_v13, 0.0 }
 0x206   : > { %v1451_v41 = vmax.f32 %v1289_v54, 0.0 }
 0x207   : > { %v1449_v55 = vmax.f32 %v1281_v39, 0.0 }
 0x208   : > { %v1499_v0 = vpack.c.bf16 %v1451_v41, %v1450_v12 }
 0x209   : > { %v7166_v25 = vpop.f32.mrb[64].mxu1  ;;  %v1498_v31 = vpack.c.bf16 %v1449_v55, %v1448_v34 }
 0x20a   : > { %v1302_v42 = vadd.f32 %v7166_v25, %v8592_v17  ;;  %v1293_v57 = vpop.f32.mrb[65].mxu1 }
 0x20b   : > { %v1294_v50 = vadd.f32 %v8592_v17, %v1293_v57  ;;  %v7167_v46 = vpop.f32.mrb[66].mxu1  ;;  %7240 = vmatprep.mubr.bf16.mxu0 %v1498_v31 }
 0x20c   : > { %v1305_v62 = vadd.f32 %v7167_v46, %v8592_v17  ;;  %v1296_v38 = vpop.f32.mrb[67].mxu1  ;;  %7241 = vmatmul.mubr.bf16.gmra.mrb[60].mxu0 %v1499_v0  ;;  %v1454_v30 = vmax.f32 %v1302_v42, 0.0 }
 0x20d   : > { %v1297_v59 = vadd.f32 %v8592_v17, %v1296_v38  ;;  %v1452_v13 = vmax.f32 %v1294_v50, 0.0 }
 0x20e   : > { %v1455_v54 = vmax.f32 %v1305_v62, 0.0 }
 0x20f   : > { %v1453_v60 = vmax.f32 %v1297_v59, 0.0 }
 0x210   : > { %v1501_v39 = vpack.c.bf16 %v1455_v54, %v1454_v30 }
 0x211   : > { %v7170_v12 = vpop.f32.mrb[68].mxu1  ;;  %v1500_v41 = vpack.c.bf16 %v1453_v60, %v1452_v13 }
 0x212   : > { %v1318_v34 = vadd.f32 %v7170_v12, %v8592_v17  ;;  %v1309_v55 = vpop.f32.mrb[69].mxu1 }
 0x213   : > { %v1310_v25 = vadd.f32 %v8592_v17, %v1309_v55  ;;  %v7171_v57 = vpop.f32.mrb[70].mxu1  ;;  %7244 = vmatprep.mubr.bf16.mxu0 %v1500_v41 }
 0x214   : > { %v1321_v31 = vadd.f32 %v7171_v57, %v8592_v17  ;;  %v1312_v46 = vpop.f32.mrb[71].mxu1  ;;  %7245 = vmatmul.mubr.bf16.gmra.mrb[64].mxu0 %v1501_v39  ;;  %v1458_v42 = vmax.f32 %v1318_v34, 0.0 }
 0x215   : > { %v1313_v0 = vadd.f32 %v8592_v17, %v1312_v46  ;;  %v1456_v50 = vmax.f32 %v1310_v25, 0.0 }
 0x216   : > { %v1459_v62 = vmax.f32 %v1321_v31, 0.0 }
 0x217   : > { %v1457_v38 = vmax.f32 %v1313_v0, 0.0 }
 0x218   : > { %v1503_v59 = vpack.c.bf16 %v1459_v62, %v1458_v42 }
 0x219   : > { %v7174_v30 = vpop.f32.mrb[72].mxu1  ;;  %v1502_v54 = vpack.c.bf16 %v1457_v38, %v1456_v50 }
 0x21a   : > { %v1334_v13 = vadd.f32 %v7174_v30, %v8592_v17  ;;  %v1325_v60 = vpop.f32.mrb[73].mxu1 }
 0x21b   : > { %v1326_v12 = vadd.f32 %v8592_v17, %v1325_v60  ;;  %v7175_v55 = vpop.f32.mrb[74].mxu1  ;;  %7248 = vmatprep.mubr.bf16.mxu0 %v1502_v54 }
 0x21c   : > { %v1337_v41 = vadd.f32 %v7175_v55, %v8592_v17  ;;  %v1328_v57 = vpop.f32.mrb[75].mxu1  ;;  %7249 = vmatmul.mubr.bf16.gmra.mrb[68].mxu0 %v1503_v59  ;;  %v1462_v34 = vmax.f32 %v1334_v13, 0.0 }
 0x21d   : > { %v1329_v39 = vadd.f32 %v8592_v17, %v1328_v57  ;;  %v1460_v25 = vmax.f32 %v1326_v12, 0.0 }
 0x21e   : > { %v1463_v31 = vmax.f32 %v1337_v41, 0.0 }
 0x21f   : > { %v1461_v46 = vmax.f32 %v1329_v39, 0.0 }
 0x220   : > { %v1505_v0 = vpack.c.bf16 %v1463_v31, %v1462_v34 }
 0x221   : > { %v7178_v42 = vpop.f32.mrb[76].mxu1  ;;  %v1504_v62 = vpack.c.bf16 %v1461_v46, %v1460_v25 }
 0x222   : > { %v1350_v50 = vadd.f32 %v7178_v42, %v8592_v17  ;;  %v1341_v38 = vpop.f32.mrb[77].mxu1 }
 0x223   : > { %v1342_v30 = vadd.f32 %v8592_v17, %v1341_v38  ;;  %v7179_v60 = vpop.f32.mrb[78].mxu1  ;;  %7252 = vmatprep.mubr.bf16.mxu0 %v1504_v62 }
 0x224   : > { %v1353_v54 = vadd.f32 %v7179_v60, %v8592_v17  ;;  %v1344_v55 = vpop.f32.mrb[79].mxu1  ;;  %7253 = vmatmul.mubr.bf16.gmra.mrb[72].mxu0 %v1505_v0  ;;  %v1466_v13 = vmax.f32 %v1350_v50, 0.0 }
 0x225   : > { %v1345_v59 = vadd.f32 %v8592_v17, %v1344_v55  ;;  %v1464_v12 = vmax.f32 %v1342_v30, 0.0 }
 0x226   : > { %v1467_v41 = vmax.f32 %v1353_v54, 0.0 }
 0x227   : > { %v1465_v57 = vmax.f32 %v1345_v59, 0.0 }
 0x228   : > { %v1507_v39 = vpack.c.bf16 %v1467_v41, %v1466_v13 }
 0x229   : > { %v7182_v34 = vpop.f32.mrb[80].mxu1  ;;  %v1506_v31 = vpack.c.bf16 %v1465_v57, %v1464_v12 }
 0x22a   : > { %v1366_v25 = vadd.f32 %v7182_v34, %v8592_v17  ;;  %v1357_v46 = vpop.f32.mrb[81].mxu1 }
 0x22b   : > { %v1358_v42 = vadd.f32 %v8592_v17, %v1357_v46  ;;  %v7183_v38 = vpop.f32.mrb[82].mxu1  ;;  %7256 = vmatprep.mubr.bf16.mxu0 %v1506_v31 }
 0x22c   : > { %v1369_v62 = vadd.f32 %v7183_v38, %v8592_v17  ;;  %v1360_v60 = vpop.f32.mrb[83].mxu1  ;;  %7257 = vmatmul.mubr.bf16.gmra.mrb[76].mxu0 %v1507_v39  ;;  %v1470_v50 = vmax.f32 %v1366_v25, 0.0 }
 0x22d   : > { %v1361_v0 = vadd.f32 %v8592_v17, %v1360_v60  ;;  %v1468_v30 = vmax.f32 %v1358_v42, 0.0 }
 0x22e   : > { %v1471_v54 = vmax.f32 %v1369_v62, 0.0 }
 0x22f   : > { %v1469_v55 = vmax.f32 %v1361_v0, 0.0 }
 0x230   : > { %v1509_v59 = vpack.c.bf16 %v1471_v54, %v1470_v50 }
 0x231   : > { %v7186_v13 = vpop.f32.mrb[84].mxu1  ;;  %v1508_v41 = vpack.c.bf16 %v1469_v55, %v1468_v30 }
 0x232   : > { %v1382_v12 = vadd.f32 %v7186_v13, %v8592_v17  ;;  %v1373_v57 = vpop.f32.mrb[85].mxu1 }
 0x233   : > { %v1374_v34 = vadd.f32 %v8592_v17, %v1373_v57  ;;  %v7187_v46 = vpop.f32.mrb[86].mxu1  ;;  %7260 = vmatprep.mubr.bf16.mxu0 %v1508_v41 }
 0x234   : > { %v1385_v31 = vadd.f32 %v7187_v46, %v8592_v17  ;;  %v1376_v38 = vpop.f32.mrb[87].mxu1  ;;  %7261 = vmatmul.mubr.bf16.gmra.mrb[80].mxu0 %v1509_v59  ;;  %v1474_v25 = vmax.f32 %v1382_v12, 0.0 }
 0x235   : > { %v1377_v39 = vadd.f32 %v8592_v17, %v1376_v38  ;;  %v1472_v42 = vmax.f32 %v1374_v34, 0.0 }
 0x236   : > { %v1475_v62 = vmax.f32 %v1385_v31, 0.0 }
 0x237   : > { %v1473_v60 = vmax.f32 %v1377_v39, 0.0 }
 0x238   : > { %v1511_v0 = vpack.c.bf16 %v1475_v62, %v1474_v25 }
 0x239   : > { %v7190_v50 = vpop.f32.mrb[88].mxu1  ;;  %v1510_v54 = vpack.c.bf16 %v1473_v60, %v1472_v42 }
 0x23a   : > { %v1398_v30 = vadd.f32 %v7190_v50, %v8592_v17  ;;  %v1389_v55 = vpop.f32.mrb[89].mxu1 }
 0x23b   : > { %v1390_v13 = vadd.f32 %v8592_v17, %v1389_v55  ;;  %v7191_v57 = vpop.f32.mrb[90].mxu1  ;;  %7264 = vmatprep.mubr.bf16.mxu0 %v1510_v54 }
 0x23c   : > { %v1401_v41 = vadd.f32 %v7191_v57, %v8592_v17  ;;  %v1392_v46 = vpop.f32.mrb[91].mxu1  ;;  %7265 = vmatmul.mubr.bf16.gmra.mrb[84].mxu0 %v1511_v0  ;;  %v1478_v12 = vmax.f32 %v1398_v30, 0.0 }
 0x23d   : > { %v1393_v59 = vadd.f32 %v8592_v17, %v1392_v46  ;;  %v1476_v34 = vmax.f32 %v1390_v13, 0.0 }
 0x23e   : > { %v1479_v31 = vmax.f32 %v1401_v41, 0.0 }
 0x23f   : > { %v1477_v38 = vmax.f32 %v1393_v59, 0.0 }
 0x240   : > { %v1513_v39 = vpack.c.bf16 %v1479_v31, %v1478_v12  ;;  %v7983_v31 = vld [vmem:[%s10830_s5 + $0x40] sm:$0xff]  }
 0x241   : > { %v7194_v25 = vpop.f32.mrb[92].mxu1  ;;  %v1512_v62 = vpack.c.bf16 %v1477_v38, %v1476_v34  ;;  %7356 = vmatprep.subr.bf16.mxu0 %v7983_v31  ;;  %v7984_v34 = vld [vmem:[%s10830_s5 + $0x48] sm:$0xff]  }
 0x242   : > { %v1414_v42 = vadd.f32 %v7194_v25, %v8592_v17  ;;  %v1405_v60 = vpop.f32.mrb[93].mxu1  ;;  %7357 = vmatpush3.bf16.msra.mxu0 %v7983_v31 }
 0x243   : > { %v1406_v50 = vadd.f32 %v8592_v17, %v1405_v60  ;;  %v7195_v55 = vpop.f32.mrb[94].mxu1  ;;  %7268 = vmatprep.mubr.bf16.mxu0 %v1512_v62  ;;  %7358 = vmatprep.subr.bf16.mxu0 %v7984_v34 }
 0x244   : > { %v1417_v54 = vadd.f32 %v7195_v55, %v8592_v17  ;;  %v1408_v57 = vpop.f32.mrb[95].mxu1  ;;  %7269 = vmatmul.mubr.bf16.gmra.mrb[88].mxu0 %v1513_v39  ;;  %v1482_v30 = vmax.f32 %v1414_v42, 0.0 }
 0x245   : > { %v1409_v0 = vadd.f32 %v8592_v17, %v1408_v57  ;;  %v1480_v13 = vmax.f32 %v1406_v50, 0.0  ;;  %v8685_v17 = vld [vmem:[%s10831_s6] ss:$0 sm:$0xff] }
 0x246   : > { %v1483_v41 = vmax.f32 %v1417_v54, 0.0  ;;  %7359 = vmatpush3.bf16.msra.mxu0 %v7984_v34 }
 0x247   : > { %v1481_v46 = vmax.f32 %v1409_v0, 0.0 }
 0x248   : > { %v1515_v59 = vpack.c.bf16 %v1483_v41, %v1482_v30  ;;  %v7985_v30 = vld [vmem:[%s10830_s5 + $0x50] sm:$0xff]   ;;  %v7986_v41 = vld [vmem:[%s10830_s5 + $0x58] sm:$0xff]  }
 0x249   : > { %v1514_v12 = vpack.c.bf16 %v1481_v46, %v1480_v13  ;;  %7360 = vmatprep.subr.bf16.mxu0 %v7985_v30 }
 0x24a   : > { %7361 = vmatpush3.bf16.msra.mxu0 %v7985_v30 }
 0x24b   : > { %7272 = vmatprep.mubr.bf16.mxu0 %v1514_v12  ;;  %7362 = vmatprep.subr.bf16.mxu0 %v7986_v41 }
 0x24c   : > { %7273 = vmatmul.mubr.bf16.gmra.mrb[92].mxu0 %v1515_v59 }
 0x24e   : > { %7363 = vmatpush3.bf16.msra.mxu0 %v7986_v41 }
 0x2a7   : > { %v7214_v38 = vpop.f32.mrb[32].mxu0 }
 0x2a8   : > { %v1630_v39 = vadd.f32 %v7214_v38, %v8685_v17  ;;  %v1621_v25 = vpop.f32.mrb[33].mxu0 }
 0x2a9   : > { %v1622_v62 = vadd.f32 %v8685_v17, %v1621_v25  ;;  %v7215_v42 = vpop.f32.mrb[34].mxu0 }
 0x2aa   : > { %v1633_v60 = vadd.f32 %v7215_v42, %v8685_v17  ;;  %v1624_v50 = vpop.f32.mrb[35].mxu0  ;;  %v8695_v57 = vadd.f32 %v1630_v39, %v8217_v51 }
 0x2ab   : > { %v8691_v55 = vadd.f32 %v1622_v62, %v8214_v49  ;;  %v1625_v54 = vadd.f32 %v8685_v17, %v1624_v50 }
 0x2ac   : > { %v8698_v0 = vadd.f32 %v1633_v60, %v8220_v52  ;;  %v1942_v59 = vmax.f32 %v8695_v57, 0.0 }
 0x2ad   : > { %v8707_v13 = vadd.f32 %v1625_v54, %v8229_v56  ;;  %v1940_v51 = vmax.f32 %v8691_v55, 0.0  ;;  %v7987_v56 = vld [vmem:[%s10830_s5 + $0x60] sm:$0xff]  }
 0x2ae   : > { %v1943_v49 = vmax.f32 %v8698_v0, 0.0  ;;  %7364 = vmatprep.subr.bf16.mxu0 %v7987_v56 }
 0x2af   : > { %v7218_v46 = vpop.f32.mrb[36].mxu0  ;;  %v1941_v52 = vmax.f32 %v8707_v13, 0.0  ;;  %7365 = vmatpush3.bf16.msra.mxu0 %v7987_v56 }
 0x2b0   : > { %v1646_v12 = vadd.f32 %v7218_v46, %v8685_v17  ;;  %v1637_v31 = vpop.f32.mrb[37].mxu0  ;;  %v2005_v25 = vpack.c.bf16 %v1943_v49, %v1942_v59  ;;  %v7988_v49 = vld [vmem:[%s10830_s5 + $0x68] sm:$0xff]  }
 0x2b1   : > { %v1638_v34 = vadd.f32 %v8685_v17, %v1637_v31  ;;  %v7219_v38 = vpop.f32.mrb[38].mxu0  ;;  %v2004_v39 = vpack.c.bf16 %v1941_v52, %v1940_v51  ;;  %7366 = vmatprep.subr.bf16.mxu0 %v7988_v49 }
 0x2b2   : > { %v1649_v62 = vadd.f32 %v7219_v38, %v8685_v17  ;;  %v1640_v42 = vpop.f32.mrb[39].mxu0  ;;  %v8724_v54 = vadd.f32 %v1646_v12, %v8242_v4  ;;  %v7989_v12 = vld [vmem:[%s10830_s5 + $0x70] sm:$0xff]  }
 0x2b3   : > { %v8720_v60 = vadd.f32 %v1638_v34, %v8239_v2  ;;  %v1641_v50 = vadd.f32 %v8685_v17, %v1640_v42  ;;  %7292 = vmatprep.mubr.bf16.mxu1 %v2004_v39  ;;  %7367 = vmatpush3.bf16.msra.mxu0 %v7988_v49 }
 0x2b4   : > { %v8727_v30 = vadd.f32 %v1649_v62, %v8245_v5  ;;  %7293 = vmatmul.mubr.bf16.vlgmr.msra.gmra.mrb[96].mxu1 %v2005_v25  ;;  %v1946_v59 = vmax.f32 %v8724_v54, 0.0  ;;  %7368 = vmatprep.subr.bf16.mxu0 %v7989_v12 }
 0x2b5   : > { %v8733_v46 = vadd.f32 %v1641_v50, %v8251_v8  ;;  %v1944_v41 = vmax.f32 %v8720_v60, 0.0 }
 0x2b6   : > { %v1947_v2 = vmax.f32 %v8727_v30, 0.0 }
 0x2b7   : > { %v7222_v51 = vpop.f32.mrb[40].mxu0  ;;  %v1945_v4 = vmax.f32 %v8733_v46, 0.0  ;;  %7369 = vmatpush3.bf16.msra.mxu0 %v7989_v12 }
 0x2b8   : > { %v1662_v5 = vadd.f32 %v7222_v51, %v8685_v17  ;;  %v1653_v52 = vpop.f32.mrb[41].mxu0  ;;  %v2007_v25 = vpack.c.bf16 %v1947_v2, %v1946_v59  ;;  %v7990_v51 = vld [vmem:[%s10830_s5 + $0x78] sm:$0xff]  }
 0x2b9   : > { %v1654_v8 = vadd.f32 %v8685_v17, %v1653_v52  ;;  %v7223_v31 = vpop.f32.mrb[42].mxu0  ;;  %v2006_v34 = vpack.c.bf16 %v1945_v4, %v1944_v41  ;;  %7370 = vmatprep.subr.bf16.mxu0 %v7990_v51 }
 0x2ba   : > { %v1665_v38 = vadd.f32 %v7223_v31, %v8685_v17  ;;  %v1656_v39 = vpop.f32.mrb[43].mxu0  ;;  %v8750_v42 = vadd.f32 %v1662_v5, %v8270_v23 }
 0x2bb   : > { %v8746_v56 = vadd.f32 %v1654_v8, %v8265_v20  ;;  %v1657_v62 = vadd.f32 %v8685_v17, %v1656_v39  ;;  %7296 = vmatprep.mubr.bf16.mxu1 %v2006_v34  ;;  %7371 = vmatpush3.bf16.msra.mxu0 %v7990_v51 }
 0x2bc   : > { %v8753_v50 = vadd.f32 %v1665_v38, %v8273_v24  ;;  %7297 = vmatmul.mubr.bf16.gmra.mrb[100].mxu1 %v2007_v25  ;;  %v1950_v5 = vmax.f32 %v8750_v42, 0.0 }
 0x2bd   : > { %v8759_v2 = vadd.f32 %v1657_v62, %v8281_v28  ;;  %v1948_v49 = vmax.f32 %v8746_v56, 0.0 }
 0x2be   : > { %v1951_v20 = vmax.f32 %v8753_v50, 0.0 }
 0x2bf   : > { %v7226_v41 = vpop.f32.mrb[44].mxu0  ;;  %v1949_v23 = vmax.f32 %v8759_v2, 0.0 }
 0x2c0   : > { %v1678_v24 = vadd.f32 %v7226_v41, %v8685_v17  ;;  %v1669_v4 = vpop.f32.mrb[45].mxu0  ;;  %v2009_v34 = vpack.c.bf16 %v1951_v20, %v1950_v5 }
 0x2c1   : > { %v1670_v52 = vadd.f32 %v8685_v17, %v1669_v4  ;;  %v7227_v59 = vpop.f32.mrb[46].mxu0  ;;  %v2008_v8 = vpack.c.bf16 %v1949_v23, %v1948_v49 }
 0x2c2   : > { %v1681_v28 = vadd.f32 %v7227_v59, %v8685_v17  ;;  %v1672_v31 = vpop.f32.mrb[47].mxu0  ;;  %v8773_v12 = vadd.f32 %v1678_v24, %v8300_v43 }
 0x2c3   : > { %v8769_v38 = vadd.f32 %v1670_v52, %v8295_v40  ;;  %v1673_v39 = vadd.f32 %v8685_v17, %v1672_v31  ;;  %7300 = vmatprep.mubr.bf16.mxu1 %v2008_v8 }
 0x2c4   : > { %v8776_v25 = vadd.f32 %v1681_v28, %v8303_v44  ;;  %7301 = vmatmul.mubr.bf16.gmra.mrb[104].mxu1 %v2009_v34  ;;  %v1954_v43 = vmax.f32 %v8773_v12, 0.0 }
 0x2c5   : > { %v8779_v62 = vadd.f32 %v1673_v39, %v8308_v48  ;;  %v1952_v40 = vmax.f32 %v8769_v38, 0.0 }
 0x2c6   : > { %v1955_v41 = vmax.f32 %v8776_v25, 0.0 }
 0x2c7   : > { %v7230_v20 = vpop.f32.mrb[48].mxu0  ;;  %v1953_v49 = vmax.f32 %v8779_v62, 0.0 }
 0x2c8   : > { %v1694_v23 = vadd.f32 %v7230_v20, %v8685_v17  ;;  %v1685_v51 = vpop.f32.mrb[49].mxu0  ;;  %v2011_v52 = vpack.c.bf16 %v1955_v41, %v1954_v43 }
 0x2c9   : > { %v1686_v24 = vadd.f32 %v8685_v17, %v1685_v51  ;;  %v7231_v44 = vpop.f32.mrb[50].mxu0  ;;  %v2010_v4 = vpack.c.bf16 %v1953_v49, %v1952_v40 }
 0x2ca   : > { %v1697_v5 = vadd.f32 %v7231_v44, %v8685_v17  ;;  %v1688_v48 = vpop.f32.mrb[51].mxu0  ;;  %v8793_v28 = vadd.f32 %v1694_v23, %v8324_v3 }
 0x2cb   : > { %v8789_v59 = vadd.f32 %v1686_v24, %v8319_v63  ;;  %v1689_v8 = vadd.f32 %v8685_v17, %v1688_v48  ;;  %7304 = vmatprep.mubr.bf16.mxu1 %v2010_v4 }
 0x2cc   : > { %v8796_v31 = vadd.f32 %v1697_v5, %v8327_v6  ;;  %7305 = vmatmul.mubr.bf16.gmra.mrb[108].mxu1 %v2011_v52  ;;  %v1958_v3 = vmax.f32 %v8793_v28, 0.0 }
 0x2cd   : > { %v8799_v34 = vadd.f32 %v1689_v8, %v8332_v10  ;;  %v1956_v41 = vmax.f32 %v8789_v59, 0.0 }
 0x2ce   : > { %v1959_v39 = vmax.f32 %v8796_v31, 0.0 }
 0x2cf   : > { %v7234_v20 = vpop.f32.mrb[52].mxu0  ;;  %v1957_v63 = vmax.f32 %v8799_v34, 0.0 }
 0x2d0   : > { %v1710_v40 = vadd.f32 %v7234_v20, %v8685_v17  ;;  %v1701_v49 = vpop.f32.mrb[53].mxu0  ;;  %v2013_v24 = vpack.c.bf16 %v1959_v39, %v1958_v3 }
 0x2d1   : > { %v1702_v23 = vadd.f32 %v8685_v17, %v1701_v49  ;;  %v7235_v6 = vpop.f32.mrb[54].mxu0  ;;  %v2012_v51 = vpack.c.bf16 %v1957_v63, %v1956_v41 }
 0x2d2   : > { %v1713_v43 = vadd.f32 %v7235_v6, %v8685_v17  ;;  %v1704_v10 = vpop.f32.mrb[55].mxu0  ;;  %v8813_v5 = vadd.f32 %v1710_v40, %v8348_v32 }
 0x2d3   : > { %v8809_v44 = vadd.f32 %v1702_v23, %v8343_v29  ;;  %v1705_v4 = vadd.f32 %v8685_v17, %v1704_v10  ;;  %7308 = vmatprep.mubr.bf16.mxu1 %v2012_v51 }
 0x2d4   : > { %v8816_v48 = vadd.f32 %v1713_v43, %v8351_v33  ;;  %7309 = vmatmul.mubr.bf16.gmra.mrb[112].mxu1 %v2013_v24  ;;  %v1962_v32 = vmax.f32 %v8813_v5, 0.0  ;;  %v10955_v43 = vld [vmem:[#allocation3_spill] sm:$0xff]  ;;  %v10956_v24 = vld [vmem:[#allocation4_spill] sm:$0xff] }
 0x2d5   : > { %v8819_v52 = vadd.f32 %v1705_v4, %v8356_v37  ;;  %v1960_v39 = vmax.f32 %v8809_v44, 0.0 }
 0x2d6   : > { %v1963_v8 = vmax.f32 %v8816_v48, 0.0 }
 0x2d7   : > { %v7238_v20 = vpop.f32.mrb[56].mxu0  ;;  %v1961_v29 = vmax.f32 %v8819_v52, 0.0 }
 0x2d8   : > { %v1726_v41 = vadd.f32 %v7238_v20, %v8685_v17  ;;  %v1717_v63 = vpop.f32.mrb[57].mxu0  ;;  %v2015_v23 = vpack.c.bf16 %v1963_v8, %v1962_v32  ;;  %v10958_v20 = vld [vmem:[#allocation5_spill] sm:$0xff] }
 0x2d9   : > { %v1718_v40 = vadd.f32 %v8685_v17, %v1717_v63  ;;  %v7239_v33 = vpop.f32.mrb[58].mxu0  ;;  %v2014_v49 = vpack.c.bf16 %v1961_v29, %v1960_v39 }
 0x2da   : > { %v1729_v3 = vadd.f32 %v7239_v33, %v8685_v17  ;;  %v1720_v37 = vpop.f32.mrb[59].mxu0  ;;  %v8833_v10 = vadd.f32 %v1726_v41, %v10955_v43 }
 0x2db   : > { %v8829_v6 = vadd.f32 %v1718_v40, %v8367_v61  ;;  %v1721_v51 = vadd.f32 %v8685_v17, %v1720_v37  ;;  %7312 = vmatprep.mubr.bf16.mxu1 %v2014_v49 }
 0x2dc   : > { %v8836_v4 = vadd.f32 %v1729_v3, %v10956_v24  ;;  %7313 = vmatmul.mubr.bf16.gmra.mrb[116].mxu1 %v2015_v23  ;;  %v1966_v41 = vmax.f32 %v8833_v10, 0.0 }
 0x2dd   : > { %v8839_v63 = vadd.f32 %v1721_v51, %v10958_v20  ;;  %v1964_v8 = vmax.f32 %v8829_v6, 0.0 }
 0x2de   : > { %10957 = vst [vmem:[#allocation3_spill] sm:$0xff] %v8836_v4  ;;  %v1967_v39 = vmax.f32 %v8836_v4, 0.0 }
 0x2df   : > { %10959 = vst [vmem:[#allocation4_spill] sm:$0xff] %v8839_v63  ;;  %v7242_v29 = vpop.f32.mrb[60].mxu0  ;;  %v1965_v61 = vmax.f32 %v8839_v63, 0.0 }
 0x2e0   : > { %v1742_v32 = vadd.f32 %v7242_v29, %v8685_v17  ;;  %v1733_v40 = vpop.f32.mrb[61].mxu0  ;;  %v2017_v51 = vpack.c.bf16 %v1967_v39, %v1966_v41  ;;  %v10962_v29 = vld [vmem:[#allocation8_spill] sm:$0xff] }
 0x2e1   : > { %v1734_v33 = vadd.f32 %v8685_v17, %v1733_v40  ;;  %v7243_v49 = vpop.f32.mrb[62].mxu0  ;;  %v2016_v3 = vpack.c.bf16 %v1965_v61, %v1964_v8  ;;  %v10964_v40 = vld [vmem:[#allocation9_spill] sm:$0xff] }
 0x2e2   : > { %v1745_v37 = vadd.f32 %v7243_v49, %v8685_v17  ;;  %v1736_v23 = vpop.f32.mrb[63].mxu0  ;;  %v8853_v20 = vadd.f32 %v1742_v32, %v8404_v19 }
 0x2e3   : > { %v8849_v43 = vadd.f32 %v1734_v33, %v8399_v58  ;;  %v1737_v24 = vadd.f32 %v8685_v17, %v1736_v23  ;;  %7316 = vmatprep.mubr.bf16.mxu1 %v2016_v3 }
 0x2e4   : > { %10961 = vst [vmem:[#allocation23_spill] sm:$0xff] %v8853_v20  ;;  %v8856_v63 = vadd.f32 %v1745_v37, %v10962_v29  ;;  %7317 = vmatmul.mubr.bf16.gmra.mrb[120].mxu1 %v2017_v51  ;;  %v1970_v19 = vmax.f32 %v8853_v20, 0.0 }
 0x2e5   : > { %10960 = vst [vmem:[#allocation5_spill] sm:$0xff] %v8849_v43  ;;  %v8859_v4 = vadd.f32 %v1737_v24, %v10964_v40  ;;  %v1968_v39 = vmax.f32 %v8849_v43, 0.0  ;;  %v10966_v24 = vld [vmem:[#allocation6_spill] sm:$0xff] }
 0x2e6   : > { %10963 = vst [vmem:[#allocation8_spill] sm:$0xff] %v8856_v63  ;;  %v1971_v8 = vmax.f32 %v8856_v63, 0.0 }
 0x2e7   : > { %10965 = vst [vmem:[#allocation9_spill] sm:$0xff] %v8859_v4  ;;  %v7246_v61 = vpop.f32.mrb[64].mxu0  ;;  %v1969_v58 = vmax.f32 %v8859_v4, 0.0  ;;  %v10967_v4 = vld [vmem:[#allocation12_spill] sm:$0xff] }
 0x2e8   : > { %v1758_v41 = vadd.f32 %v7246_v61, %v8685_v17  ;;  %v1749_v33 = vpop.f32.mrb[65].mxu0  ;;  %v2019_v51 = vpack.c.bf16 %v1971_v8, %v1970_v19  ;;  %v10968_v61 = vld [vmem:[#allocation13_spill] sm:$0xff] }
 0x2e9   : > { %v1750_v32 = vadd.f32 %v8685_v17, %v1749_v33  ;;  %v7247_v49 = vpop.f32.mrb[66].mxu0  ;;  %v2018_v3 = vpack.c.bf16 %v1969_v58, %v1968_v39  ;;  %v10970_v33 = vld [vmem:[#allocation7_spill] sm:$0xff] }
 0x2ea   : > { %v1761_v37 = vadd.f32 %v7247_v49, %v8685_v17  ;;  %v1752_v23 = vpop.f32.mrb[67].mxu0  ;;  %v8873_v63 = vadd.f32 %v1758_v41, %v10967_v4 }
 0x2eb   : > { %v8869_v29 = vadd.f32 %v1750_v32, %v10966_v24  ;;  %v1753_v40 = vadd.f32 %v8685_v17, %v1752_v23  ;;  %7320 = vmatprep.mubr.bf16.mxu1 %v2018_v3 }
 0x2ec   : > { %v8876_v43 = vadd.f32 %v1761_v37, %v10968_v61  ;;  %7321 = vmatmul.mubr.bf16.gmra.mrb[124].mxu1 %v2019_v51  ;;  %v1974_v4 = vmax.f32 %v8873_v63, 0.0 }
 0x2ed   : > { %v8879_v20 = vadd.f32 %v1753_v40, %v10970_v33  ;;  %v1972_v8 = vmax.f32 %v8869_v29, 0.0  ;;  %v10972_v40 = vld [vmem:[#allocation10_spill] sm:$0xff] }
 0x2ee   : > { %10969 = vst [vmem:[#allocation6_spill] sm:$0xff] %v8876_v43  ;;  %v1975_v39 = vmax.f32 %v8876_v43, 0.0 }
 0x2ef   : > { %10971 = vst [vmem:[#allocation12_spill] sm:$0xff] %v8879_v20  ;;  %v7250_v58 = vpop.f32.mrb[68].mxu0  ;;  %v1973_v19 = vmax.f32 %v8879_v20, 0.0 }
 0x2f0   : > { %v1774_v32 = vadd.f32 %v7250_v58, %v8685_v17  ;;  %v1765_v49 = vpop.f32.mrb[69].mxu0  ;;  %v2021_v24 = vpack.c.bf16 %v1975_v39, %v1974_v4 }
 0x2f1   : > { %v1766_v41 = vadd.f32 %v8685_v17, %v1765_v49  ;;  %v7251_v3 = vpop.f32.mrb[70].mxu0  ;;  %v2020_v37 = vpack.c.bf16 %v1973_v19, %v1972_v8  ;;  %v10973_v49 = vld [vmem:[#allocation11_spill] sm:$0xff] }
 0x2f2   : > { %v1777_v23 = vadd.f32 %v7251_v3, %v8685_v17  ;;  %v1768_v51 = vpop.f32.mrb[71].mxu0  ;;  %v8893_v20 = vadd.f32 %v1774_v32, %v8460_v11 }
 0x2f3   : > { %v8889_v61 = vadd.f32 %v1766_v41, %v10972_v40  ;;  %v1769_v33 = vadd.f32 %v8685_v17, %v1768_v51  ;;  %7324 = vmatprep.mubr.bf16.mxu1 %v2020_v37 }
 0x2f4   : > { %v8896_v58 = vadd.f32 %v1777_v23, %v8464_v15  ;;  %7325 = vmatmul.mubr.bf16.gmra.mrb[128].mxu1 %v2021_v24  ;;  %v1978_v11 = vmax.f32 %v8893_v20, 0.0 }
 0x2f5   : > { %v8899_v43 = vadd.f32 %v1769_v33, %v10973_v49  ;;  %v1976_v39 = vmax.f32 %v8889_v61, 0.0 }
 0x2f6   : > { %v1979_v8 = vmax.f32 %v8896_v58, 0.0 }
 0x2f7   : > { %10974 = vst [vmem:[#allocation13_spill] sm:$0xff] %v8899_v43  ;;  %v7254_v19 = vpop.f32.mrb[72].mxu0  ;;  %v1977_v4 = vmax.f32 %v8899_v43, 0.0 }
 0x2f8   : > { %v1790_v41 = vadd.f32 %v7254_v19, %v8685_v17  ;;  %v1781_v3 = vpop.f32.mrb[73].mxu0  ;;  %v2023_v24 = vpack.c.bf16 %v1979_v8, %v1978_v11 }
 0x2f9   : > { %v1782_v32 = vadd.f32 %v8685_v17, %v1781_v3  ;;  %v7255_v15 = vpop.f32.mrb[74].mxu0  ;;  %v2022_v37 = vpack.c.bf16 %v1977_v4, %v1976_v39  ;;  %v10975_v3 = vld [vmem:[#allocation14_spill] sm:$0xff] }
 0x2fa   : > { %v1793_v23 = vadd.f32 %v7255_v15, %v8685_v17  ;;  %v1784_v51 = vpop.f32.mrb[75].mxu0  ;;  %v8913_v49 = vadd.f32 %v1790_v41, %v8482_v26 }
 0x2fb   : > { %v8909_v40 = vadd.f32 %v1782_v32, %v8450_v22  ;;  %v1785_v33 = vadd.f32 %v8685_v17, %v1784_v51  ;;  %7328 = vmatprep.mubr.bf16.mxu1 %v2022_v37 }
 0x2fc   : > { %v8916_v19 = vadd.f32 %v1793_v23, %v8486_v16  ;;  %7329 = vmatmul.mubr.bf16.gmra.mrb[132].mxu1 %v2023_v24  ;;  %v1982_v26 = vmax.f32 %v8913_v49, 0.0 }
 0x2fd   : > { %v8919_v43 = vadd.f32 %v1785_v33, %v10975_v3  ;;  %v1980_v8 = vmax.f32 %v8909_v40, 0.0 }
 0x2fe   : > { %v1983_v39 = vmax.f32 %v8916_v19, 0.0 }
 0x2ff   : > { %v7258_v4 = vpop.f32.mrb[76].mxu0  ;;  %v1981_v22 = vmax.f32 %v8919_v43, 0.0 }
 0x300   : > { %v1806_v11 = vadd.f32 %v7258_v4, %v8685_v17  ;;  %v1797_v32 = vpop.f32.mrb[77].mxu0  ;;  %v2025_v51 = vpack.c.bf16 %v1983_v39, %v1982_v26 }
 0x301   : > { %v1798_v41 = vadd.f32 %v8685_v17, %v1797_v32  ;;  %v7259_v16 = vpop.f32.mrb[78].mxu0  ;;  %v2024_v15 = vpack.c.bf16 %v1981_v22, %v1980_v8 }
 0x302   : > { %v1809_v37 = vadd.f32 %v7259_v16, %v8685_v17  ;;  %v1800_v23 = vpop.f32.mrb[79].mxu0  ;;  %v8933_v3 = vadd.f32 %v1806_v11, %v8502_v53 }
 0x303   : > { %v8929_v24 = vadd.f32 %v1798_v41, %v8474_v45  ;;  %v1801_v33 = vadd.f32 %v8685_v17, %v1800_v23  ;;  %7332 = vmatprep.mubr.bf16.mxu1 %v2024_v15 }
 0x304   : > { %v8936_v4 = vadd.f32 %v1809_v37, %v8506_v36  ;;  %7333 = vmatmul.mubr.bf16.gmra.mrb[136].mxu1 %v2025_v51  ;;  %v1986_v53 = vmax.f32 %v8933_v3, 0.0 }
 0x305   : > { %v8939_v32 = vadd.f32 %v1801_v33, %v8478_v21  ;;  %v1984_v39 = vmax.f32 %v8929_v24, 0.0 }
 0x306   : > { %v1987_v8 = vmax.f32 %v8936_v4, 0.0 }
 0x307   : > { %v7262_v22 = vpop.f32.mrb[80].mxu0  ;;  %v1985_v45 = vmax.f32 %v8939_v32, 0.0 }
 0x308   : > { %v1822_v26 = vadd.f32 %v7262_v22, %v8685_v17  ;;  %v1813_v41 = vpop.f32.mrb[81].mxu0  ;;  %v2027_v37 = vpack.c.bf16 %v1987_v8, %v1986_v53 }
 0x309   : > { %v1814_v11 = vadd.f32 %v8685_v17, %v1813_v41  ;;  %v7263_v36 = vpop.f32.mrb[82].mxu0  ;;  %v2026_v16 = vpack.c.bf16 %v1985_v45, %v1984_v39 }
 0x30a   : > { %v1825_v15 = vadd.f32 %v7263_v36, %v8685_v17  ;;  %v1816_v21 = vpop.f32.mrb[83].mxu0  ;;  %v8953_v33 = vadd.f32 %v1822_v26, %v8522_v47 }
 0x30b   : > { %v8949_v23 = vadd.f32 %v1814_v11, %v8494_v9  ;;  %v1817_v51 = vadd.f32 %v8685_v17, %v1816_v21  ;;  %7336 = vmatprep.mubr.bf16.mxu1 %v2026_v16 }
 0x30c   : > { %v8956_v22 = vadd.f32 %v1825_v15, %v8526_v35  ;;  %7337 = vmatmul.mubr.bf16.gmra.mrb[140].mxu1 %v2027_v37  ;;  %v1990_v47 = vmax.f32 %v8953_v33, 0.0 }
 0x30d   : > { %v8959_v41 = vadd.f32 %v1817_v51, %v8498_v1  ;;  %v1988_v8 = vmax.f32 %v8949_v23, 0.0 }
 0x30e   : > { %v1991_v39 = vmax.f32 %v8956_v22, 0.0 }
 0x30f   : > { %10976 = vst [vmem:[#allocation7_spill] sm:$0xff] %v8959_v41  ;;  %v7266_v45 = vpop.f32.mrb[84].mxu0  ;;  %v1989_v9 = vmax.f32 %v8959_v41, 0.0 }
 0x310   : > { %v1838_v53 = vadd.f32 %v7266_v45, %v8685_v17  ;;  %v1829_v11 = vpop.f32.mrb[85].mxu0  ;;  %v2029_v15 = vpack.c.bf16 %v1991_v39, %v1990_v47 }
 0x311   : > { %v1830_v26 = vadd.f32 %v8685_v17, %v1829_v11  ;;  %v7267_v35 = vpop.f32.mrb[86].mxu0  ;;  %v2028_v36 = vpack.c.bf16 %v1989_v9, %v1988_v8  ;;  %v10979_v11 = vld [vmem:[#allocation15_spill] sm:$0xff] }
 0x312   : > { %v1841_v16 = vadd.f32 %v7267_v35, %v8685_v17  ;;  %v1832_v1 = vpop.f32.mrb[87].mxu0  ;;  %v8973_v51 = vadd.f32 %v1838_v53, %v8545_v14 }
 0x313   : > { %v8969_v21 = vadd.f32 %v1830_v26, %v8514_v27  ;;  %v1833_v37 = vadd.f32 %v8685_v17, %v1832_v1  ;;  %7340 = vmatprep.mubr.bf16.mxu1 %v2028_v36 }
 0x314   : > { %10977 = vst [vmem:[#allocation10_spill] sm:$0xff] %v8973_v51  ;;  %v8976_v45 = vadd.f32 %v1841_v16, %v8549_v18  ;;  %7341 = vmatmul.mubr.bf16.gmra.mrb[144].mxu1 %v2029_v15  ;;  %v1994_v14 = vmax.f32 %v8973_v51, 0.0 }
 0x315   : > { %v8979_v41 = vadd.f32 %v1833_v37, %v10979_v11  ;;  %v1992_v39 = vmax.f32 %v8969_v21, 0.0  ;;  %v10982_v11 = vld [vmem:[#allocation19_spill] sm:$0xff] }
 0x316   : > { %10978 = vst [vmem:[#allocation11_spill] sm:$0xff] %v8976_v45  ;;  %v1995_v8 = vmax.f32 %v8976_v45, 0.0 }
 0x317   : > { %10980 = vst [vmem:[#allocation14_spill] sm:$0xff] %v8979_v41  ;;  %v7270_v9 = vpop.f32.mrb[88].mxu0  ;;  %v1993_v27 = vmax.f32 %v8979_v41, 0.0 }
 0x318   : > { %v1854_v47 = vadd.f32 %v7270_v9, %v8685_v17  ;;  %v1845_v26 = vpop.f32.mrb[89].mxu0  ;;  %v2031_v1 = vpack.c.bf16 %v1995_v8, %v1994_v14  ;;  %v10984_v9 = vld [vmem:[#allocation20_spill] sm:$0xff] }
 0x319   : > { %v1846_v53 = vadd.f32 %v8685_v17, %v1845_v26  ;;  %v7271_v18 = vpop.f32.mrb[90].mxu0  ;;  %v2030_v35 = vpack.c.bf16 %v1993_v27, %v1992_v39  ;;  %v10986_v26 = vld [vmem:[#allocation16_spill] sm:$0xff] }
 0x31a   : > { %v1857_v36 = vadd.f32 %v7271_v18, %v8685_v17  ;;  %v1848_v16 = vpop.f32.mrb[91].mxu0  ;;  %v8993_v41 = vadd.f32 %v1854_v47, %v10982_v11  ;;  %v10988_v11 = vld [vmem:[#allocation17_spill] sm:$0xff] }
 0x31b   : > { %v8989_v15 = vadd.f32 %v1846_v53, %v8537_v7  ;;  %v1849_v37 = vadd.f32 %v8685_v17, %v1848_v16  ;;  %7344 = vmatprep.mubr.bf16.mxu1 %v2030_v35 }
 0x31c   : > { %10983 = vst [vmem:[#allocation19_spill] sm:$0xff] %v8993_v41  ;;  %v8996_v45 = vadd.f32 %v1857_v36, %v10984_v9  ;;  %7345 = vmatmul.mubr.bf16.gmra.mrb[148].mxu1 %v2031_v1  ;;  %v1998_v47 = vmax.f32 %v8993_v41, 0.0 }
 0x31d   : > { %10981 = vst [vmem:[#allocation15_spill] sm:$0xff] %v8989_v15  ;;  %v8999_v51 = vadd.f32 %v1849_v37, %v10986_v26  ;;  %v1996_v8 = vmax.f32 %v8989_v15, 0.0 }
 0x31e   : > { %10985 = vst [vmem:[#allocation20_spill] sm:$0xff] %v8996_v45  ;;  %v1999_v39 = vmax.f32 %v8996_v45, 0.0 }
 0x31f   : > { %10987 = vst [vmem:[#allocation16_spill] sm:$0xff] %v8999_v51  ;;  %v7274_v27 = vpop.f32.mrb[92].mxu0  ;;  %v1997_v7 = vmax.f32 %v8999_v51, 0.0  ;;  %v10989_v51 = vld [vmem:[#allocation21_spill] sm:$0xff] }
 0x320   : > { %v1870_v14 = vadd.f32 %v7274_v27, %v8685_v17  ;;  %v1861_v53 = vpop.f32.mrb[93].mxu0  ;;  %v2033_v37 = vpack.c.bf16 %v1999_v39, %v1998_v47  ;;  %v10991_v27 = vld [vmem:[#allocation22_spill] sm:$0xff] }
 0x321   : > { %v1862_v18 = vadd.f32 %v8685_v17, %v1861_v53  ;;  %v7275_v35 = vpop.f32.mrb[94].mxu0  ;;  %v2032_v36 = vpack.c.bf16 %v1997_v7, %v1996_v8  ;;  %v10993_v53 = vld [vmem:[#allocation18_spill] sm:$0xff] }
 0x322   : > { %v1873_v16 = vadd.f32 %v7275_v35, %v8685_v17  ;;  %v1864_v1 = vpop.f32.mrb[95].mxu0  ;;  %v9013_v45 = vadd.f32 %v1870_v14, %v10989_v51  ;;  %v7991_v51 = vld [vmem:[%s10828_s3 + $0x80] sm:$0xff]   ;;  %v7992_v35 = vld [vmem:[%s10828_s3 + $0x88] sm:$0xff]  }
 0x323   : > { %v9009_v9 = vadd.f32 %v1862_v18, %v10988_v11  ;;  %v1865_v26 = vadd.f32 %v8685_v17, %v1864_v1  ;;  %7348 = vmatprep.mubr.bf16.mxu1 %v2032_v36  ;;  %7436 = vmatprep.subr.bf16.mxu1 %v7991_v51  ;;  %v9031_v14 = vld [vmem:[%s10829_s4 + $0x1] ss:$0 sm:$0xff] }
 0x324   : > { %10990 = vst [vmem:[#allocation17_spill] sm:$0xff] %v9013_v45  ;;  %v9016_v15 = vadd.f32 %v1873_v16, %v10991_v27  ;;  %7349 = vmatmul.mubr.bf16.gmra.mrb[152].mxu1 %v2033_v37  ;;  %v2002_v47 = vmax.f32 %v9013_v45, 0.0 }
 0x325   : > { %v9019_v41 = vadd.f32 %v1865_v26, %v10993_v53  ;;  %v2000_v39 = vmax.f32 %v9009_v9, 0.0  ;;  %7437 = vmatpush3.bf16.msra.mxu1 %v7991_v51  ;;  %v7993_v53 = vld [vmem:[%s10828_s3 + $0x90] sm:$0xff]  }
 0x326   : > { %10992 = vst [vmem:[#allocation21_spill] sm:$0xff] %v9016_v15  ;;  %v2003_v8 = vmax.f32 %v9016_v15, 0.0  ;;  %7438 = vmatprep.subr.bf16.mxu1 %v7992_v35 }
 0x327   : > { %10994 = vst [vmem:[#allocation22_spill] sm:$0xff] %v9019_v41  ;;  %v2001_v7 = vmax.f32 %v9019_v41, 0.0 }
 0x328   : > { %v2035_v18 = vpack.c.bf16 %v2003_v8, %v2002_v47  ;;  %v7994_v8 = vld [vmem:[%s10828_s3 + $0x98] sm:$0xff]  }
 0x329   : > { %v2034_v17 = vpack.c.bf16 %v2001_v7, %v2000_v39  ;;  %7439 = vmatpush3.bf16.msra.mxu1 %v7992_v35  ;;  %v7995_v35 = vld [vmem:[%s10828_s3 + $0xa0] sm:$0xff]  }
 0x32a   : > { %7440 = vmatprep.subr.bf16.mxu1 %v7993_v53 }
 0x32b   : > { %7352 = vmatprep.mubr.bf16.mxu1 %v2034_v17 }
 0x32c   : > { %7353 = vmatmul.mubr.bf16.gmra.mrb[156].mxu1 %v2035_v18 }
 0x32d   : > { %7441 = vmatpush3.bf16.msra.mxu1 %v7993_v53 }
 0x32e   : > { %7442 = vmatprep.subr.bf16.mxu1 %v7994_v8 }
 0x331   : > { %7443 = vmatpush3.bf16.msra.mxu1 %v7994_v8  ;;  %v7997_v8 = vld [vmem:[%s10828_s3 + $0xb0] sm:$0xff]  }
 0x332   : > { %7444 = vmatprep.subr.bf16.mxu1 %v7995_v35 }
 0x335   : > { %7445 = vmatpush3.bf16.msra.mxu1 %v7995_v35  ;;  %v7998_v35 = vld [vmem:[%s10828_s3 + $0xb8] sm:$0xff]  }
 0x387   : > { %v7294_v36 = vpop.f32.mrb[96].mxu1 }
 0x388   : > { %v2152_v16 = vadd.f32 %v7294_v36, %v9031_v14  ;;  %v2143_v1 = vpop.f32.mrb[97].mxu1 }
 0x389   : > { %v2144_v37 = vadd.f32 %v9031_v14, %v2143_v1  ;;  %v7295_v11 = vpop.f32.mrb[98].mxu1 }
 0x38a   : > { %v2155_v26 = vadd.f32 %v7295_v11, %v9031_v14  ;;  %v2146_v27 = vpop.f32.mrb[99].mxu1  ;;  %v2400_v7 = vmax.f32 %v2152_v16, 0.0 }
 0x38b   : > { %v2147_v39 = vadd.f32 %v9031_v14, %v2146_v27  ;;  %v2398_v17 = vmax.f32 %v2144_v37, 0.0 }
 0x38c   : > { %v2401_v47 = vmax.f32 %v2155_v26, 0.0  ;;  %v7996_v26 = vld [vmem:[%s10828_s3 + $0xa8] sm:$0xff]  }
 0x38d   : > { %v2399_v18 = vmax.f32 %v2147_v39, 0.0  ;;  %7446 = vmatprep.subr.bf16.mxu1 %v7996_v26 }
 0x38e   : > { %v2463_v51 = vpack.c.bf16 %v2401_v47, %v2400_v7  ;;  %7447 = vmatpush3.bf16.msra.mxu1 %v7996_v26 }
 0x38f   : > { %v2462_v36 = vpack.c.bf16 %v2399_v18, %v2398_v17  ;;  %v7298_v1 = vpop.f32.mrb[100].mxu1  ;;  %7448 = vmatprep.subr.bf16.mxu1 %v7997_v8 }
 0x390   : > { %v2168_v11 = vadd.f32 %v7298_v1, %v9031_v14  ;;  %v2159_v41 = vpop.f32.mrb[101].mxu1 }
 0x391   : > { %v2160_v15 = vadd.f32 %v9031_v14, %v2159_v41  ;;  %v7299_v27 = vpop.f32.mrb[102].mxu1  ;;  %7372 = vmatprep.mubr.bf16.mxu0 %v2462_v36 }
 0x392   : > { %v2171_v16 = vadd.f32 %v7299_v27, %v9031_v14  ;;  %v2162_v37 = vpop.f32.mrb[103].mxu1  ;;  %7373 = vmatmul.mubr.bf16.vlgmr.msra.gmra.mrb[96].mxu0 %v2463_v51  ;;  %v2404_v39 = vmax.f32 %v2168_v11, 0.0  ;;  %7449 = vmatpush3.bf16.msra.mxu1 %v7997_v8 }
 0x393   : > { %v2163_v53 = vadd.f32 %v9031_v14, %v2162_v37  ;;  %v2402_v47 = vmax.f32 %v2160_v15, 0.0  ;;  %7450 = vmatprep.subr.bf16.mxu1 %v7998_v35 }
 0x394   : > { %v2405_v7 = vmax.f32 %v2171_v16, 0.0 }
 0x395   : > { %v2403_v17 = vmax.f32 %v2163_v53, 0.0 }
 0x396   : > { %v2465_v41 = vpack.c.bf16 %v2405_v7, %v2404_v39  ;;  %7451 = vmatpush3.bf16.msra.mxu1 %v7998_v35 }
 0x397   : > { %v2464_v18 = vpack.c.bf16 %v2403_v17, %v2402_v47  ;;  %v7302_v51 = vpop.f32.mrb[104].mxu1 }
 0x398   : > { %v2184_v36 = vadd.f32 %v7302_v51, %v9031_v14  ;;  %v2175_v1 = vpop.f32.mrb[105].mxu1 }
 0x399   : > { %v2176_v27 = vadd.f32 %v9031_v14, %v2175_v1  ;;  %v7303_v45 = vpop.f32.mrb[106].mxu1  ;;  %7376 = vmatprep.mubr.bf16.mxu0 %v2464_v18 }
 0x39a   : > { %v2187_v15 = vadd.f32 %v7303_v45, %v9031_v14  ;;  %v2178_v11 = vpop.f32.mrb[107].mxu1  ;;  %7377 = vmatmul.mubr.bf16.gmra.mrb[100].mxu0 %v2465_v41  ;;  %v2408_v37 = vmax.f32 %v2184_v36, 0.0 }
 0x39b   : > { %v2179_v16 = vadd.f32 %v9031_v14, %v2178_v11  ;;  %v2406_v39 = vmax.f32 %v2176_v27, 0.0 }
 0x39c   : > { %v2409_v53 = vmax.f32 %v2187_v15, 0.0 }
 0x39d   : > { %v2407_v7 = vmax.f32 %v2179_v16, 0.0 }
 0x39e   : > { %v2467_v47 = vpack.c.bf16 %v2409_v53, %v2408_v37 }
 0x39f   : > { %v2466_v17 = vpack.c.bf16 %v2407_v7, %v2406_v39  ;;  %v7306_v26 = vpop.f32.mrb[108].mxu1 }
 0x3a0   : > { %v2200_v45 = vadd.f32 %v7306_v26, %v9031_v14  ;;  %v2191_v18 = vpop.f32.mrb[109].mxu1 }
 0x3a1   : > { %v2192_v41 = vadd.f32 %v9031_v14, %v2191_v18  ;;  %v7307_v51 = vpop.f32.mrb[110].mxu1  ;;  %7380 = vmatprep.mubr.bf16.mxu0 %v2466_v17 }
 0x3a2   : > { %v2203_v1 = vadd.f32 %v7307_v51, %v9031_v14  ;;  %v2194_v11 = vpop.f32.mrb[111].mxu1  ;;  %7381 = vmatmul.mubr.bf16.gmra.mrb[104].mxu0 %v2467_v47  ;;  %v2412_v27 = vmax.f32 %v2200_v45, 0.0 }
 0x3a3   : > { %v2195_v36 = vadd.f32 %v9031_v14, %v2194_v11  ;;  %v2410_v15 = vmax.f32 %v2192_v41, 0.0 }
 0x3a4   : > { %v2413_v8 = vmax.f32 %v2203_v1, 0.0 }
 0x3a5   : > { %v2411_v16 = vmax.f32 %v2195_v36, 0.0 }
 0x3a6   : > { %v2469_v37 = vpack.c.bf16 %v2413_v8, %v2412_v27 }
 0x3a7   : > { %v2468_v53 = vpack.c.bf16 %v2411_v16, %v2410_v15  ;;  %v7310_v39 = vpop.f32.mrb[112].mxu1 }
 0x3a8   : > { %v2216_v7 = vadd.f32 %v7310_v39, %v9031_v14  ;;  %v2207_v26 = vpop.f32.mrb[113].mxu1 }
 0x3a9   : > { %v2208_v18 = vadd.f32 %v9031_v14, %v2207_v26  ;;  %v7311_v17 = vpop.f32.mrb[114].mxu1  ;;  %7384 = vmatprep.mubr.bf16.mxu0 %v2468_v53 }
 0x3aa   : > { %v2219_v35 = vadd.f32 %v7311_v17, %v9031_v14  ;;  %v2210_v51 = vpop.f32.mrb[115].mxu1  ;;  %7385 = vmatmul.mubr.bf16.gmra.mrb[108].mxu0 %v2469_v37  ;;  %v2416_v45 = vmax.f32 %v2216_v7, 0.0 }
 0x3ab   : > { %v2211_v47 = vadd.f32 %v9031_v14, %v2210_v51  ;;  %v2414_v41 = vmax.f32 %v2208_v18, 0.0 }
 0x3ac   : > { %v2417_v1 = vmax.f32 %v2219_v35, 0.0 }
 0x3ad   : > { %v2415_v11 = vmax.f32 %v2211_v47, 0.0 }
 0x3ae   : > { %v2471_v36 = vpack.c.bf16 %v2417_v1, %v2416_v45 }
 0x3af   : > { %v2470_v27 = vpack.c.bf16 %v2415_v11, %v2414_v41  ;;  %v7314_v8 = vpop.f32.mrb[116].mxu1 }
 0x3b0   : > { %v2232_v15 = vadd.f32 %v7314_v8, %v9031_v14  ;;  %v2223_v16 = vpop.f32.mrb[117].mxu1 }
 0x3b1   : > { %v2224_v39 = vadd.f32 %v9031_v14, %v2223_v16  ;;  %v7315_v26 = vpop.f32.mrb[118].mxu1  ;;  %7388 = vmatprep.mubr.bf16.mxu0 %v2470_v27 }
 0x3b2   : > { %v2235_v53 = vadd.f32 %v7315_v26, %v9031_v14  ;;  %v2226_v17 = vpop.f32.mrb[119].mxu1  ;;  %7389 = vmatmul.mubr.bf16.gmra.mrb[112].mxu0 %v2471_v36  ;;  %v2420_v7 = vmax.f32 %v2232_v15, 0.0 }
 0x3b3   : > { %v2227_v37 = vadd.f32 %v9031_v14, %v2226_v17  ;;  %v2418_v18 = vmax.f32 %v2224_v39, 0.0 }
 0x3b4   : > { %v2421_v35 = vmax.f32 %v2235_v53, 0.0 }
 0x3b5   : > { %v2419_v51 = vmax.f32 %v2227_v37, 0.0 }
 0x3b6   : > { %v2473_v47 = vpack.c.bf16 %v2421_v35, %v2420_v7 }
 0x3b7   : > { %v2472_v45 = vpack.c.bf16 %v2419_v51, %v2418_v18  ;;  %v7318_v1 = vpop.f32.mrb[120].mxu1 }
 0x3b8   : > { %v2248_v41 = vadd.f32 %v7318_v1, %v9031_v14  ;;  %v2239_v11 = vpop.f32.mrb[121].mxu1 }
 0x3b9   : > { %v2240_v8 = vadd.f32 %v9031_v14, %v2239_v11  ;;  %v7319_v16 = vpop.f32.mrb[122].mxu1  ;;  %7392 = vmatprep.mubr.bf16.mxu0 %v2472_v45 }
 0x3ba   : > { %v2251_v27 = vadd.f32 %v7319_v16, %v9031_v14  ;;  %v2242_v26 = vpop.f32.mrb[123].mxu1  ;;  %7393 = vmatmul.mubr.bf16.gmra.mrb[116].mxu0 %v2473_v47  ;;  %v2424_v15 = vmax.f32 %v2248_v41, 0.0 }
 0x3bb   : > { %v2243_v36 = vadd.f32 %v9031_v14, %v2242_v26  ;;  %v2422_v39 = vmax.f32 %v2240_v8, 0.0 }
 0x3bc   : > { %v2425_v53 = vmax.f32 %v2251_v27, 0.0 }
 0x3bd   : > { %v2423_v17 = vmax.f32 %v2243_v36, 0.0 }
 0x3be   : > { %v2475_v37 = vpack.c.bf16 %v2425_v53, %v2424_v15 }
 0x3bf   : > { %v2474_v7 = vpack.c.bf16 %v2423_v17, %v2422_v39  ;;  %v7322_v35 = vpop.f32.mrb[124].mxu1 }
 0x3c0   : > { %v2264_v18 = vadd.f32 %v7322_v35, %v9031_v14  ;;  %v2255_v51 = vpop.f32.mrb[125].mxu1 }
 0x3c1   : > { %v2256_v1 = vadd.f32 %v9031_v14, %v2255_v51  ;;  %v7323_v11 = vpop.f32.mrb[126].mxu1  ;;  %7396 = vmatprep.mubr.bf16.mxu0 %v2474_v7 }
 0x3c2   : > { %v2267_v45 = vadd.f32 %v7323_v11, %v9031_v14  ;;  %v2258_v16 = vpop.f32.mrb[127].mxu1  ;;  %7397 = vmatmul.mubr.bf16.gmra.mrb[120].mxu0 %v2475_v37  ;;  %v2428_v41 = vmax.f32 %v2264_v18, 0.0 }
 0x3c3   : > { %v2259_v47 = vadd.f32 %v9031_v14, %v2258_v16  ;;  %v2426_v8 = vmax.f32 %v2256_v1, 0.0 }
 0x3c4   : > { %v2429_v27 = vmax.f32 %v2267_v45, 0.0 }
 0x3c5   : > { %v2427_v26 = vmax.f32 %v2259_v47, 0.0 }
 0x3c6   : > { %v2477_v36 = vpack.c.bf16 %v2429_v27, %v2428_v41 }
 0x3c7   : > { %v2476_v15 = vpack.c.bf16 %v2427_v26, %v2426_v8  ;;  %v7326_v53 = vpop.f32.mrb[128].mxu1 }
 0x3c8   : > { %v2280_v39 = vadd.f32 %v7326_v53, %v9031_v14  ;;  %v2271_v17 = vpop.f32.mrb[129].mxu1 }
 0x3c9   : > { %v2272_v35 = vadd.f32 %v9031_v14, %v2271_v17  ;;  %v7327_v51 = vpop.f32.mrb[130].mxu1  ;;  %7400 = vmatprep.mubr.bf16.mxu0 %v2476_v15 }
 0x3ca   : > { %v2283_v7 = vadd.f32 %v7327_v51, %v9031_v14  ;;  %v2274_v11 = vpop.f32.mrb[131].mxu1  ;;  %7401 = vmatmul.mubr.bf16.gmra.mrb[124].mxu0 %v2477_v36  ;;  %v2432_v18 = vmax.f32 %v2280_v39, 0.0 }
 0x3cb   : > { %v2275_v37 = vadd.f32 %v9031_v14, %v2274_v11  ;;  %v2430_v1 = vmax.f32 %v2272_v35, 0.0 }
 0x3cc   : > { %v2433_v45 = vmax.f32 %v2283_v7, 0.0 }
 0x3cd   : > { %v2431_v16 = vmax.f32 %v2275_v37, 0.0 }
 0x3ce   : > { %v2479_v47 = vpack.c.bf16 %v2433_v45, %v2432_v18 }
 0x3cf   : > { %v2478_v41 = vpack.c.bf16 %v2431_v16, %v2430_v1  ;;  %v7330_v27 = vpop.f32.mrb[132].mxu1 }
 0x3d0   : > { %v2296_v8 = vadd.f32 %v7330_v27, %v9031_v14  ;;  %v2287_v26 = vpop.f32.mrb[133].mxu1 }
 0x3d1   : > { %v2288_v53 = vadd.f32 %v9031_v14, %v2287_v26  ;;  %v7331_v17 = vpop.f32.mrb[134].mxu1  ;;  %7404 = vmatprep.mubr.bf16.mxu0 %v2478_v41 }
 0x3d2   : > { %v2299_v15 = vadd.f32 %v7331_v17, %v9031_v14  ;;  %v2290_v51 = vpop.f32.mrb[135].mxu1  ;;  %7405 = vmatmul.mubr.bf16.gmra.mrb[128].mxu0 %v2479_v47  ;;  %v2436_v39 = vmax.f32 %v2296_v8, 0.0 }
 0x3d3   : > { %v2291_v36 = vadd.f32 %v9031_v14, %v2290_v51  ;;  %v2434_v35 = vmax.f32 %v2288_v53, 0.0 }
 0x3d4   : > { %v2437_v7 = vmax.f32 %v2299_v15, 0.0 }
 0x3d5   : > { %v2435_v11 = vmax.f32 %v2291_v36, 0.0 }
 0x3d6   : > { %v2481_v37 = vpack.c.bf16 %v2437_v7, %v2436_v39 }
 0x3d7   : > { %v2480_v18 = vpack.c.bf16 %v2435_v11, %v2434_v35  ;;  %v7334_v45 = vpop.f32.mrb[136].mxu1 }
 0x3d8   : > { %v2312_v1 = vadd.f32 %v7334_v45, %v9031_v14  ;;  %v2303_v16 = vpop.f32.mrb[137].mxu1 }
 0x3d9   : > { %v2304_v27 = vadd.f32 %v9031_v14, %v2303_v16  ;;  %v7335_v26 = vpop.f32.mrb[138].mxu1  ;;  %7408 = vmatprep.mubr.bf16.mxu0 %v2480_v18 }
 0x3da   : > { %v2315_v41 = vadd.f32 %v7335_v26, %v9031_v14  ;;  %v2306_v17 = vpop.f32.mrb[139].mxu1  ;;  %7409 = vmatmul.mubr.bf16.gmra.mrb[132].mxu0 %v2481_v37  ;;  %v2440_v8 = vmax.f32 %v2312_v1, 0.0 }
 0x3db   : > { %v2307_v47 = vadd.f32 %v9031_v14, %v2306_v17  ;;  %v2438_v53 = vmax.f32 %v2304_v27, 0.0 }
 0x3dc   : > { %v2441_v15 = vmax.f32 %v2315_v41, 0.0 }
 0x3dd   : > { %v2439_v51 = vmax.f32 %v2307_v47, 0.0 }
 0x3de   : > { %v2483_v36 = vpack.c.bf16 %v2441_v15, %v2440_v8 }
 0x3df   : > { %v2482_v39 = vpack.c.bf16 %v2439_v51, %v2438_v53  ;;  %v7338_v7 = vpop.f32.mrb[140].mxu1 }
 0x3e0   : > { %v2328_v35 = vadd.f32 %v7338_v7, %v9031_v14  ;;  %v2319_v11 = vpop.f32.mrb[141].mxu1 }
 0x3e1   : > { %v2320_v45 = vadd.f32 %v9031_v14, %v2319_v11  ;;  %v7339_v16 = vpop.f32.mrb[142].mxu1  ;;  %7412 = vmatprep.mubr.bf16.mxu0 %v2482_v39 }
 0x3e2   : > { %v2331_v18 = vadd.f32 %v7339_v16, %v9031_v14  ;;  %v2322_v26 = vpop.f32.mrb[143].mxu1  ;;  %7413 = vmatmul.mubr.bf16.gmra.mrb[136].mxu0 %v2483_v36  ;;  %v2444_v1 = vmax.f32 %v2328_v35, 0.0 }
 0x3e3   : > { %v2323_v37 = vadd.f32 %v9031_v14, %v2322_v26  ;;  %v2442_v27 = vmax.f32 %v2320_v45, 0.0 }
 0x3e4   : > { %v2445_v41 = vmax.f32 %v2331_v18, 0.0 }
 0x3e5   : > { %v2443_v17 = vmax.f32 %v2323_v37, 0.0 }
 0x3e6   : > { %v2485_v47 = vpack.c.bf16 %v2445_v41, %v2444_v1 }
 0x3e7   : > { %v2484_v8 = vpack.c.bf16 %v2443_v17, %v2442_v27  ;;  %v7342_v15 = vpop.f32.mrb[144].mxu1 }
 0x3e8   : > { %v2344_v53 = vadd.f32 %v7342_v15, %v9031_v14  ;;  %v2335_v51 = vpop.f32.mrb[145].mxu1 }
 0x3e9   : > { %v2336_v7 = vadd.f32 %v9031_v14, %v2335_v51  ;;  %v7343_v11 = vpop.f32.mrb[146].mxu1  ;;  %7416 = vmatprep.mubr.bf16.mxu0 %v2484_v8 }
 0x3ea   : > { %v2347_v39 = vadd.f32 %v7343_v11, %v9031_v14  ;;  %v2338_v16 = vpop.f32.mrb[147].mxu1  ;;  %7417 = vmatmul.mubr.bf16.gmra.mrb[140].mxu0 %v2485_v47  ;;  %v2448_v35 = vmax.f32 %v2344_v53, 0.0 }
 0x3eb   : > { %v2339_v36 = vadd.f32 %v9031_v14, %v2338_v16  ;;  %v2446_v45 = vmax.f32 %v2336_v7, 0.0 }
 0x3ec   : > { %v2449_v18 = vmax.f32 %v2347_v39, 0.0 }
 0x3ed   : > { %v2447_v26 = vmax.f32 %v2339_v36, 0.0 }
 0x3ee   : > { %v2487_v37 = vpack.c.bf16 %v2449_v18, %v2448_v35 }
 0x3ef   : > { %v2486_v1 = vpack.c.bf16 %v2447_v26, %v2446_v45  ;;  %v7346_v41 = vpop.f32.mrb[148].mxu1 }
 0x3f0   : > { %v2360_v27 = vadd.f32 %v7346_v41, %v9031_v14  ;;  %v2351_v17 = vpop.f32.mrb[149].mxu1 }
 0x3f1   : > { %v2352_v15 = vadd.f32 %v9031_v14, %v2351_v17  ;;  %v7347_v51 = vpop.f32.mrb[150].mxu1  ;;  %7420 = vmatprep.mubr.bf16.mxu0 %v2486_v1 }
 0x3f2   : > { %v2363_v8 = vadd.f32 %v7347_v51, %v9031_v14  ;;  %v2354_v11 = vpop.f32.mrb[151].mxu1  ;;  %7421 = vmatmul.mubr.bf16.gmra.mrb[144].mxu0 %v2487_v37  ;;  %v2452_v53 = vmax.f32 %v2360_v27, 0.0 }
 0x3f3   : > { %v2355_v47 = vadd.f32 %v9031_v14, %v2354_v11  ;;  %v2450_v7 = vmax.f32 %v2352_v15, 0.0 }
 0x3f4   : > { %v2453_v39 = vmax.f32 %v2363_v8, 0.0 }
 0x3f5   : > { %v2451_v16 = vmax.f32 %v2355_v47, 0.0 }
 0x3f6   : > { %v2489_v36 = vpack.c.bf16 %v2453_v39, %v2452_v53 }
 0x3f7   : > { %v2488_v35 = vpack.c.bf16 %v2451_v16, %v2450_v7  ;;  %v7350_v18 = vpop.f32.mrb[152].mxu1 }
 0x3f8   : > { %v2376_v45 = vadd.f32 %v7350_v18, %v9031_v14  ;;  %v2367_v26 = vpop.f32.mrb[153].mxu1 }
 0x3f9   : > { %v2368_v41 = vadd.f32 %v9031_v14, %v2367_v26  ;;  %v7351_v17 = vpop.f32.mrb[154].mxu1  ;;  %7424 = vmatprep.mubr.bf16.mxu0 %v2488_v35 }
 0x3fa   : > { %v2379_v1 = vadd.f32 %v7351_v17, %v9031_v14  ;;  %v2370_v51 = vpop.f32.mrb[155].mxu1  ;;  %7425 = vmatmul.mubr.bf16.gmra.mrb[148].mxu0 %v2489_v36  ;;  %v2456_v27 = vmax.f32 %v2376_v45, 0.0 }
 0x3fb   : > { %v2371_v37 = vadd.f32 %v9031_v14, %v2370_v51  ;;  %v2454_v15 = vmax.f32 %v2368_v41, 0.0 }
 0x3fc   : > { %v2457_v8 = vmax.f32 %v2379_v1, 0.0 }
 0x3fd   : > { %v2455_v11 = vmax.f32 %v2371_v37, 0.0 }
 0x3fe   : > { %v2491_v47 = vpack.c.bf16 %v2457_v8, %v2456_v27  ;;  %v7999_v8 = vld [vmem:[%s10830_s5 + $0x80] sm:$0xff]  }
 0x3ff   : > { %v2490_v53 = vpack.c.bf16 %v2455_v11, %v2454_v15  ;;  %v7354_v39 = vpop.f32.mrb[156].mxu1  ;;  %7516 = vmatprep.subr.bf16.mxu0 %v7999_v8  ;;  %v9124_v15 = vld [vmem:[%s10831_s6 + $0x1] ss:$0 sm:$0xff] }
 0x400   : > { %v2392_v7 = vadd.f32 %v7354_v39, %v9031_v14  ;;  %v2383_v16 = vpop.f32.mrb[157].mxu1  ;;  %7517 = vmatpush3.bf16.msra.mxu0 %v7999_v8 }
 0x401   : > { %v2384_v18 = vadd.f32 %v9031_v14, %v2383_v16  ;;  %v7355_v26 = vpop.f32.mrb[158].mxu1  ;;  %7428 = vmatprep.mubr.bf16.mxu0 %v2490_v53 }
 0x402   : > { %v2395_v35 = vadd.f32 %v7355_v26, %v9031_v14  ;;  %v2386_v17 = vpop.f32.mrb[159].mxu1  ;;  %7429 = vmatmul.mubr.bf16.gmra.mrb[152].mxu0 %v2491_v47  ;;  %v2460_v45 = vmax.f32 %v2392_v7, 0.0 }
 0x403   : > { %v2387_v36 = vadd.f32 %v9031_v14, %v2386_v17  ;;  %v2458_v41 = vmax.f32 %v2384_v18, 0.0  ;;  %v8000_v14 = vld [vmem:[%s10830_s5 + $0x88] sm:$0xff]  }
 0x404   : > { %v2461_v1 = vmax.f32 %v2395_v35, 0.0  ;;  %7518 = vmatprep.subr.bf16.mxu0 %v8000_v14 }
 0x405   : > { %v2459_v51 = vmax.f32 %v2387_v36, 0.0  ;;  %7519 = vmatpush3.bf16.msra.mxu0 %v8000_v14 }
 0x406   : > { %v2493_v37 = vpack.c.bf16 %v2461_v1, %v2460_v45  ;;  %v8001_v45 = vld [vmem:[%s10830_s5 + $0x90] sm:$0xff]   ;;  %v8002_v1 = vld [vmem:[%s10830_s5 + $0x98] sm:$0xff]  }
 0x407   : > { %v2492_v27 = vpack.c.bf16 %v2459_v51, %v2458_v41  ;;  %7520 = vmatprep.subr.bf16.mxu0 %v8001_v45 }
 0x409   : > { %7432 = vmatprep.mubr.bf16.mxu0 %v2492_v27  ;;  %7521 = vmatpush3.bf16.msra.mxu0 %v8001_v45 }
 0x40a   : > { %7433 = vmatmul.mubr.bf16.gmra.mrb[156].mxu0 %v2493_v37  ;;  %7522 = vmatprep.subr.bf16.mxu0 %v8002_v1 }
 0x40d   : > { %7523 = vmatpush3.bf16.msra.mxu0 %v8002_v1 }
 0x465   : > { %v7374_v11 = vpop.f32.mrb[96].mxu0 }
 0x466   : > { %v2610_v47 = vadd.f32 %v7374_v11, %v9124_v15  ;;  %v2601_v53 = vpop.f32.mrb[97].mxu0 }
 0x467   : > { %v2602_v39 = vadd.f32 %v9124_v15, %v2601_v53  ;;  %v7375_v7 = vpop.f32.mrb[98].mxu0 }
 0x468   : > { %v2613_v16 = vadd.f32 %v7375_v7, %v9124_v15  ;;  %v2604_v18 = vpop.f32.mrb[99].mxu0  ;;  %v9137_v17 = vadd.f32 %v2610_v47, %v8695_v57 }
 0x469   : > { %v9133_v26 = vadd.f32 %v2602_v39, %v8691_v55  ;;  %v2605_v35 = vadd.f32 %v9124_v15, %v2604_v18 }
 0x46a   : > { %v9140_v36 = vadd.f32 %v2613_v16, %v8698_v0  ;;  %v2922_v37 = vmax.f32 %v9137_v17, 0.0 }
 0x46b   : > { %v9149_v41 = vadd.f32 %v2605_v35, %v8707_v13  ;;  %v2920_v57 = vmax.f32 %v9133_v26, 0.0  ;;  %v8003_v13 = vld [vmem:[%s10830_s5 + $0xa0] sm:$0xff]  }
 0x46c   : > { %v2923_v55 = vmax.f32 %v9140_v36, 0.0  ;;  %7524 = vmatprep.subr.bf16.mxu0 %v8003_v13 }
 0x46d   : > { %v2921_v51 = vmax.f32 %v9149_v41, 0.0  ;;  %v7378_v0 = vpop.f32.mrb[100].mxu0  ;;  %7525 = vmatpush3.bf16.msra.mxu0 %v8003_v13 }
 0x46e   : > { %v2626_v27 = vadd.f32 %v7378_v0, %v9124_v15  ;;  %v2617_v8 = vpop.f32.mrb[101].mxu0  ;;  %v2985_v53 = vpack.c.bf16 %v2923_v55, %v2922_v37  ;;  %v8004_v55 = vld [vmem:[%s10830_s5 + $0xa8] sm:$0xff]  }
 0x46f   : > { %v2618_v14 = vadd.f32 %v9124_v15, %v2617_v8  ;;  %v7379_v11 = vpop.f32.mrb[102].mxu0  ;;  %v2984_v47 = vpack.c.bf16 %v2921_v51, %v2920_v57  ;;  %7526 = vmatprep.subr.bf16.mxu0 %v8004_v55 }
 0x470   : > { %v2629_v39 = vadd.f32 %v7379_v11, %v9124_v15  ;;  %v2620_v7 = vpop.f32.mrb[103].mxu0  ;;  %v9166_v35 = vadd.f32 %v2626_v27, %v8724_v54  ;;  %v8005_v27 = vld [vmem:[%s10830_s5 + $0xb0] sm:$0xff]  }
 0x471   : > { %v9162_v16 = vadd.f32 %v2618_v14, %v8720_v60  ;;  %v2621_v18 = vadd.f32 %v9124_v15, %v2620_v7  ;;  %7452 = vmatprep.mubr.bf16.mxu1 %v2984_v47  ;;  %7527 = vmatpush3.bf16.msra.mxu0 %v8004_v55 }
 0x472   : > { %v9169_v45 = vadd.f32 %v2629_v39, %v8727_v30  ;;  %7453 = vmatmul.mubr.bf16.vlgmr.msra.gmra.mrb[160].mxu1 %v2985_v53  ;;  %v2926_v30 = vmax.f32 %v9166_v35, 0.0  ;;  %7528 = vmatprep.subr.bf16.mxu0 %v8005_v27 }
 0x473   : > { %v9175_v57 = vadd.f32 %v2621_v18, %v8733_v46  ;;  %v2924_v51 = vmax.f32 %v9162_v16, 0.0 }
 0x474   : > { %v2927_v60 = vmax.f32 %v9169_v45, 0.0 }
 0x475   : > { %v2925_v1 = vmax.f32 %v9175_v57, 0.0  ;;  %v7382_v54 = vpop.f32.mrb[104].mxu0  ;;  %7529 = vmatpush3.bf16.msra.mxu0 %v8005_v27 }
 0x476   : > { %v2642_v0 = vadd.f32 %v7382_v54, %v9124_v15  ;;  %v2633_v37 = vpop.f32.mrb[105].mxu0  ;;  %v2987_v53 = vpack.c.bf16 %v2927_v60, %v2926_v30 }
 0x477   : > { %v2634_v46 = vadd.f32 %v9124_v15, %v2633_v37  ;;  %v7383_v8 = vpop.f32.mrb[106].mxu0  ;;  %v2986_v14 = vpack.c.bf16 %v2925_v1, %v2924_v51  ;;  %v8006_v51 = vld [vmem:[%s10830_s5 + $0xb8] sm:$0xff]  }
 0x478   : > { %v2645_v11 = vadd.f32 %v7383_v8, %v9124_v15  ;;  %v2636_v47 = vpop.f32.mrb[107].mxu0  ;;  %v9192_v7 = vadd.f32 %v2642_v0, %v8750_v42  ;;  %7530 = vmatprep.subr.bf16.mxu0 %v8006_v51 }
 0x479   : > { %v9188_v13 = vadd.f32 %v2634_v46, %v8746_v56  ;;  %v2637_v39 = vadd.f32 %v9124_v15, %v2636_v47  ;;  %7456 = vmatprep.mubr.bf16.mxu1 %v2986_v14  ;;  %7531 = vmatpush3.bf16.msra.mxu0 %v8006_v51 }
 0x47a   : > { %v9195_v18 = vadd.f32 %v2645_v11, %v8753_v50  ;;  %7457 = vmatmul.mubr.bf16.gmra.mrb[164].mxu1 %v2987_v53  ;;  %v2930_v50 = vmax.f32 %v9192_v7, 0.0 }
 0x47b   : > { %v9201_v60 = vadd.f32 %v2637_v39, %v8759_v2  ;;  %v2928_v1 = vmax.f32 %v9188_v13, 0.0 }
 0x47c   : > { %v2931_v56 = vmax.f32 %v9195_v18, 0.0 }
 0x47d   : > { %v2929_v55 = vmax.f32 %v9201_v60, 0.0  ;;  %v7386_v42 = vpop.f32.mrb[108].mxu0 }
 0x47e   : > { %v2658_v54 = vadd.f32 %v7386_v42, %v9124_v15  ;;  %v2649_v30 = vpop.f32.mrb[109].mxu0  ;;  %v2989_v14 = vpack.c.bf16 %v2931_v56, %v2930_v50 }
 0x47f   : > { %v2650_v0 = vadd.f32 %v9124_v15, %v2649_v30  ;;  %v7387_v37 = vpop.f32.mrb[110].mxu0  ;;  %v2988_v46 = vpack.c.bf16 %v2929_v55, %v2928_v1 }
 0x480   : > { %v2661_v2 = vadd.f32 %v7387_v37, %v9124_v15  ;;  %v2652_v8 = vpop.f32.mrb[111].mxu0  ;;  %v9215_v27 = vadd.f32 %v2658_v54, %v8773_v12 }
 0x481   : > { %v9211_v11 = vadd.f32 %v2650_v0, %v8769_v38  ;;  %v2653_v47 = vadd.f32 %v9124_v15, %v2652_v8  ;;  %7460 = vmatprep.mubr.bf16.mxu1 %v2988_v46 }
 0x482   : > { %v9218_v53 = vadd.f32 %v2661_v2, %v8776_v25  ;;  %7461 = vmatmul.mubr.bf16.gmra.mrb[168].mxu1 %v2989_v14  ;;  %v2934_v42 = vmax.f32 %v9215_v27, 0.0 }
 0x483   : > { %v9221_v39 = vadd.f32 %v2653_v47, %v8779_v62  ;;  %v2932_v56 = vmax.f32 %v9211_v11, 0.0 }
 0x484   : > { %v2935_v1 = vmax.f32 %v9218_v53, 0.0 }
 0x485   : > { %v2933_v38 = vmax.f32 %v9221_v39, 0.0  ;;  %v7390_v55 = vpop.f32.mrb[112].mxu0 }
 0x486   : > { %v2674_v51 = vadd.f32 %v7390_v55, %v9124_v15  ;;  %v2665_v12 = vpop.f32.mrb[113].mxu0  ;;  %v2991_v0 = vpack.c.bf16 %v2935_v1, %v2934_v42 }
 0x487   : > { %v2666_v50 = vadd.f32 %v9124_v15, %v2665_v12  ;;  %v7391_v25 = vpop.f32.mrb[114].mxu0  ;;  %v2990_v54 = vpack.c.bf16 %v2933_v38, %v2932_v56 }
 0x488   : > { %v2677_v30 = vadd.f32 %v7391_v25, %v9124_v15  ;;  %v2668_v62 = vpop.f32.mrb[115].mxu0  ;;  %v9235_v2 = vadd.f32 %v2674_v51, %v8793_v28 }
 0x489   : > { %v9231_v37 = vadd.f32 %v2666_v50, %v8789_v59  ;;  %v2669_v46 = vadd.f32 %v9124_v15, %v2668_v62  ;;  %7464 = vmatprep.mubr.bf16.mxu1 %v2990_v54 }
 0x48a   : > { %v9238_v8 = vadd.f32 %v2677_v30, %v8796_v31  ;;  %7465 = vmatmul.mubr.bf16.gmra.mrb[172].mxu1 %v2991_v0  ;;  %v2938_v38 = vmax.f32 %v9235_v2, 0.0 }
 0x48b   : > { %v9241_v14 = vadd.f32 %v2669_v46, %v8799_v34  ;;  %v2936_v1 = vmax.f32 %v9231_v37, 0.0 }
 0x48c   : > { %v2939_v47 = vmax.f32 %v9238_v8, 0.0 }
 0x48d   : > { %v2937_v59 = vmax.f32 %v9241_v14, 0.0  ;;  %v7394_v56 = vpop.f32.mrb[116].mxu0 }
 0x48e   : > { %v2690_v55 = vadd.f32 %v7394_v56, %v9124_v15  ;;  %v2681_v28 = vpop.f32.mrb[117].mxu0  ;;  %v2993_v50 = vpack.c.bf16 %v2939_v47, %v2938_v38 }
 0x48f   : > { %v2682_v42 = vadd.f32 %v9124_v15, %v2681_v28  ;;  %v7395_v31 = vpop.f32.mrb[118].mxu0  ;;  %v2992_v51 = vpack.c.bf16 %v2937_v59, %v2936_v1 }
 0x490   : > { %v2693_v12 = vadd.f32 %v7395_v31, %v9124_v15  ;;  %v2684_v34 = vpop.f32.mrb[119].mxu0  ;;  %v9255_v30 = vadd.f32 %v2690_v55, %v8813_v5 }
 0x491   : > { %v9251_v25 = vadd.f32 %v2682_v42, %v8809_v44  ;;  %v2685_v54 = vadd.f32 %v9124_v15, %v2684_v34  ;;  %7468 = vmatprep.mubr.bf16.mxu1 %v2992_v51  ;;  %v10996_v34 = vld [vmem:[#allocation3_spill] sm:$0xff] }
 0x492   : > { %v9258_v62 = vadd.f32 %v2693_v12, %v8816_v48  ;;  %7469 = vmatmul.mubr.bf16.gmra.mrb[176].mxu1 %v2993_v50  ;;  %v2942_v59 = vmax.f32 %v9255_v30, 0.0 }
 0x493   : > { %v9261_v0 = vadd.f32 %v2685_v54, %v8819_v52  ;;  %v2940_v47 = vmax.f32 %v9251_v25, 0.0  ;;  %v10998_v54 = vld [vmem:[#allocation4_spill] sm:$0xff] }
 0x494   : > { %v2943_v46 = vmax.f32 %v9258_v62, 0.0 }
 0x495   : > { %v2941_v44 = vmax.f32 %v9261_v0, 0.0  ;;  %v7398_v1 = vpop.f32.mrb[120].mxu0 }
 0x496   : > { %v2706_v56 = vadd.f32 %v7398_v1, %v9124_v15  ;;  %v2697_v5 = vpop.f32.mrb[121].mxu0  ;;  %v2995_v42 = vpack.c.bf16 %v2943_v46, %v2942_v59 }
 0x497   : > { %v2698_v38 = vadd.f32 %v9124_v15, %v2697_v5  ;;  %v7399_v48 = vpop.f32.mrb[122].mxu0  ;;  %v2994_v55 = vpack.c.bf16 %v2941_v44, %v2940_v47 }
 0x498   : > { %v2709_v28 = vadd.f32 %v7399_v48, %v9124_v15  ;;  %v2700_v52 = vpop.f32.mrb[123].mxu0  ;;  %v9275_v12 = vadd.f32 %v2706_v56, %v8833_v10 }
 0x499   : > { %v9271_v31 = vadd.f32 %v2698_v38, %v8829_v6  ;;  %v2701_v51 = vadd.f32 %v9124_v15, %v2700_v52  ;;  %7472 = vmatprep.mubr.bf16.mxu1 %v2994_v55 }
 0x49a   : > { %10995 = vst [vmem:[#allocation18_spill] sm:$0xff] %v9275_v12  ;;  %v9278_v50 = vadd.f32 %v2709_v28, %v10996_v34  ;;  %7473 = vmatmul.mubr.bf16.gmra.mrb[180].mxu1 %v2995_v42  ;;  %v2946_v59 = vmax.f32 %v9275_v12, 0.0  ;;  %v11000_v42 = vld [vmem:[#allocation5_spill] sm:$0xff] }
 0x49b   : > { %v9281_v1 = vadd.f32 %v2701_v51, %v10998_v54  ;;  %v2944_v46 = vmax.f32 %v9271_v31, 0.0  ;;  %v11001_v54 = vld [vmem:[#allocation23_spill] sm:$0xff] }
 0x49c   : > { %10997 = vst [vmem:[#allocation3_spill] sm:$0xff] %v9278_v50  ;;  %v2947_v47 = vmax.f32 %v9278_v50, 0.0  ;;  %v11002_v50 = vld [vmem:[#allocation8_spill] sm:$0xff] }
 0x49d   : > { %10999 = vst [vmem:[#allocation4_spill] sm:$0xff] %v9281_v1  ;;  %v2945_v6 = vmax.f32 %v9281_v1, 0.0  ;;  %v7402_v44 = vpop.f32.mrb[124].mxu0 }
 0x49e   : > { %v2722_v5 = vadd.f32 %v7402_v44, %v9124_v15  ;;  %v2713_v10 = vpop.f32.mrb[125].mxu0  ;;  %v2997_v52 = vpack.c.bf16 %v2947_v47, %v2946_v59 }
 0x49f   : > { %v2714_v56 = vadd.f32 %v9124_v15, %v2713_v10  ;;  %v7403_v38 = vpop.f32.mrb[126].mxu0  ;;  %v2996_v48 = vpack.c.bf16 %v2945_v6, %v2944_v46  ;;  %v11004_v10 = vld [vmem:[#allocation9_spill] sm:$0xff] }
 0x4a0   : > { %v2725_v55 = vadd.f32 %v7403_v38, %v9124_v15  ;;  %v2716_v28 = vpop.f32.mrb[127].mxu0  ;;  %v9295_v1 = vadd.f32 %v2722_v5, %v11001_v54 }
 0x4a1   : > { %v9291_v51 = vadd.f32 %v2714_v56, %v11000_v42  ;;  %v2717_v34 = vadd.f32 %v9124_v15, %v2716_v28  ;;  %7476 = vmatprep.mubr.bf16.mxu1 %v2996_v48 }
 0x4a2   : > { %v9298_v44 = vadd.f32 %v2725_v55, %v11002_v50  ;;  %7477 = vmatmul.mubr.bf16.gmra.mrb[184].mxu1 %v2997_v52  ;;  %v2950_v56 = vmax.f32 %v9295_v1, 0.0 }
 0x4a3   : > { %v9301_v12 = vadd.f32 %v2717_v34, %v11004_v10  ;;  %v2948_v47 = vmax.f32 %v9291_v51, 0.0 }
 0x4a4   : > { %11003 = vst [vmem:[#allocation5_spill] sm:$0xff] %v9298_v44  ;;  %v2951_v46 = vmax.f32 %v9298_v44, 0.0 }
 0x4a5   : > { %11005 = vst [vmem:[#allocation23_spill] sm:$0xff] %v9301_v12  ;;  %v2949_v6 = vmax.f32 %v9301_v12, 0.0  ;;  %v7406_v59 = vpop.f32.mrb[128].mxu0  ;;  %v11006_v12 = vld [vmem:[#allocation6_spill] sm:$0xff] }
 0x4a6   : > { %v2738_v38 = vadd.f32 %v7406_v59, %v9124_v15  ;;  %v2729_v5 = vpop.f32.mrb[129].mxu0  ;;  %v2999_v42 = vpack.c.bf16 %v2951_v46, %v2950_v56 }
 0x4a7   : > { %v2730_v48 = vadd.f32 %v9124_v15, %v2729_v5  ;;  %v7407_v50 = vpop.f32.mrb[130].mxu0  ;;  %v2998_v55 = vpack.c.bf16 %v2949_v6, %v2948_v47  ;;  %v11007_v5 = vld [vmem:[#allocation12_spill] sm:$0xff] }
 0x4a8   : > { %v2741_v28 = vadd.f32 %v7407_v50, %v9124_v15  ;;  %v2732_v52 = vpop.f32.mrb[131].mxu0  ;;  %v9315_v10 = vadd.f32 %v2738_v38, %v8873_v63 }
 0x4a9   : > { %v9311_v34 = vadd.f32 %v2730_v48, %v8869_v29  ;;  %v2733_v54 = vadd.f32 %v9124_v15, %v2732_v52  ;;  %7480 = vmatprep.mubr.bf16.mxu1 %v2998_v55 }
 0x4aa   : > { %v9318_v59 = vadd.f32 %v2741_v28, %v11006_v12  ;;  %7481 = vmatmul.mubr.bf16.gmra.mrb[188].mxu1 %v2999_v42  ;;  %v2954_v56 = vmax.f32 %v9315_v10, 0.0 }
 0x4ab   : > { %v9321_v44 = vadd.f32 %v2733_v54, %v11007_v5  ;;  %v2952_v46 = vmax.f32 %v9311_v34, 0.0 }
 0x4ac   : > { %v2955_v47 = vmax.f32 %v9318_v59, 0.0 }
 0x4ad   : > { %11008 = vst [vmem:[#allocation8_spill] sm:$0xff] %v9321_v44  ;;  %v2953_v29 = vmax.f32 %v9321_v44, 0.0  ;;  %v7410_v6 = vpop.f32.mrb[132].mxu0 }
 0x4ae   : > { %v2754_v48 = vadd.f32 %v7410_v6, %v9124_v15  ;;  %v2745_v63 = vpop.f32.mrb[133].mxu0  ;;  %v3001_v52 = vpack.c.bf16 %v2955_v47, %v2954_v56 }
 0x4af   : > { %v2746_v38 = vadd.f32 %v9124_v15, %v2745_v63  ;;  %v7411_v12 = vpop.f32.mrb[134].mxu0  ;;  %v3000_v50 = vpack.c.bf16 %v2953_v29, %v2952_v46  ;;  %v11009_v63 = vld [vmem:[#allocation13_spill] sm:$0xff] }
 0x4b0   : > { %v2757_v55 = vadd.f32 %v7411_v12, %v9124_v15  ;;  %v2748_v28 = vpop.f32.mrb[135].mxu0  ;;  %v9335_v5 = vadd.f32 %v2754_v48, %v8893_v20 }
 0x4b1   : > { %v9331_v42 = vadd.f32 %v2746_v38, %v8889_v61  ;;  %v2749_v54 = vadd.f32 %v9124_v15, %v2748_v28  ;;  %7484 = vmatprep.mubr.bf16.mxu1 %v3000_v50 }
 0x4b2   : > { %v9338_v6 = vadd.f32 %v2757_v55, %v8896_v58  ;;  %7485 = vmatmul.mubr.bf16.gmra.mrb[192].mxu1 %v3001_v52  ;;  %v2958_v56 = vmax.f32 %v9335_v5, 0.0 }
 0x4b3   : > { %v9341_v44 = vadd.f32 %v2749_v54, %v11009_v63  ;;  %v2956_v47 = vmax.f32 %v9331_v42, 0.0 }
 0x4b4   : > { %v2959_v46 = vmax.f32 %v9338_v6, 0.0 }
 0x4b5   : > { %v2957_v61 = vmax.f32 %v9341_v44, 0.0  ;;  %v7414_v29 = vpop.f32.mrb[136].mxu0 }
 0x4b6   : > { %v2770_v38 = vadd.f32 %v7414_v29, %v9124_v15  ;;  %v2761_v20 = vpop.f32.mrb[137].mxu0  ;;  %v3003_v28 = vpack.c.bf16 %v2959_v46, %v2958_v56 }
 0x4b7   : > { %v2762_v48 = vadd.f32 %v9124_v15, %v2761_v20  ;;  %v7415_v58 = vpop.f32.mrb[138].mxu0  ;;  %v3002_v12 = vpack.c.bf16 %v2957_v61, %v2956_v47 }
 0x4b8   : > { %v2773_v50 = vadd.f32 %v7415_v58, %v9124_v15  ;;  %v2764_v55 = vpop.f32.mrb[139].mxu0  ;;  %v9355_v63 = vadd.f32 %v2770_v38, %v8913_v49 }
 0x4b9   : > { %v9351_v52 = vadd.f32 %v2762_v48, %v8909_v40  ;;  %v2765_v54 = vadd.f32 %v9124_v15, %v2764_v55  ;;  %7488 = vmatprep.mubr.bf16.mxu1 %v3002_v12 }
 0x4ba   : > { %v9358_v29 = vadd.f32 %v2773_v50, %v8916_v19  ;;  %7489 = vmatmul.mubr.bf16.gmra.mrb[196].mxu1 %v3003_v28  ;;  %v2962_v56 = vmax.f32 %v9355_v63, 0.0 }
 0x4bb   : > { %v9361_v20 = vadd.f32 %v2765_v54, %v8919_v43  ;;  %v2960_v46 = vmax.f32 %v9351_v52, 0.0 }
 0x4bc   : > { %v2963_v47 = vmax.f32 %v9358_v29, 0.0 }
 0x4bd   : > { %v2961_v40 = vmax.f32 %v9361_v20, 0.0  ;;  %v7418_v61 = vpop.f32.mrb[140].mxu0 }
 0x4be   : > { %v2786_v48 = vadd.f32 %v7418_v61, %v9124_v15  ;;  %v2777_v49 = vpop.f32.mrb[141].mxu0  ;;  %v3005_v50 = vpack.c.bf16 %v2963_v47, %v2962_v56 }
 0x4bf   : > { %v2778_v38 = vadd.f32 %v9124_v15, %v2777_v49  ;;  %v7419_v19 = vpop.f32.mrb[142].mxu0  ;;  %v3004_v58 = vpack.c.bf16 %v2961_v40, %v2960_v46 }
 0x4c0   : > { %v2789_v12 = vadd.f32 %v7419_v19, %v9124_v15  ;;  %v2780_v43 = vpop.f32.mrb[143].mxu0  ;;  %v9375_v54 = vadd.f32 %v2786_v48, %v8933_v3 }
 0x4c1   : > { %v9371_v55 = vadd.f32 %v2778_v38, %v8929_v24  ;;  %v2781_v28 = vadd.f32 %v9124_v15, %v2780_v43  ;;  %7492 = vmatprep.mubr.bf16.mxu1 %v3004_v58 }
 0x4c2   : > { %v9378_v61 = vadd.f32 %v2789_v12, %v8936_v4  ;;  %7493 = vmatmul.mubr.bf16.gmra.mrb[200].mxu1 %v3005_v50  ;;  %v2966_v56 = vmax.f32 %v9375_v54, 0.0 }
 0x4c3   : > { %v9381_v49 = vadd.f32 %v2781_v28, %v8939_v32  ;;  %v2964_v47 = vmax.f32 %v9371_v55, 0.0 }
 0x4c4   : > { %v2967_v46 = vmax.f32 %v9378_v61, 0.0 }
 0x4c5   : > { %11010 = vst [vmem:[#allocation9_spill] sm:$0xff] %v9381_v49  ;;  %v2965_v24 = vmax.f32 %v9381_v49, 0.0  ;;  %v7422_v40 = vpop.f32.mrb[144].mxu0 }
 0x4c6   : > { %v2802_v38 = vadd.f32 %v7422_v40, %v9124_v15  ;;  %v2793_v3 = vpop.f32.mrb[145].mxu0  ;;  %v3007_v12 = vpack.c.bf16 %v2967_v46, %v2966_v56 }
 0x4c7   : > { %v2794_v48 = vadd.f32 %v9124_v15, %v2793_v3  ;;  %v7423_v4 = vpop.f32.mrb[146].mxu0  ;;  %v3006_v19 = vpack.c.bf16 %v2965_v24, %v2964_v47  ;;  %v11013_v3 = vld [vmem:[#allocation7_spill] sm:$0xff] }
 0x4c8   : > { %v2805_v58 = vadd.f32 %v7423_v4, %v9124_v15  ;;  %v2796_v32 = vpop.f32.mrb[147].mxu0  ;;  %v9395_v28 = vadd.f32 %v2802_v38, %v8953_v33 }
 0x4c9   : > { %v9391_v43 = vadd.f32 %v2794_v48, %v8949_v23  ;;  %v2797_v50 = vadd.f32 %v9124_v15, %v2796_v32  ;;  %7496 = vmatprep.mubr.bf16.mxu1 %v3006_v19 }
 0x4ca   : > { %11011 = vst [vmem:[#allocation6_spill] sm:$0xff] %v9395_v28  ;;  %v9398_v40 = vadd.f32 %v2805_v58, %v8956_v22  ;;  %7497 = vmatmul.mubr.bf16.gmra.mrb[204].mxu1 %v3007_v12  ;;  %v2970_v56 = vmax.f32 %v9395_v28, 0.0 }
 0x4cb   : > { %v9401_v49 = vadd.f32 %v2797_v50, %v11013_v3  ;;  %v2968_v46 = vmax.f32 %v9391_v43, 0.0  ;;  %v11016_v3 = vld [vmem:[#allocation10_spill] sm:$0xff] }
 0x4cc   : > { %11012 = vst [vmem:[#allocation12_spill] sm:$0xff] %v9398_v40  ;;  %v2971_v47 = vmax.f32 %v9398_v40, 0.0  ;;  %v11018_v40 = vld [vmem:[#allocation11_spill] sm:$0xff] }
 0x4cd   : > { %11014 = vst [vmem:[#allocation13_spill] sm:$0xff] %v9401_v49  ;;  %v2969_v23 = vmax.f32 %v9401_v49, 0.0  ;;  %v7426_v24 = vpop.f32.mrb[148].mxu0 }
 0x4ce   : > { %v2818_v48 = vadd.f32 %v7426_v24, %v9124_v15  ;;  %v2809_v33 = vpop.f32.mrb[149].mxu0  ;;  %v3009_v32 = vpack.c.bf16 %v2971_v47, %v2970_v56 }
 0x4cf   : > { %v2810_v38 = vadd.f32 %v9124_v15, %v2809_v33  ;;  %v7427_v22 = vpop.f32.mrb[150].mxu0  ;;  %v3008_v4 = vpack.c.bf16 %v2969_v23, %v2968_v46  ;;  %v11020_v33 = vld [vmem:[#allocation14_spill] sm:$0xff] }
 0x4d0   : > { %v2821_v19 = vadd.f32 %v7427_v22, %v9124_v15  ;;  %v2812_v58 = vpop.f32.mrb[151].mxu0  ;;  %v9415_v49 = vadd.f32 %v2818_v48, %v11016_v3 }
 0x4d1   : > { %v9411_v12 = vadd.f32 %v2810_v38, %v8969_v21  ;;  %v2813_v50 = vadd.f32 %v9124_v15, %v2812_v58  ;;  %7500 = vmatprep.mubr.bf16.mxu1 %v3008_v4 }
 0x4d2   : > { %11017 = vst [vmem:[#allocation10_spill] sm:$0xff] %v9415_v49  ;;  %v9418_v24 = vadd.f32 %v2821_v19, %v11018_v40  ;;  %7501 = vmatmul.mubr.bf16.gmra.mrb[208].mxu1 %v3009_v32  ;;  %v2974_v56 = vmax.f32 %v9415_v49, 0.0  ;;  %v11025_v49 = vld [vmem:[#allocation20_spill] sm:$0xff] }
 0x4d3   : > { %11015 = vst [vmem:[#allocation7_spill] sm:$0xff] %v9411_v12  ;;  %v9421_v28 = vadd.f32 %v2813_v50, %v11020_v33  ;;  %v2972_v47 = vmax.f32 %v9411_v12, 0.0  ;;  %v11022_v50 = vld [vmem:[#allocation15_spill] sm:$0xff] }
 0x4d4   : > { %11019 = vst [vmem:[#allocation11_spill] sm:$0xff] %v9418_v24  ;;  %v2975_v46 = vmax.f32 %v9418_v24, 0.0 }
 0x4d5   : > { %11021 = vst [vmem:[#allocation14_spill] sm:$0xff] %v9421_v28  ;;  %v2973_v21 = vmax.f32 %v9421_v28, 0.0  ;;  %v7430_v23 = vpop.f32.mrb[152].mxu0  ;;  %v11023_v28 = vld [vmem:[#allocation19_spill] sm:$0xff] }
 0x4d6   : > { %v2834_v38 = vadd.f32 %v7430_v23, %v9124_v15  ;;  %v2825_v48 = vpop.f32.mrb[153].mxu0  ;;  %v3011_v32 = vpack.c.bf16 %v2975_v46, %v2974_v56 }
 0x4d7   : > { %v2826_v22 = vadd.f32 %v9124_v15, %v2825_v48  ;;  %v7431_v40 = vpop.f32.mrb[154].mxu0  ;;  %v3010_v4 = vpack.c.bf16 %v2973_v21, %v2972_v47  ;;  %v11027_v48 = vld [vmem:[#allocation16_spill] sm:$0xff] }
 0x4d8   : > { %v2837_v19 = vadd.f32 %v7431_v40, %v9124_v15  ;;  %v2828_v58 = vpop.f32.mrb[155].mxu0  ;;  %v9435_v24 = vadd.f32 %v2834_v38, %v11023_v28 }
 0x4d9   : > { %v9431_v3 = vadd.f32 %v2826_v22, %v11022_v50  ;;  %v2829_v33 = vadd.f32 %v9124_v15, %v2828_v58  ;;  %7504 = vmatprep.mubr.bf16.mxu1 %v3010_v4 }
 0x4da   : > { %11024 = vst [vmem:[#allocation15_spill] sm:$0xff] %v9435_v24  ;;  %v9438_v23 = vadd.f32 %v2837_v19, %v11025_v49  ;;  %7505 = vmatmul.mubr.bf16.gmra.mrb[212].mxu1 %v3011_v32  ;;  %v2978_v22 = vmax.f32 %v9435_v24, 0.0 }
 0x4db   : > { %v9441_v12 = vadd.f32 %v2829_v33, %v11027_v48  ;;  %v2976_v46 = vmax.f32 %v9431_v3, 0.0  ;;  %v11029_v48 = vld [vmem:[#allocation17_spill] sm:$0xff] }
 0x4dc   : > { %11026 = vst [vmem:[#allocation19_spill] sm:$0xff] %v9438_v23  ;;  %v2979_v47 = vmax.f32 %v9438_v23, 0.0  ;;  %v11031_v23 = vld [vmem:[#allocation21_spill] sm:$0xff] }
 0x4dd   : > { %11028 = vst [vmem:[#allocation20_spill] sm:$0xff] %v9441_v12  ;;  %v2977_v21 = vmax.f32 %v9441_v12, 0.0  ;;  %v7434_v56 = vpop.f32.mrb[156].mxu0 }
 0x4de   : > { %v2850_v40 = vadd.f32 %v7434_v56, %v9124_v15  ;;  %v2841_v28 = vpop.f32.mrb[157].mxu0  ;;  %v3013_v32 = vpack.c.bf16 %v2979_v47, %v2978_v22 }
 0x4df   : > { %v2842_v38 = vadd.f32 %v9124_v15, %v2841_v28  ;;  %v7435_v49 = vpop.f32.mrb[158].mxu0  ;;  %v3012_v4 = vpack.c.bf16 %v2977_v21, %v2976_v46  ;;  %v11033_v28 = vld [vmem:[#allocation22_spill] sm:$0xff] }
 0x4e0   : > { %v2853_v19 = vadd.f32 %v7435_v49, %v9124_v15  ;;  %v2844_v58 = vpop.f32.mrb[159].mxu0  ;;  %v9455_v12 = vadd.f32 %v2850_v40, %v11029_v48  ;;  %v9473_v40 = vld [vmem:[%s10829_s4 + $0x2] ss:$0 sm:$0xff] }
 0x4e1   : > { %v9451_v50 = vadd.f32 %v2842_v38, %v9009_v9  ;;  %v2845_v33 = vadd.f32 %v9124_v15, %v2844_v58  ;;  %7508 = vmatprep.mubr.bf16.mxu1 %v3012_v4  ;;  %v8008_v38 = vld [vmem:[%s10828_s3 + $0xc8] sm:$0xff]  }
 0x4e2   : > { %11030 = vst [vmem:[#allocation16_spill] sm:$0xff] %v9455_v12  ;;  %v9458_v56 = vadd.f32 %v2853_v19, %v11031_v23  ;;  %7509 = vmatmul.mubr.bf16.gmra.mrb[216].mxu1 %v3013_v32  ;;  %v2982_v21 = vmax.f32 %v9455_v12, 0.0  ;;  %v8007_v23 = vld [vmem:[%s10828_s3 + $0xc0] sm:$0xff]  }
 0x4e3   : > { %v9461_v24 = vadd.f32 %v2845_v33, %v11033_v28  ;;  %v2980_v47 = vmax.f32 %v9451_v50, 0.0  ;;  %7596 = vmatprep.subr.bf16.mxu1 %v8007_v23  ;;  %v8009_v28 = vld [vmem:[%s10828_s3 + $0xd0] sm:$0xff]  }
 0x4e4   : > { %11032 = vst [vmem:[#allocation17_spill] sm:$0xff] %v9458_v56  ;;  %v2983_v46 = vmax.f32 %v9458_v56, 0.0  ;;  %7597 = vmatpush3.bf16.msra.mxu1 %v8007_v23 }
 0x4e5   : > { %11034 = vst [vmem:[#allocation21_spill] sm:$0xff] %v9461_v24  ;;  %v2981_v9 = vmax.f32 %v9461_v24, 0.0  ;;  %7598 = vmatprep.subr.bf16.mxu1 %v8008_v38 }
 0x4e6   : > { %v3015_v22 = vpack.c.bf16 %v2983_v46, %v2982_v21  ;;  %v8010_v46 = vld [vmem:[%s10828_s3 + $0xd8] sm:$0xff]  }
 0x4e7   : > { %v3014_v15 = vpack.c.bf16 %v2981_v9, %v2980_v47 }
 0x4e8   : > { %7599 = vmatpush3.bf16.msra.mxu1 %v8008_v38  ;;  %v8011_v38 = vld [vmem:[%s10828_s3 + $0xe0] sm:$0xff]  }
 0x4e9   : > { %7512 = vmatprep.mubr.bf16.mxu1 %v3014_v15  ;;  %7600 = vmatprep.subr.bf16.mxu1 %v8009_v28 }
 0x4ea   : > { %7513 = vmatmul.mubr.bf16.gmra.mrb[220].mxu1 %v3015_v22 }
 0x4ec   : > { %7601 = vmatpush3.bf16.msra.mxu1 %v8009_v28 }
 0x4ed   : > { %7602 = vmatprep.subr.bf16.mxu1 %v8010_v46 }
 0x4f0   : > { %7603 = vmatpush3.bf16.msra.mxu1 %v8010_v46  ;;  %v8013_v46 = vld [vmem:[%s10828_s3 + $0xf0] sm:$0xff]  }
 0x4f1   : > { %7604 = vmatprep.subr.bf16.mxu1 %v8011_v38 }
 0x4f4   : > { %7605 = vmatpush3.bf16.msra.mxu1 %v8011_v38  ;;  %v8014_v38 = vld [vmem:[%s10828_s3 + $0xf8] sm:$0xff]  }
 0x545   : > { %v7454_v49 = vpop.f32.mrb[160].mxu1 }
 0x546   : > { %v3132_v4 = vadd.f32 %v7454_v49, %v9473_v40  ;;  %v3123_v19 = vpop.f32.mrb[161].mxu1 }
 0x547   : > { %v3124_v58 = vadd.f32 %v9473_v40, %v3123_v19  ;;  %v7455_v32 = vpop.f32.mrb[162].mxu1 }
 0x548   : > { %v3135_v33 = vadd.f32 %v7455_v32, %v9473_v40  ;;  %v3126_v48 = vpop.f32.mrb[163].mxu1  ;;  %v3380_v9 = vmax.f32 %v3132_v4, 0.0 }
 0x549   : > { %v3127_v47 = vadd.f32 %v9473_v40, %v3126_v48  ;;  %v3378_v15 = vmax.f32 %v3124_v58, 0.0 }
 0x54a   : > { %v3381_v21 = vmax.f32 %v3135_v33, 0.0  ;;  %v8012_v33 = vld [vmem:[%s10828_s3 + $0xe8] sm:$0xff]  }
 0x54b   : > { %v3379_v22 = vmax.f32 %v3127_v47, 0.0  ;;  %7606 = vmatprep.subr.bf16.mxu1 %v8012_v33 }
 0x54c   : > { %v3443_v23 = vpack.c.bf16 %v3381_v21, %v3380_v9  ;;  %7607 = vmatpush3.bf16.msra.mxu1 %v8012_v33 }
 0x54d   : > { %v3442_v49 = vpack.c.bf16 %v3379_v22, %v3378_v15  ;;  %v7458_v19 = vpop.f32.mrb[164].mxu1  ;;  %7608 = vmatprep.subr.bf16.mxu1 %v8013_v46 }
 0x54e   : > { %v3148_v32 = vadd.f32 %v7458_v19, %v9473_v40  ;;  %v3139_v24 = vpop.f32.mrb[165].mxu1 }
 0x54f   : > { %v3140_v56 = vadd.f32 %v9473_v40, %v3139_v24  ;;  %v7459_v48 = vpop.f32.mrb[166].mxu1  ;;  %7532 = vmatprep.mubr.bf16.mxu0 %v3442_v49 }
 0x550   : > { %v3151_v4 = vadd.f32 %v7459_v48, %v9473_v40  ;;  %v3142_v58 = vpop.f32.mrb[167].mxu1  ;;  %7533 = vmatmul.mubr.bf16.vlgmr.msra.gmra.mrb[160].mxu0 %v3443_v23  ;;  %v3384_v47 = vmax.f32 %v3148_v32, 0.0  ;;  %7609 = vmatpush3.bf16.msra.mxu1 %v8013_v46 }
 0x551   : > { %v3143_v28 = vadd.f32 %v9473_v40, %v3142_v58  ;;  %v3382_v21 = vmax.f32 %v3140_v56, 0.0  ;;  %7610 = vmatprep.subr.bf16.mxu1 %v8014_v38 }
 0x552   : > { %v3385_v9 = vmax.f32 %v3151_v4, 0.0 }
 0x553   : > { %v3383_v15 = vmax.f32 %v3143_v28, 0.0 }
 0x554   : > { %v3445_v24 = vpack.c.bf16 %v3385_v9, %v3384_v47  ;;  %7611 = vmatpush3.bf16.msra.mxu1 %v8014_v38 }
 0x555   : > { %v3444_v22 = vpack.c.bf16 %v3383_v15, %v3382_v21  ;;  %v7462_v23 = vpop.f32.mrb[168].mxu1 }
 0x556   : > { %v3164_v49 = vadd.f32 %v7462_v23, %v9473_v40  ;;  %v3155_v19 = vpop.f32.mrb[169].mxu1 }
 0x557   : > { %v3156_v48 = vadd.f32 %v9473_v40, %v3155_v19  ;;  %v7463_v12 = vpop.f32.mrb[170].mxu1  ;;  %7536 = vmatprep.mubr.bf16.mxu0 %v3444_v22 }
 0x558   : > { %v3167_v56 = vadd.f32 %v7463_v12, %v9473_v40  ;;  %v3158_v32 = vpop.f32.mrb[171].mxu1  ;;  %7537 = vmatmul.mubr.bf16.gmra.mrb[164].mxu0 %v3445_v24  ;;  %v3388_v58 = vmax.f32 %v3164_v49, 0.0 }
 0x559   : > { %v3159_v4 = vadd.f32 %v9473_v40, %v3158_v32  ;;  %v3386_v47 = vmax.f32 %v3156_v48, 0.0 }
 0x55a   : > { %v3389_v28 = vmax.f32 %v3167_v56, 0.0 }
 0x55b   : > { %v3387_v9 = vmax.f32 %v3159_v4, 0.0 }
 0x55c   : > { %v3447_v21 = vpack.c.bf16 %v3389_v28, %v3388_v58 }
 0x55d   : > { %v3446_v15 = vpack.c.bf16 %v3387_v9, %v3386_v47  ;;  %v7466_v33 = vpop.f32.mrb[172].mxu1 }
 0x55e   : > { %v3180_v12 = vadd.f32 %v7466_v33, %v9473_v40  ;;  %v3171_v22 = vpop.f32.mrb[173].mxu1 }
 0x55f   : > { %v3172_v24 = vadd.f32 %v9473_v40, %v3171_v22  ;;  %v7467_v23 = vpop.f32.mrb[174].mxu1  ;;  %7540 = vmatprep.mubr.bf16.mxu0 %v3446_v15 }
 0x560   : > { %v3183_v19 = vadd.f32 %v7467_v23, %v9473_v40  ;;  %v3174_v32 = vpop.f32.mrb[175].mxu1  ;;  %7541 = vmatmul.mubr.bf16.gmra.mrb[168].mxu0 %v3447_v21  ;;  %v3392_v48 = vmax.f32 %v3180_v12, 0.0 }
 0x561   : > { %v3175_v49 = vadd.f32 %v9473_v40, %v3174_v32  ;;  %v3390_v56 = vmax.f32 %v3172_v24, 0.0 }
 0x562   : > { %v3393_v46 = vmax.f32 %v3183_v19, 0.0 }
 0x563   : > { %v3391_v4 = vmax.f32 %v3175_v49, 0.0 }
 0x564   : > { %v3449_v58 = vpack.c.bf16 %v3393_v46, %v3392_v48 }
 0x565   : > { %v3448_v28 = vpack.c.bf16 %v3391_v4, %v3390_v56  ;;  %v7470_v47 = vpop.f32.mrb[176].mxu1 }
 0x566   : > { %v3196_v9 = vadd.f32 %v7470_v47, %v9473_v40  ;;  %v3187_v33 = vpop.f32.mrb[177].mxu1 }
 0x567   : > { %v3188_v22 = vadd.f32 %v9473_v40, %v3187_v33  ;;  %v7471_v15 = vpop.f32.mrb[178].mxu1  ;;  %7544 = vmatprep.mubr.bf16.mxu0 %v3448_v28 }
 0x568   : > { %v3199_v38 = vadd.f32 %v7471_v15, %v9473_v40  ;;  %v3190_v23 = vpop.f32.mrb[179].mxu1  ;;  %7545 = vmatmul.mubr.bf16.gmra.mrb[172].mxu0 %v3449_v58  ;;  %v3396_v12 = vmax.f32 %v3196_v9, 0.0 }
 0x569   : > { %v3191_v21 = vadd.f32 %v9473_v40, %v3190_v23  ;;  %v3394_v24 = vmax.f32 %v3188_v22, 0.0 }
 0x56a   : > { %v3397_v19 = vmax.f32 %v3199_v38, 0.0 }
 0x56b   : > { %v3395_v32 = vmax.f32 %v3191_v21, 0.0 }
 0x56c   : > { %v3451_v49 = vpack.c.bf16 %v3397_v19, %v3396_v12 }
 0x56d   : > { %v3450_v48 = vpack.c.bf16 %v3395_v32, %v3394_v24  ;;  %v7474_v46 = vpop.f32.mrb[180].mxu1 }
 0x56e   : > { %v3212_v56 = vadd.f32 %v7474_v46, %v9473_v40  ;;  %v3203_v4 = vpop.f32.mrb[181].mxu1 }
 0x56f   : > { %v3204_v47 = vadd.f32 %v9473_v40, %v3203_v4  ;;  %v7475_v33 = vpop.f32.mrb[182].mxu1  ;;  %7548 = vmatprep.mubr.bf16.mxu0 %v3450_v48 }
 0x570   : > { %v3215_v28 = vadd.f32 %v7475_v33, %v9473_v40  ;;  %v3206_v15 = vpop.f32.mrb[183].mxu1  ;;  %7549 = vmatmul.mubr.bf16.gmra.mrb[176].mxu0 %v3451_v49  ;;  %v3400_v9 = vmax.f32 %v3212_v56, 0.0 }
 0x571   : > { %v3207_v58 = vadd.f32 %v9473_v40, %v3206_v15  ;;  %v3398_v22 = vmax.f32 %v3204_v47, 0.0 }
 0x572   : > { %v3401_v38 = vmax.f32 %v3215_v28, 0.0 }
 0x573   : > { %v3399_v23 = vmax.f32 %v3207_v58, 0.0 }
 0x574   : > { %v3453_v21 = vpack.c.bf16 %v3401_v38, %v3400_v9 }
 0x575   : > { %v3452_v12 = vpack.c.bf16 %v3399_v23, %v3398_v22  ;;  %v7478_v19 = vpop.f32.mrb[184].mxu1 }
 0x576   : > { %v3228_v24 = vadd.f32 %v7478_v19, %v9473_v40  ;;  %v3219_v32 = vpop.f32.mrb[185].mxu1 }
 0x577   : > { %v3220_v46 = vadd.f32 %v9473_v40, %v3219_v32  ;;  %v7479_v4 = vpop.f32.mrb[186].mxu1  ;;  %7552 = vmatprep.mubr.bf16.mxu0 %v3452_v12 }
 0x578   : > { %v3231_v48 = vadd.f32 %v7479_v4, %v9473_v40  ;;  %v3222_v33 = vpop.f32.mrb[187].mxu1  ;;  %7553 = vmatmul.mubr.bf16.gmra.mrb[180].mxu0 %v3453_v21  ;;  %v3404_v56 = vmax.f32 %v3228_v24, 0.0 }
 0x579   : > { %v3223_v49 = vadd.f32 %v9473_v40, %v3222_v33  ;;  %v3402_v47 = vmax.f32 %v3220_v46, 0.0 }
 0x57a   : > { %v3405_v28 = vmax.f32 %v3231_v48, 0.0 }
 0x57b   : > { %v3403_v15 = vmax.f32 %v3223_v49, 0.0 }
 0x57c   : > { %v3455_v58 = vpack.c.bf16 %v3405_v28, %v3404_v56 }
 0x57d   : > { %v3454_v9 = vpack.c.bf16 %v3403_v15, %v3402_v47  ;;  %v7482_v38 = vpop.f32.mrb[188].mxu1 }
 0x57e   : > { %v3244_v22 = vadd.f32 %v7482_v38, %v9473_v40  ;;  %v3235_v23 = vpop.f32.mrb[189].mxu1 }
 0x57f   : > { %v3236_v19 = vadd.f32 %v9473_v40, %v3235_v23  ;;  %v7483_v32 = vpop.f32.mrb[190].mxu1  ;;  %7556 = vmatprep.mubr.bf16.mxu0 %v3454_v9 }
 0x580   : > { %v3247_v12 = vadd.f32 %v7483_v32, %v9473_v40  ;;  %v3238_v4 = vpop.f32.mrb[191].mxu1  ;;  %7557 = vmatmul.mubr.bf16.gmra.mrb[184].mxu0 %v3455_v58  ;;  %v3408_v24 = vmax.f32 %v3244_v22, 0.0 }
 0x581   : > { %v3239_v21 = vadd.f32 %v9473_v40, %v3238_v4  ;;  %v3406_v46 = vmax.f32 %v3236_v19, 0.0 }
 0x582   : > { %v3409_v48 = vmax.f32 %v3247_v12, 0.0 }
 0x583   : > { %v3407_v33 = vmax.f32 %v3239_v21, 0.0 }
 0x584   : > { %v3457_v49 = vpack.c.bf16 %v3409_v48, %v3408_v24 }
 0x585   : > { %v3456_v56 = vpack.c.bf16 %v3407_v33, %v3406_v46  ;;  %v7486_v28 = vpop.f32.mrb[192].mxu1 }
 0x586   : > { %v3260_v47 = vadd.f32 %v7486_v28, %v9473_v40  ;;  %v3251_v15 = vpop.f32.mrb[193].mxu1 }
 0x587   : > { %v3252_v38 = vadd.f32 %v9473_v40, %v3251_v15  ;;  %v7487_v23 = vpop.f32.mrb[194].mxu1  ;;  %7560 = vmatprep.mubr.bf16.mxu0 %v3456_v56 }
 0x588   : > { %v3263_v9 = vadd.f32 %v7487_v23, %v9473_v40  ;;  %v3254_v32 = vpop.f32.mrb[195].mxu1  ;;  %7561 = vmatmul.mubr.bf16.gmra.mrb[188].mxu0 %v3457_v49  ;;  %v3412_v22 = vmax.f32 %v3260_v47, 0.0 }
 0x589   : > { %v3255_v58 = vadd.f32 %v9473_v40, %v3254_v32  ;;  %v3410_v19 = vmax.f32 %v3252_v38, 0.0 }
 0x58a   : > { %v3413_v12 = vmax.f32 %v3263_v9, 0.0 }
 0x58b   : > { %v3411_v4 = vmax.f32 %v3255_v58, 0.0 }
 0x58c   : > { %v3459_v21 = vpack.c.bf16 %v3413_v12, %v3412_v22 }
 0x58d   : > { %v3458_v24 = vpack.c.bf16 %v3411_v4, %v3410_v19  ;;  %v7490_v48 = vpop.f32.mrb[196].mxu1 }
 0x58e   : > { %v3276_v46 = vadd.f32 %v7490_v48, %v9473_v40  ;;  %v3267_v33 = vpop.f32.mrb[197].mxu1 }
 0x58f   : > { %v3268_v28 = vadd.f32 %v9473_v40, %v3267_v33  ;;  %v7491_v15 = vpop.f32.mrb[198].mxu1  ;;  %7564 = vmatprep.mubr.bf16.mxu0 %v3458_v24 }
 0x590   : > { %v3279_v56 = vadd.f32 %v7491_v15, %v9473_v40  ;;  %v3270_v23 = vpop.f32.mrb[199].mxu1  ;;  %7565 = vmatmul.mubr.bf16.gmra.mrb[192].mxu0 %v3459_v21  ;;  %v3416_v47 = vmax.f32 %v3276_v46, 0.0 }
 0x591   : > { %v3271_v49 = vadd.f32 %v9473_v40, %v3270_v23  ;;  %v3414_v38 = vmax.f32 %v3268_v28, 0.0 }
 0x592   : > { %v3417_v9 = vmax.f32 %v3279_v56, 0.0 }
 0x593   : > { %v3415_v32 = vmax.f32 %v3271_v49, 0.0 }
 0x594   : > { %v3461_v58 = vpack.c.bf16 %v3417_v9, %v3416_v47 }
 0x595   : > { %v3460_v22 = vpack.c.bf16 %v3415_v32, %v3414_v38  ;;  %v7494_v12 = vpop.f32.mrb[200].mxu1 }
 0x596   : > { %v3292_v19 = vadd.f32 %v7494_v12, %v9473_v40  ;;  %v3283_v4 = vpop.f32.mrb[201].mxu1 }
 0x597   : > { %v3284_v48 = vadd.f32 %v9473_v40, %v3283_v4  ;;  %v7495_v33 = vpop.f32.mrb[202].mxu1  ;;  %7568 = vmatprep.mubr.bf16.mxu0 %v3460_v22 }
 0x598   : > { %v3295_v24 = vadd.f32 %v7495_v33, %v9473_v40  ;;  %v3286_v15 = vpop.f32.mrb[203].mxu1  ;;  %7569 = vmatmul.mubr.bf16.gmra.mrb[196].mxu0 %v3461_v58  ;;  %v3420_v46 = vmax.f32 %v3292_v19, 0.0 }
 0x599   : > { %v3287_v21 = vadd.f32 %v9473_v40, %v3286_v15  ;;  %v3418_v28 = vmax.f32 %v3284_v48, 0.0 }
 0x59a   : > { %v3421_v56 = vmax.f32 %v3295_v24, 0.0 }
 0x59b   : > { %v3419_v23 = vmax.f32 %v3287_v21, 0.0 }
 0x59c   : > { %v3463_v49 = vpack.c.bf16 %v3421_v56, %v3420_v46 }
 0x59d   : > { %v3462_v47 = vpack.c.bf16 %v3419_v23, %v3418_v28  ;;  %v7498_v9 = vpop.f32.mrb[204].mxu1 }
 0x59e   : > { %v3308_v38 = vadd.f32 %v7498_v9, %v9473_v40  ;;  %v3299_v32 = vpop.f32.mrb[205].mxu1 }
 0x59f   : > { %v3300_v12 = vadd.f32 %v9473_v40, %v3299_v32  ;;  %v7499_v4 = vpop.f32.mrb[206].mxu1  ;;  %7572 = vmatprep.mubr.bf16.mxu0 %v3462_v47 }
 0x5a0   : > { %v3311_v22 = vadd.f32 %v7499_v4, %v9473_v40  ;;  %v3302_v33 = vpop.f32.mrb[207].mxu1  ;;  %7573 = vmatmul.mubr.bf16.gmra.mrb[200].mxu0 %v3463_v49  ;;  %v3424_v19 = vmax.f32 %v3308_v38, 0.0 }
 0x5a1   : > { %v3303_v58 = vadd.f32 %v9473_v40, %v3302_v33  ;;  %v3422_v48 = vmax.f32 %v3300_v12, 0.0 }
 0x5a2   : > { %v3425_v24 = vmax.f32 %v3311_v22, 0.0 }
 0x5a3   : > { %v3423_v15 = vmax.f32 %v3303_v58, 0.0 }
 0x5a4   : > { %v3465_v21 = vpack.c.bf16 %v3425_v24, %v3424_v19 }
 0x5a5   : > { %v3464_v46 = vpack.c.bf16 %v3423_v15, %v3422_v48  ;;  %v7502_v56 = vpop.f32.mrb[208].mxu1 }
 0x5a6   : > { %v3324_v28 = vadd.f32 %v7502_v56, %v9473_v40  ;;  %v3315_v23 = vpop.f32.mrb[209].mxu1 }
 0x5a7   : > { %v3316_v9 = vadd.f32 %v9473_v40, %v3315_v23  ;;  %v7503_v32 = vpop.f32.mrb[210].mxu1  ;;  %7576 = vmatprep.mubr.bf16.mxu0 %v3464_v46 }
 0x5a8   : > { %v3327_v47 = vadd.f32 %v7503_v32, %v9473_v40  ;;  %v3318_v4 = vpop.f32.mrb[211].mxu1  ;;  %7577 = vmatmul.mubr.bf16.gmra.mrb[204].mxu0 %v3465_v21  ;;  %v3428_v38 = vmax.f32 %v3324_v28, 0.0 }
 0x5a9   : > { %v3319_v49 = vadd.f32 %v9473_v40, %v3318_v4  ;;  %v3426_v12 = vmax.f32 %v3316_v9, 0.0 }
 0x5aa   : > { %v3429_v22 = vmax.f32 %v3327_v47, 0.0 }
 0x5ab   : > { %v3427_v33 = vmax.f32 %v3319_v49, 0.0 }
 0x5ac   : > { %v3467_v58 = vpack.c.bf16 %v3429_v22, %v3428_v38 }
 0x5ad   : > { %v3466_v19 = vpack.c.bf16 %v3427_v33, %v3426_v12  ;;  %v7506_v24 = vpop.f32.mrb[212].mxu1 }
 0x5ae   : > { %v3340_v48 = vadd.f32 %v7506_v24, %v9473_v40  ;;  %v3331_v15 = vpop.f32.mrb[213].mxu1 }
 0x5af   : > { %v3332_v56 = vadd.f32 %v9473_v40, %v3331_v15  ;;  %v7507_v23 = vpop.f32.mrb[214].mxu1  ;;  %7580 = vmatprep.mubr.bf16.mxu0 %v3466_v19 }
 0x5b0   : > { %v3343_v46 = vadd.f32 %v7507_v23, %v9473_v40  ;;  %v3334_v32 = vpop.f32.mrb[215].mxu1  ;;  %7581 = vmatmul.mubr.bf16.gmra.mrb[208].mxu0 %v3467_v58  ;;  %v3432_v28 = vmax.f32 %v3340_v48, 0.0 }
 0x5b1   : > { %v3335_v21 = vadd.f32 %v9473_v40, %v3334_v32  ;;  %v3430_v9 = vmax.f32 %v3332_v56, 0.0 }
 0x5b2   : > { %v3433_v47 = vmax.f32 %v3343_v46, 0.0 }
 0x5b3   : > { %v3431_v4 = vmax.f32 %v3335_v21, 0.0 }
 0x5b4   : > { %v3469_v49 = vpack.c.bf16 %v3433_v47, %v3432_v28 }
 0x5b5   : > { %v3468_v38 = vpack.c.bf16 %v3431_v4, %v3430_v9  ;;  %v7510_v22 = vpop.f32.mrb[216].mxu1 }
 0x5b6   : > { %v3356_v12 = vadd.f32 %v7510_v22, %v9473_v40  ;;  %v3347_v33 = vpop.f32.mrb[217].mxu1 }
 0x5b7   : > { %v3348_v24 = vadd.f32 %v9473_v40, %v3347_v33  ;;  %v7511_v15 = vpop.f32.mrb[218].mxu1  ;;  %7584 = vmatprep.mubr.bf16.mxu0 %v3468_v38 }
 0x5b8   : > { %v3359_v19 = vadd.f32 %v7511_v15, %v9473_v40  ;;  %v3350_v23 = vpop.f32.mrb[219].mxu1  ;;  %7585 = vmatmul.mubr.bf16.gmra.mrb[212].mxu0 %v3469_v49  ;;  %v3436_v48 = vmax.f32 %v3356_v12, 0.0 }
 0x5b9   : > { %v3351_v58 = vadd.f32 %v9473_v40, %v3350_v23  ;;  %v3434_v56 = vmax.f32 %v3348_v24, 0.0 }
 0x5ba   : > { %v3437_v46 = vmax.f32 %v3359_v19, 0.0 }
 0x5bb   : > { %v3435_v32 = vmax.f32 %v3351_v58, 0.0 }
 0x5bc   : > { %v3471_v21 = vpack.c.bf16 %v3437_v46, %v3436_v48  ;;  %v8015_v46 = vld [vmem:[%s10830_s5 + $0xc0] sm:$0xff]  }
 0x5bd   : > { %v3470_v28 = vpack.c.bf16 %v3435_v32, %v3434_v56  ;;  %v7514_v47 = vpop.f32.mrb[220].mxu1  ;;  %7676 = vmatprep.subr.bf16.mxu0 %v8015_v46  ;;  %v9566_v56 = vld [vmem:[%s10831_s6 + $0x2] ss:$0 sm:$0xff] }
 0x5be   : > { %v3372_v9 = vadd.f32 %v7514_v47, %v9473_v40  ;;  %v3363_v4 = vpop.f32.mrb[221].mxu1  ;;  %7677 = vmatpush3.bf16.msra.mxu0 %v8015_v46 }
 0x5bf   : > { %v3364_v22 = vadd.f32 %v9473_v40, %v3363_v4  ;;  %v7515_v33 = vpop.f32.mrb[222].mxu1  ;;  %7588 = vmatprep.mubr.bf16.mxu0 %v3470_v28  ;;  %v8016_v28 = vld [vmem:[%s10830_s5 + $0xc8] sm:$0xff]  }
 0x5c0   : > { %v3375_v38 = vadd.f32 %v7515_v33, %v9473_v40  ;;  %v3366_v15 = vpop.f32.mrb[223].mxu1  ;;  %7589 = vmatmul.mubr.bf16.gmra.mrb[216].mxu0 %v3471_v21  ;;  %v3440_v12 = vmax.f32 %v3372_v9, 0.0  ;;  %7678 = vmatprep.subr.bf16.mxu0 %v8016_v28 }
 0x5c1   : > { %v3367_v49 = vadd.f32 %v9473_v40, %v3366_v15  ;;  %v3438_v24 = vmax.f32 %v3364_v22, 0.0 }
 0x5c2   : > { %v3441_v19 = vmax.f32 %v3375_v38, 0.0  ;;  %7679 = vmatpush3.bf16.msra.mxu0 %v8016_v28 }
 0x5c3   : > { %v3439_v23 = vmax.f32 %v3367_v49, 0.0 }
 0x5c4   : > { %v3473_v58 = vpack.c.bf16 %v3441_v19, %v3440_v12  ;;  %v8017_v12 = vld [vmem:[%s10830_s5 + $0xd0] sm:$0xff]   ;;  %v8018_v19 = vld [vmem:[%s10830_s5 + $0xd8] sm:$0xff]  }
 0x5c5   : > { %v3472_v48 = vpack.c.bf16 %v3439_v23, %v3438_v24  ;;  %7680 = vmatprep.subr.bf16.mxu0 %v8017_v12 }
 0x5c6   : > { %7681 = vmatpush3.bf16.msra.mxu0 %v8017_v12 }
 0x5c7   : > { %7592 = vmatprep.mubr.bf16.mxu0 %v3472_v48  ;;  %7682 = vmatprep.subr.bf16.mxu0 %v8018_v19 }
 0x5c8   : > { %7593 = vmatmul.mubr.bf16.gmra.mrb[220].mxu0 %v3473_v58 }
 0x5ca   : > { %7683 = vmatpush3.bf16.msra.mxu0 %v8018_v19 }
 0x623   : > { %v7534_v40 = vpop.f32.mrb[160].mxu0 }
 0x624   : > { %v3590_v32 = vadd.f32 %v7534_v40, %v9566_v56  ;;  %v3581_v21 = vpop.f32.mrb[161].mxu0 }
 0x625   : > { %v3582_v47 = vadd.f32 %v9566_v56, %v3581_v21  ;;  %v7535_v9 = vpop.f32.mrb[162].mxu0 }
 0x626   : > { %v3593_v4 = vadd.f32 %v7535_v9, %v9566_v56  ;;  %v3584_v22 = vpop.f32.mrb[163].mxu0  ;;  %v9579_v15 = vadd.f32 %v3590_v32, %v9137_v17 }
 0x627   : > { %v9575_v33 = vadd.f32 %v3582_v47, %v9133_v26  ;;  %v3585_v38 = vadd.f32 %v9566_v56, %v3584_v22 }
 0x628   : > { %v9582_v49 = vadd.f32 %v3593_v4, %v9140_v36  ;;  %v3902_v58 = vmax.f32 %v9579_v15, 0.0 }
 0x629   : > { %v9591_v26 = vadd.f32 %v3585_v38, %v9149_v41  ;;  %v3900_v17 = vmax.f32 %v9575_v33, 0.0  ;;  %v8019_v41 = vld [vmem:[%s10830_s5 + $0xe0] sm:$0xff]  }
 0x62a   : > { %v3903_v24 = vmax.f32 %v9582_v49, 0.0  ;;  %7684 = vmatprep.subr.bf16.mxu0 %v8019_v41 }
 0x62b   : > { %v3901_v23 = vmax.f32 %v9591_v26, 0.0  ;;  %v7538_v36 = vpop.f32.mrb[164].mxu0  ;;  %7685 = vmatpush3.bf16.msra.mxu0 %v8019_v41 }
 0x62c   : > { %v3606_v48 = vadd.f32 %v7538_v36, %v9566_v56  ;;  %v3597_v46 = vpop.f32.mrb[165].mxu0  ;;  %v3965_v28 = vpack.c.bf16 %v3903_v24, %v3902_v58  ;;  %v8020_v24 = vld [vmem:[%s10830_s5 + $0xe8] sm:$0xff]  }
 0x62d   : > { %v3598_v40 = vadd.f32 %v9566_v56, %v3597_v46  ;;  %v7539_v32 = vpop.f32.mrb[166].mxu0  ;;  %v3964_v21 = vpack.c.bf16 %v3901_v23, %v3900_v17  ;;  %7686 = vmatprep.subr.bf16.mxu0 %v8020_v24 }
 0x62e   : > { %v3609_v47 = vadd.f32 %v7539_v32, %v9566_v56  ;;  %v3600_v9 = vpop.f32.mrb[167].mxu0  ;;  %v9608_v38 = vadd.f32 %v3606_v48, %v9166_v35  ;;  %v8021_v48 = vld [vmem:[%s10830_s5 + $0xf0] sm:$0xff]  }
 0x62f   : > { %v9604_v4 = vadd.f32 %v3598_v40, %v9162_v16  ;;  %v3601_v22 = vadd.f32 %v9566_v56, %v3600_v9  ;;  %7612 = vmatprep.mubr.bf16.mxu1 %v3964_v21  ;;  %7687 = vmatpush3.bf16.msra.mxu0 %v8020_v24 }
 0x630   : > { %v9611_v12 = vadd.f32 %v3609_v47, %v9169_v45  ;;  %7613 = vmatmul.mubr.bf16.vlgmr.msra.gmra.mrb[224].mxu1 %v3965_v28  ;;  %v3906_v45 = vmax.f32 %v9608_v38, 0.0  ;;  %7688 = vmatprep.subr.bf16.mxu0 %v8021_v48 }
 0x631   : > { %v9617_v17 = vadd.f32 %v3601_v22, %v9175_v57  ;;  %v3904_v23 = vmax.f32 %v9604_v4, 0.0 }
 0x632   : > { %v3907_v16 = vmax.f32 %v9611_v12, 0.0 }
 0x633   : > { %v3905_v19 = vmax.f32 %v9617_v17, 0.0  ;;  %v7542_v35 = vpop.f32.mrb[168].mxu0  ;;  %7689 = vmatpush3.bf16.msra.mxu0 %v8021_v48 }
 0x634   : > { %v3622_v36 = vadd.f32 %v7542_v35, %v9566_v56  ;;  %v3613_v58 = vpop.f32.mrb[169].mxu0  ;;  %v3967_v28 = vpack.c.bf16 %v3907_v16, %v3906_v45 }
 0x635   : > { %v3614_v57 = vadd.f32 %v9566_v56, %v3613_v58  ;;  %v7543_v46 = vpop.f32.mrb[170].mxu0  ;;  %v3966_v40 = vpack.c.bf16 %v3905_v19, %v3904_v23  ;;  %v8022_v23 = vld [vmem:[%s10830_s5 + $0xf8] sm:$0xff]  }
 0x636   : > { %v3625_v32 = vadd.f32 %v7543_v46, %v9566_v56  ;;  %v3616_v21 = vpop.f32.mrb[171].mxu0  ;;  %v9634_v9 = vadd.f32 %v3622_v36, %v9192_v7  ;;  %7690 = vmatprep.subr.bf16.mxu0 %v8022_v23 }
 0x637   : > { %v9630_v41 = vadd.f32 %v3614_v57, %v9188_v13  ;;  %v3617_v47 = vadd.f32 %v9566_v56, %v3616_v21  ;;  %7616 = vmatprep.mubr.bf16.mxu1 %v3966_v40  ;;  %7691 = vmatpush3.bf16.msra.mxu0 %v8022_v23 }
 0x638   : > { %v9637_v22 = vadd.f32 %v3625_v32, %v9195_v18  ;;  %7617 = vmatmul.mubr.bf16.gmra.mrb[228].mxu1 %v3967_v28  ;;  %v3910_v18 = vmax.f32 %v9634_v9, 0.0 }
 0x639   : > { %v9643_v16 = vadd.f32 %v3617_v47, %v9201_v60  ;;  %v3908_v19 = vmax.f32 %v9630_v41, 0.0 }
 0x63a   : > { %v3911_v13 = vmax.f32 %v9637_v22, 0.0 }
 0x63b   : > { %v3909_v24 = vmax.f32 %v9643_v16, 0.0  ;;  %v7546_v7 = vpop.f32.mrb[172].mxu0 }
 0x63c   : > { %v3638_v35 = vadd.f32 %v7546_v7, %v9566_v56  ;;  %v3629_v45 = vpop.f32.mrb[173].mxu0  ;;  %v3969_v40 = vpack.c.bf16 %v3911_v13, %v3910_v18 }
 0x63d   : > { %v3630_v36 = vadd.f32 %v9566_v56, %v3629_v45  ;;  %v7547_v58 = vpop.f32.mrb[174].mxu0  ;;  %v3968_v57 = vpack.c.bf16 %v3909_v24, %v3908_v19 }
 0x63e   : > { %v3641_v60 = vadd.f32 %v7547_v58, %v9566_v56  ;;  %v3632_v46 = vpop.f32.mrb[175].mxu0  ;;  %v9657_v48 = vadd.f32 %v3638_v35, %v9215_v27 }
 0x63f   : > { %v9653_v32 = vadd.f32 %v3630_v36, %v9211_v11  ;;  %v3633_v21 = vadd.f32 %v9566_v56, %v3632_v46  ;;  %7620 = vmatprep.mubr.bf16.mxu1 %v3968_v57 }
 0x640   : > { %v9660_v28 = vadd.f32 %v3641_v60, %v9218_v53  ;;  %7621 = vmatmul.mubr.bf16.gmra.mrb[232].mxu1 %v3969_v40  ;;  %v3914_v7 = vmax.f32 %v9657_v48, 0.0 }
 0x641   : > { %v9663_v47 = vadd.f32 %v3633_v21, %v9221_v39  ;;  %v3912_v13 = vmax.f32 %v9653_v32, 0.0 }
 0x642   : > { %v3915_v19 = vmax.f32 %v9660_v28, 0.0 }
 0x643   : > { %v3913_v11 = vmax.f32 %v9663_v47, 0.0  ;;  %v7550_v24 = vpop.f32.mrb[176].mxu0 }
 0x644   : > { %v3654_v23 = vadd.f32 %v7550_v24, %v9566_v56  ;;  %v3645_v27 = vpop.f32.mrb[177].mxu0  ;;  %v3971_v36 = vpack.c.bf16 %v3915_v19, %v3914_v7 }
 0x645   : > { %v3646_v18 = vadd.f32 %v9566_v56, %v3645_v27  ;;  %v7551_v53 = vpop.f32.mrb[178].mxu0  ;;  %v3970_v35 = vpack.c.bf16 %v3913_v11, %v3912_v13 }
 0x646   : > { %v3657_v45 = vadd.f32 %v7551_v53, %v9566_v56  ;;  %v3648_v39 = vpop.f32.mrb[179].mxu0  ;;  %v9677_v60 = vadd.f32 %v3654_v23, %v9235_v2 }
 0x647   : > { %v9673_v58 = vadd.f32 %v3646_v18, %v9231_v37  ;;  %v3649_v57 = vadd.f32 %v9566_v56, %v3648_v39  ;;  %7624 = vmatprep.mubr.bf16.mxu1 %v3970_v35 }
 0x648   : > { %v9680_v46 = vadd.f32 %v3657_v45, %v9238_v8  ;;  %7625 = vmatmul.mubr.bf16.gmra.mrb[236].mxu1 %v3971_v36  ;;  %v3918_v11 = vmax.f32 %v9677_v60, 0.0 }
 0x649   : > { %v9683_v40 = vadd.f32 %v3649_v57, %v9241_v14  ;;  %v3916_v19 = vmax.f32 %v9673_v58, 0.0 }
 0x64a   : > { %v3919_v21 = vmax.f32 %v9680_v46, 0.0 }
 0x64b   : > { %v3917_v37 = vmax.f32 %v9683_v40, 0.0  ;;  %v7554_v13 = vpop.f32.mrb[180].mxu0 }
 0x64c   : > { %v3670_v24 = vadd.f32 %v7554_v13, %v9566_v56  ;;  %v3661_v2 = vpop.f32.mrb[181].mxu0  ;;  %v3973_v18 = vpack.c.bf16 %v3919_v21, %v3918_v11 }
 0x64d   : > { %v3662_v7 = vadd.f32 %v9566_v56, %v3661_v2  ;;  %v7555_v8 = vpop.f32.mrb[182].mxu0  ;;  %v3972_v23 = vpack.c.bf16 %v3917_v37, %v3916_v19 }
 0x64e   : > { %v3673_v27 = vadd.f32 %v7555_v8, %v9566_v56  ;;  %v3664_v14 = vpop.f32.mrb[183].mxu0  ;;  %v9697_v45 = vadd.f32 %v3670_v24, %v9255_v30 }
 0x64f   : > { %v9693_v53 = vadd.f32 %v3662_v7, %v9251_v25  ;;  %v3665_v35 = vadd.f32 %v9566_v56, %v3664_v14  ;;  %7628 = vmatprep.mubr.bf16.mxu1 %v3972_v23 }
 0x650   : > { %v9700_v39 = vadd.f32 %v3673_v27, %v9258_v62  ;;  %7629 = vmatmul.mubr.bf16.gmra.mrb[240].mxu1 %v3973_v18  ;;  %v3922_v37 = vmax.f32 %v9697_v45, 0.0  ;;  %v11035_v27 = vld [vmem:[#allocation18_spill] sm:$0xff]  ;;  %v11036_v18 = vld [vmem:[#allocation3_spill] sm:$0xff] }
 0x651   : > { %v9703_v36 = vadd.f32 %v3665_v35, %v9261_v0  ;;  %v3920_v21 = vmax.f32 %v9693_v53, 0.0 }
 0x652   : > { %v3923_v57 = vmax.f32 %v9700_v39, 0.0 }
 0x653   : > { %v3921_v25 = vmax.f32 %v9703_v36, 0.0  ;;  %v7558_v19 = vpop.f32.mrb[184].mxu0 }
 0x654   : > { %v3686_v13 = vadd.f32 %v7558_v19, %v9566_v56  ;;  %v3677_v30 = vpop.f32.mrb[185].mxu0  ;;  %v3975_v7 = vpack.c.bf16 %v3923_v57, %v3922_v37  ;;  %v11038_v19 = vld [vmem:[#allocation4_spill] sm:$0xff] }
 0x655   : > { %v3678_v11 = vadd.f32 %v9566_v56, %v3677_v30  ;;  %v7559_v62 = vpop.f32.mrb[186].mxu0  ;;  %v3974_v24 = vpack.c.bf16 %v3921_v25, %v3920_v21 }
 0x656   : > { %v3689_v2 = vadd.f32 %v7559_v62, %v9566_v56  ;;  %v3680_v0 = vpop.f32.mrb[187].mxu0  ;;  %v9717_v14 = vadd.f32 %v3686_v13, %v11035_v27 }
 0x657   : > { %v9713_v8 = vadd.f32 %v3678_v11, %v9271_v31  ;;  %v3681_v23 = vadd.f32 %v9566_v56, %v3680_v0  ;;  %7632 = vmatprep.mubr.bf16.mxu1 %v3974_v24 }
 0x658   : > { %v9720_v35 = vadd.f32 %v3689_v2, %v11036_v18  ;;  %7633 = vmatmul.mubr.bf16.gmra.mrb[244].mxu1 %v3975_v7  ;;  %v3926_v37 = vmax.f32 %v9717_v14, 0.0 }
 0x659   : > { %v9723_v30 = vadd.f32 %v3681_v23, %v11038_v19  ;;  %v3924_v57 = vmax.f32 %v9713_v8, 0.0 }
 0x65a   : > { %11037 = vst [vmem:[#allocation22_spill] sm:$0xff] %v9720_v35  ;;  %v3927_v21 = vmax.f32 %v9720_v35, 0.0 }
 0x65b   : > { %11039 = vst [vmem:[#allocation18_spill] sm:$0xff] %v9723_v30  ;;  %v3925_v31 = vmax.f32 %v9723_v30, 0.0  ;;  %v7562_v25 = vpop.f32.mrb[188].mxu0  ;;  %v11040_v30 = vld [vmem:[#allocation5_spill] sm:$0xff] }
 0x65c   : > { %v3702_v11 = vadd.f32 %v7562_v25, %v9566_v56  ;;  %v3693_v13 = vpop.f32.mrb[189].mxu0  ;;  %v3977_v23 = vpack.c.bf16 %v3927_v21, %v3926_v37 }
 0x65d   : > { %v3694_v62 = vadd.f32 %v9566_v56, %v3693_v13  ;;  %v7563_v24 = vpop.f32.mrb[190].mxu0  ;;  %v3976_v2 = vpack.c.bf16 %v3925_v31, %v3924_v57  ;;  %v11041_v13 = vld [vmem:[#allocation23_spill] sm:$0xff] }
 0x65e   : > { %v3705_v0 = vadd.f32 %v7563_v24, %v9566_v56  ;;  %v3696_v7 = vpop.f32.mrb[191].mxu0  ;;  %v9737_v19 = vadd.f32 %v3702_v11, %v9295_v1 }
 0x65f   : > { %v9733_v27 = vadd.f32 %v3694_v62, %v9291_v51  ;;  %v3697_v18 = vadd.f32 %v9566_v56, %v3696_v7  ;;  %7636 = vmatprep.mubr.bf16.mxu1 %v3976_v2 }
 0x660   : > { %v9740_v25 = vadd.f32 %v3705_v0, %v11040_v30  ;;  %7637 = vmatmul.mubr.bf16.gmra.mrb[248].mxu1 %v3977_v23  ;;  %v3930_v37 = vmax.f32 %v9737_v19, 0.0 }
 0x661   : > { %v9743_v35 = vadd.f32 %v3697_v18, %v11041_v13  ;;  %v3928_v21 = vmax.f32 %v9733_v27, 0.0 }
 0x662   : > { %v3931_v57 = vmax.f32 %v9740_v25, 0.0 }
 0x663   : > { %11042 = vst [vmem:[#allocation3_spill] sm:$0xff] %v9743_v35  ;;  %v3929_v51 = vmax.f32 %v9743_v35, 0.0  ;;  %v7566_v31 = vpop.f32.mrb[192].mxu0 }
 0x664   : > { %v3718_v62 = vadd.f32 %v7566_v31, %v9566_v56  ;;  %v3709_v1 = vpop.f32.mrb[193].mxu0  ;;  %v3979_v7 = vpack.c.bf16 %v3931_v57, %v3930_v37 }
 0x665   : > { %v3710_v11 = vadd.f32 %v9566_v56, %v3709_v1  ;;  %v7567_v30 = vpop.f32.mrb[194].mxu0  ;;  %v3978_v24 = vpack.c.bf16 %v3929_v51, %v3928_v21  ;;  %v11043_v1 = vld [vmem:[#allocation8_spill] sm:$0xff] }
 0x666   : > { %v3721_v2 = vadd.f32 %v7567_v30, %v9566_v56  ;;  %v3712_v0 = vpop.f32.mrb[195].mxu0  ;;  %v9757_v13 = vadd.f32 %v3718_v62, %v9315_v10 }
 0x667   : > { %v9753_v23 = vadd.f32 %v3710_v11, %v9311_v34  ;;  %v3713_v18 = vadd.f32 %v9566_v56, %v3712_v0  ;;  %7640 = vmatprep.mubr.bf16.mxu1 %v3978_v24 }
 0x668   : > { %v9760_v31 = vadd.f32 %v3721_v2, %v9318_v59  ;;  %7641 = vmatmul.mubr.bf16.gmra.mrb[252].mxu1 %v3979_v7  ;;  %v3934_v37 = vmax.f32 %v9757_v13, 0.0 }
 0x669   : > { %v9763_v35 = vadd.f32 %v3713_v18, %v11043_v1  ;;  %v3932_v57 = vmax.f32 %v9753_v23, 0.0 }
 0x66a   : > { %v3935_v21 = vmax.f32 %v9760_v31, 0.0 }
 0x66b   : > { %v3933_v34 = vmax.f32 %v9763_v35, 0.0  ;;  %v7570_v51 = vpop.f32.mrb[196].mxu0 }
 0x66c   : > { %v3734_v11 = vadd.f32 %v7570_v51, %v9566_v56  ;;  %v3725_v10 = vpop.f32.mrb[197].mxu0  ;;  %v3981_v24 = vpack.c.bf16 %v3935_v21, %v3934_v37 }
 0x66d   : > { %v3726_v62 = vadd.f32 %v9566_v56, %v3725_v10  ;;  %v7571_v59 = vpop.f32.mrb[198].mxu0  ;;  %v3980_v30 = vpack.c.bf16 %v3933_v34, %v3932_v57 }
 0x66e   : > { %v3737_v2 = vadd.f32 %v7571_v59, %v9566_v56  ;;  %v3728_v0 = vpop.f32.mrb[199].mxu0  ;;  %v9777_v1 = vadd.f32 %v3734_v11, %v9335_v5 }
 0x66f   : > { %v9773_v7 = vadd.f32 %v3726_v62, %v9331_v42  ;;  %v3729_v18 = vadd.f32 %v9566_v56, %v3728_v0  ;;  %7644 = vmatprep.mubr.bf16.mxu1 %v3980_v30 }
 0x670   : > { %v9780_v51 = vadd.f32 %v3737_v2, %v9338_v6  ;;  %7645 = vmatmul.mubr.bf16.gmra.mrb[0].mxu1 %v3981_v24  ;;  %v3938_v37 = vmax.f32 %v9777_v1, 0.0 }
 0x671   : > { %v9783_v10 = vadd.f32 %v3729_v18, %v9341_v44  ;;  %v3936_v57 = vmax.f32 %v9773_v7, 0.0 }
 0x672   : > { %v3939_v21 = vmax.f32 %v9780_v51, 0.0 }
 0x673   : > { %v3937_v42 = vmax.f32 %v9783_v10, 0.0  ;;  %v7574_v34 = vpop.f32.mrb[200].mxu0 }
 0x674   : > { %v3750_v62 = vadd.f32 %v7574_v34, %v9566_v56  ;;  %v3741_v5 = vpop.f32.mrb[201].mxu0  ;;  %v3983_v30 = vpack.c.bf16 %v3939_v21, %v3938_v37 }
 0x675   : > { %v3742_v11 = vadd.f32 %v9566_v56, %v3741_v5  ;;  %v7575_v6 = vpop.f32.mrb[202].mxu0  ;;  %v3982_v59 = vpack.c.bf16 %v3937_v42, %v3936_v57 }
 0x676   : > { %v3753_v44 = vadd.f32 %v7575_v6, %v9566_v56  ;;  %v3744_v24 = vpop.f32.mrb[203].mxu0  ;;  %v9797_v18 = vadd.f32 %v3750_v62, %v9355_v63 }
 0x677   : > { %v9793_v2 = vadd.f32 %v3742_v11, %v9351_v52  ;;  %v3745_v0 = vadd.f32 %v9566_v56, %v3744_v24  ;;  %7648 = vmatprep.mubr.bf16.mxu1 %v3982_v59 }
 0x678   : > { %v9800_v34 = vadd.f32 %v3753_v44, %v9358_v29  ;;  %7649 = vmatmul.mubr.bf16.gmra.mrb[4].mxu1 %v3983_v30  ;;  %v3942_v37 = vmax.f32 %v9797_v18, 0.0 }
 0x679   : > { %v9803_v5 = vadd.f32 %v3745_v0, %v9361_v20  ;;  %v3940_v57 = vmax.f32 %v9793_v2, 0.0 }
 0x67a   : > { %v3943_v21 = vmax.f32 %v9800_v34, 0.0 }
 0x67b   : > { %11044 = vst [vmem:[#allocation4_spill] sm:$0xff] %v9803_v5  ;;  %v3941_v52 = vmax.f32 %v9803_v5, 0.0  ;;  %v7578_v42 = vpop.f32.mrb[204].mxu0 }
 0x67c   : > { %v3766_v11 = vadd.f32 %v7578_v42, %v9566_v56  ;;  %v3757_v63 = vpop.f32.mrb[205].mxu0  ;;  %v3985_v59 = vpack.c.bf16 %v3943_v21, %v3942_v37 }
 0x67d   : > { %v3758_v62 = vadd.f32 %v9566_v56, %v3757_v63  ;;  %v7579_v29 = vpop.f32.mrb[206].mxu0  ;;  %v3984_v6 = vpack.c.bf16 %v3941_v52, %v3940_v57  ;;  %v11047_v63 = vld [vmem:[#allocation9_spill] sm:$0xff] }
 0x67e   : > { %v3769_v20 = vadd.f32 %v7579_v29, %v9566_v56  ;;  %v3760_v30 = vpop.f32.mrb[207].mxu0  ;;  %v9817_v0 = vadd.f32 %v3766_v11, %v9375_v54 }
 0x67f   : > { %v9813_v44 = vadd.f32 %v3758_v62, %v9371_v55  ;;  %v3761_v24 = vadd.f32 %v9566_v56, %v3760_v30  ;;  %7652 = vmatprep.mubr.bf16.mxu1 %v3984_v6 }
 0x680   : > { %11045 = vst [vmem:[#allocation5_spill] sm:$0xff] %v9817_v0  ;;  %v9820_v42 = vadd.f32 %v3769_v20, %v9378_v61  ;;  %7653 = vmatmul.mubr.bf16.gmra.mrb[8].mxu1 %v3985_v59  ;;  %v3946_v37 = vmax.f32 %v9817_v0, 0.0 }
 0x681   : > { %v9823_v5 = vadd.f32 %v3761_v24, %v11047_v63  ;;  %v3944_v57 = vmax.f32 %v9813_v44, 0.0  ;;  %v11050_v63 = vld [vmem:[#allocation6_spill] sm:$0xff] }
 0x682   : > { %11046 = vst [vmem:[#allocation23_spill] sm:$0xff] %v9820_v42  ;;  %v3947_v21 = vmax.f32 %v9820_v42, 0.0  ;;  %v11052_v42 = vld [vmem:[#allocation12_spill] sm:$0xff] }
 0x683   : > { %11048 = vst [vmem:[#allocation8_spill] sm:$0xff] %v9823_v5  ;;  %v3945_v55 = vmax.f32 %v9823_v5, 0.0  ;;  %v7582_v52 = vpop.f32.mrb[208].mxu0 }
 0x684   : > { %v3782_v62 = vadd.f32 %v7582_v52, %v9566_v56  ;;  %v3773_v54 = vpop.f32.mrb[209].mxu0  ;;  %v3987_v6 = vpack.c.bf16 %v3947_v21, %v3946_v37 }
 0x685   : > { %v3774_v11 = vadd.f32 %v9566_v56, %v3773_v54  ;;  %v7583_v61 = vpop.f32.mrb[210].mxu0  ;;  %v3986_v29 = vpack.c.bf16 %v3945_v55, %v3944_v57  ;;  %v11054_v54 = vld [vmem:[#allocation13_spill] sm:$0xff] }
 0x686   : > { %v3785_v59 = vadd.f32 %v7583_v61, %v9566_v56  ;;  %v3776_v20 = vpop.f32.mrb[211].mxu0  ;;  %v9837_v5 = vadd.f32 %v3782_v62, %v11050_v63 }
 0x687   : > { %v9833_v30 = vadd.f32 %v3774_v11, %v9391_v43  ;;  %v3777_v24 = vadd.f32 %v9566_v56, %v3776_v20  ;;  %7656 = vmatprep.mubr.bf16.mxu1 %v3986_v29 }
 0x688   : > { %11051 = vst [vmem:[#allocation6_spill] sm:$0xff] %v9837_v5  ;;  %v9840_v52 = vadd.f32 %v3785_v59, %v11052_v42  ;;  %7657 = vmatmul.mubr.bf16.gmra.mrb[12].mxu1 %v3987_v6  ;;  %v3950_v37 = vmax.f32 %v9837_v5, 0.0  ;;  %v11059_v5 = vld [vmem:[#allocation11_spill] sm:$0xff] }
 0x689   : > { %11049 = vst [vmem:[#allocation9_spill] sm:$0xff] %v9833_v30  ;;  %v9843_v0 = vadd.f32 %v3777_v24, %v11054_v54  ;;  %v3948_v57 = vmax.f32 %v9833_v30, 0.0  ;;  %v11056_v24 = vld [vmem:[#allocation7_spill] sm:$0xff] }
 0x68a   : > { %11053 = vst [vmem:[#allocation12_spill] sm:$0xff] %v9840_v52  ;;  %v3951_v21 = vmax.f32 %v9840_v52, 0.0 }
 0x68b   : > { %11055 = vst [vmem:[#allocation13_spill] sm:$0xff] %v9843_v0  ;;  %v3949_v43 = vmax.f32 %v9843_v0, 0.0  ;;  %v7586_v55 = vpop.f32.mrb[212].mxu0  ;;  %v11057_v0 = vld [vmem:[#allocation10_spill] sm:$0xff] }
 0x68c   : > { %v3798_v11 = vadd.f32 %v7586_v55, %v9566_v56  ;;  %v3789_v62 = vpop.f32.mrb[213].mxu0  ;;  %v3989_v6 = vpack.c.bf16 %v3951_v21, %v3950_v37 }
 0x68d   : > { %v3790_v61 = vadd.f32 %v9566_v56, %v3789_v62  ;;  %v7587_v42 = vpop.f32.mrb[214].mxu0  ;;  %v3988_v29 = vpack.c.bf16 %v3949_v43, %v3948_v57  ;;  %v11061_v62 = vld [vmem:[#allocation14_spill] sm:$0xff] }
 0x68e   : > { %v3801_v59 = vadd.f32 %v7587_v42, %v9566_v56  ;;  %v3792_v20 = vpop.f32.mrb[215].mxu0  ;;  %v9857_v52 = vadd.f32 %v3798_v11, %v11057_v0 }
 0x68f   : > { %v9853_v63 = vadd.f32 %v3790_v61, %v11056_v24  ;;  %v3793_v54 = vadd.f32 %v9566_v56, %v3792_v20  ;;  %7660 = vmatprep.mubr.bf16.mxu1 %v3988_v29 }
 0x690   : > { %11058 = vst [vmem:[#allocation7_spill] sm:$0xff] %v9857_v52  ;;  %v9860_v55 = vadd.f32 %v3801_v59, %v11059_v5  ;;  %7661 = vmatmul.mubr.bf16.gmra.mrb[16].mxu1 %v3989_v6  ;;  %v3954_v61 = vmax.f32 %v9857_v52, 0.0 }
 0x691   : > { %v9863_v30 = vadd.f32 %v3793_v54, %v11061_v62  ;;  %v3952_v57 = vmax.f32 %v9853_v63, 0.0  ;;  %v11063_v62 = vld [vmem:[#allocation15_spill] sm:$0xff] }
 0x692   : > { %11060 = vst [vmem:[#allocation10_spill] sm:$0xff] %v9860_v55  ;;  %v3955_v21 = vmax.f32 %v9860_v55, 0.0  ;;  %v11065_v55 = vld [vmem:[#allocation19_spill] sm:$0xff] }
 0x693   : > { %11062 = vst [vmem:[#allocation11_spill] sm:$0xff] %v9863_v30  ;;  %v3953_v43 = vmax.f32 %v9863_v30, 0.0  ;;  %v7590_v37 = vpop.f32.mrb[216].mxu0 }
 0x694   : > { %v3814_v42 = vadd.f32 %v7590_v37, %v9566_v56  ;;  %v3805_v0 = vpop.f32.mrb[217].mxu0  ;;  %v3991_v6 = vpack.c.bf16 %v3955_v21, %v3954_v61 }
 0x695   : > { %v3806_v11 = vadd.f32 %v9566_v56, %v3805_v0  ;;  %v7591_v5 = vpop.f32.mrb[218].mxu0  ;;  %v3990_v29 = vpack.c.bf16 %v3953_v43, %v3952_v57  ;;  %v11067_v0 = vld [vmem:[#allocation20_spill] sm:$0xff] }
 0x696   : > { %v3817_v59 = vadd.f32 %v7591_v5, %v9566_v56  ;;  %v3808_v20 = vpop.f32.mrb[219].mxu0  ;;  %v9877_v30 = vadd.f32 %v3814_v42, %v11063_v62 }
 0x697   : > { %v9873_v24 = vadd.f32 %v3806_v11, %v9431_v3  ;;  %v3809_v54 = vadd.f32 %v9566_v56, %v3808_v20  ;;  %7664 = vmatprep.mubr.bf16.mxu1 %v3990_v29 }
 0x698   : > { %11064 = vst [vmem:[#allocation14_spill] sm:$0xff] %v9877_v30  ;;  %v9880_v37 = vadd.f32 %v3817_v59, %v11065_v55  ;;  %7665 = vmatmul.mubr.bf16.gmra.mrb[20].mxu1 %v3991_v6  ;;  %v3958_v61 = vmax.f32 %v9877_v30, 0.0 }
 0x699   : > { %v9883_v52 = vadd.f32 %v3809_v54, %v11067_v0  ;;  %v3956_v57 = vmax.f32 %v9873_v24, 0.0  ;;  %v11069_v0 = vld [vmem:[#allocation16_spill] sm:$0xff] }
 0x69a   : > { %11066 = vst [vmem:[#allocation15_spill] sm:$0xff] %v9880_v37  ;;  %v3959_v21 = vmax.f32 %v9880_v37, 0.0  ;;  %v11071_v37 = vld [vmem:[#allocation17_spill] sm:$0xff] }
 0x69b   : > { %11068 = vst [vmem:[#allocation19_spill] sm:$0xff] %v9883_v52  ;;  %v3957_v3 = vmax.f32 %v9883_v52, 0.0  ;;  %v7594_v43 = vpop.f32.mrb[220].mxu0 }
 0x69c   : > { %v3830_v11 = vadd.f32 %v7594_v43, %v9566_v56  ;;  %v3821_v42 = vpop.f32.mrb[221].mxu0  ;;  %v3993_v6 = vpack.c.bf16 %v3959_v21, %v3958_v61 }
 0x69d   : > { %v3822_v5 = vadd.f32 %v9566_v56, %v3821_v42  ;;  %v7595_v55 = vpop.f32.mrb[222].mxu0  ;;  %v3992_v29 = vpack.c.bf16 %v3957_v3, %v3956_v57  ;;  %v11073_v42 = vld [vmem:[#allocation21_spill] sm:$0xff] }
 0x69e   : > { %v3833_v59 = vadd.f32 %v7595_v55, %v9566_v56  ;;  %v3824_v20 = vpop.f32.mrb[223].mxu0  ;;  %v9897_v52 = vadd.f32 %v3830_v11, %v11069_v0  ;;  %v9915_v11 = vld [vmem:[%s10829_s4 + $0x3] ss:$0 sm:$0xff] }
 0x69f   : > { %v9893_v54 = vadd.f32 %v3822_v5, %v9451_v50  ;;  %v3825_v62 = vadd.f32 %v9566_v56, %v3824_v20  ;;  %7668 = vmatprep.mubr.bf16.mxu1 %v3992_v29  ;;  %v8024_v5 = vld [vmem:[%s10828_s3 + $0x108] sm:$0xff]  }
 0x6a0   : > { %11070 = vst [vmem:[#allocation20_spill] sm:$0xff] %v9897_v52  ;;  %v9900_v43 = vadd.f32 %v3833_v59, %v11071_v37  ;;  %7669 = vmatmul.mubr.bf16.gmra.mrb[24].mxu1 %v3993_v6  ;;  %v3962_v3 = vmax.f32 %v9897_v52, 0.0  ;;  %v8023_v37 = vld [vmem:[%s10828_s3 + $0x100] sm:$0xff]  }
 0x6a1   : > { %v9903_v30 = vadd.f32 %v3825_v62, %v11073_v42  ;;  %v3960_v57 = vmax.f32 %v9893_v54, 0.0  ;;  %7756 = vmatprep.subr.bf16.mxu1 %v8023_v37  ;;  %v8025_v42 = vld [vmem:[%s10828_s3 + $0x110] sm:$0xff]  }
 0x6a2   : > { %11072 = vst [vmem:[#allocation16_spill] sm:$0xff] %v9900_v43  ;;  %v3963_v21 = vmax.f32 %v9900_v43, 0.0  ;;  %7757 = vmatpush3.bf16.msra.mxu1 %v8023_v37 }
 0x6a3   : > { %11074 = vst [vmem:[#allocation17_spill] sm:$0xff] %v9903_v30  ;;  %v3961_v50 = vmax.f32 %v9903_v30, 0.0  ;;  %7758 = vmatprep.subr.bf16.mxu1 %v8024_v5 }
 0x6a4   : > { %v3995_v61 = vpack.c.bf16 %v3963_v21, %v3962_v3  ;;  %v8026_v21 = vld [vmem:[%s10828_s3 + $0x118] sm:$0xff]  }
 0x6a5   : > { %v3994_v56 = vpack.c.bf16 %v3961_v50, %v3960_v57 }
 0x6a6   : > { %7759 = vmatpush3.bf16.msra.mxu1 %v8024_v5  ;;  %v8027_v5 = vld [vmem:[%s10828_s3 + $0x120] sm:$0xff]  }
 0x6a7   : > { %7672 = vmatprep.mubr.bf16.mxu1 %v3994_v56  ;;  %7760 = vmatprep.subr.bf16.mxu1 %v8025_v42 }
 0x6a8   : > { %7673 = vmatmul.mubr.bf16.gmra.mrb[28].mxu1 %v3995_v61 }
 0x6aa   : > { %7761 = vmatpush3.bf16.msra.mxu1 %v8025_v42 }
 0x6ab   : > { %7762 = vmatprep.subr.bf16.mxu1 %v8026_v21 }
 0x6ae   : > { %7763 = vmatpush3.bf16.msra.mxu1 %v8026_v21  ;;  %v8029_v21 = vld [vmem:[%s10828_s3 + $0x130] sm:$0xff]  }
 0x6af   : > { %7764 = vmatprep.subr.bf16.mxu1 %v8027_v5 }
 0x6b2   : > { %7765 = vmatpush3.bf16.msra.mxu1 %v8027_v5  ;;  %v8030_v5 = vld [vmem:[%s10828_s3 + $0x138] sm:$0xff]  }
 0x703   : > { %v7614_v55 = vpop.f32.mrb[224].mxu1 }
 0x704   : > { %v4112_v29 = vadd.f32 %v7614_v55, %v9915_v11  ;;  %v4103_v6 = vpop.f32.mrb[225].mxu1 }
 0x705   : > { %v4104_v59 = vadd.f32 %v9915_v11, %v4103_v6  ;;  %v7615_v20 = vpop.f32.mrb[226].mxu1 }
 0x706   : > { %v4115_v62 = vadd.f32 %v7615_v20, %v9915_v11  ;;  %v4106_v0 = vpop.f32.mrb[227].mxu1  ;;  %v4360_v50 = vmax.f32 %v4112_v29, 0.0 }
 0x707   : > { %v4107_v57 = vadd.f32 %v9915_v11, %v4106_v0  ;;  %v4358_v56 = vmax.f32 %v4104_v59, 0.0 }
 0x708   : > { %v4361_v3 = vmax.f32 %v4115_v62, 0.0  ;;  %v8028_v62 = vld [vmem:[%s10828_s3 + $0x128] sm:$0xff]  }
 0x709   : > { %v4359_v61 = vmax.f32 %v4107_v57, 0.0  ;;  %7766 = vmatprep.subr.bf16.mxu1 %v8028_v62 }
 0x70a   : > { %v4423_v37 = vpack.c.bf16 %v4361_v3, %v4360_v50  ;;  %7767 = vmatpush3.bf16.msra.mxu1 %v8028_v62 }
 0x70b   : > { %v4422_v55 = vpack.c.bf16 %v4359_v61, %v4358_v56  ;;  %v7618_v6 = vpop.f32.mrb[228].mxu1  ;;  %7768 = vmatprep.subr.bf16.mxu1 %v8029_v21 }
 0x70c   : > { %v4128_v20 = vadd.f32 %v7618_v6, %v9915_v11  ;;  %v4119_v30 = vpop.f32.mrb[229].mxu1 }
 0x70d   : > { %v4120_v43 = vadd.f32 %v9915_v11, %v4119_v30  ;;  %v7619_v0 = vpop.f32.mrb[230].mxu1  ;;  %7692 = vmatprep.mubr.bf16.mxu0 %v4422_v55 }
 0x70e   : > { %v4131_v29 = vadd.f32 %v7619_v0, %v9915_v11  ;;  %v4122_v59 = vpop.f32.mrb[231].mxu1  ;;  %7693 = vmatmul.mubr.bf16.vlgmr.msra.gmra.mrb[224].mxu0 %v4423_v37  ;;  %v4364_v57 = vmax.f32 %v4128_v20, 0.0  ;;  %7769 = vmatpush3.bf16.msra.mxu1 %v8029_v21 }
 0x70f   : > { %v4123_v42 = vadd.f32 %v9915_v11, %v4122_v59  ;;  %v4362_v3 = vmax.f32 %v4120_v43, 0.0  ;;  %7770 = vmatprep.subr.bf16.mxu1 %v8030_v5 }
 0x710   : > { %v4365_v50 = vmax.f32 %v4131_v29, 0.0 }
 0x711   : > { %v4363_v56 = vmax.f32 %v4123_v42, 0.0 }
 0x712   : > { %v4425_v30 = vpack.c.bf16 %v4365_v50, %v4364_v57  ;;  %7771 = vmatpush3.bf16.msra.mxu1 %v8030_v5 }
 0x713   : > { %v4424_v61 = vpack.c.bf16 %v4363_v56, %v4362_v3  ;;  %v7622_v37 = vpop.f32.mrb[232].mxu1 }
 0x714   : > { %v4144_v55 = vadd.f32 %v7622_v37, %v9915_v11  ;;  %v4135_v6 = vpop.f32.mrb[233].mxu1 }
 0x715   : > { %v4136_v0 = vadd.f32 %v9915_v11, %v4135_v6  ;;  %v7623_v52 = vpop.f32.mrb[234].mxu1  ;;  %7696 = vmatprep.mubr.bf16.mxu0 %v4424_v61 }
 0x716   : > { %v4147_v43 = vadd.f32 %v7623_v52, %v9915_v11  ;;  %v4138_v20 = vpop.f32.mrb[235].mxu1  ;;  %7697 = vmatmul.mubr.bf16.gmra.mrb[228].mxu0 %v4425_v30  ;;  %v4368_v59 = vmax.f32 %v4144_v55, 0.0 }
 0x717   : > { %v4139_v29 = vadd.f32 %v9915_v11, %v4138_v20  ;;  %v4366_v57 = vmax.f32 %v4136_v0, 0.0 }
 0x718   : > { %v4369_v42 = vmax.f32 %v4147_v43, 0.0 }
 0x719   : > { %v4367_v50 = vmax.f32 %v4139_v29, 0.0 }
 0x71a   : > { %v4427_v3 = vpack.c.bf16 %v4369_v42, %v4368_v59 }
 0x71b   : > { %v4426_v56 = vpack.c.bf16 %v4367_v50, %v4366_v57  ;;  %v7626_v62 = vpop.f32.mrb[236].mxu1 }
 0x71c   : > { %v4160_v52 = vadd.f32 %v7626_v62, %v9915_v11  ;;  %v4151_v61 = vpop.f32.mrb[237].mxu1 }
 0x71d   : > { %v4152_v30 = vadd.f32 %v9915_v11, %v4151_v61  ;;  %v7627_v37 = vpop.f32.mrb[238].mxu1  ;;  %7700 = vmatprep.mubr.bf16.mxu0 %v4426_v56 }
 0x71e   : > { %v4163_v6 = vadd.f32 %v7627_v37, %v9915_v11  ;;  %v4154_v20 = vpop.f32.mrb[239].mxu1  ;;  %7701 = vmatmul.mubr.bf16.gmra.mrb[232].mxu0 %v4427_v3  ;;  %v4372_v0 = vmax.f32 %v4160_v52, 0.0 }
 0x71f   : > { %v4155_v55 = vadd.f32 %v9915_v11, %v4154_v20  ;;  %v4370_v43 = vmax.f32 %v4152_v30, 0.0 }
 0x720   : > { %v4373_v21 = vmax.f32 %v4163_v6, 0.0 }
 0x721   : > { %v4371_v29 = vmax.f32 %v4155_v55, 0.0 }
 0x722   : > { %v4429_v59 = vpack.c.bf16 %v4373_v21, %v4372_v0 }
 0x723   : > { %v4428_v42 = vpack.c.bf16 %v4371_v29, %v4370_v43  ;;  %v7630_v57 = vpop.f32.mrb[240].mxu1 }
 0x724   : > { %v4176_v50 = vadd.f32 %v7630_v57, %v9915_v11  ;;  %v4167_v62 = vpop.f32.mrb[241].mxu1 }
 0x725   : > { %v4168_v61 = vadd.f32 %v9915_v11, %v4167_v62  ;;  %v7631_v56 = vpop.f32.mrb[242].mxu1  ;;  %7704 = vmatprep.mubr.bf16.mxu0 %v4428_v42 }
 0x726   : > { %v4179_v5 = vadd.f32 %v7631_v56, %v9915_v11  ;;  %v4170_v37 = vpop.f32.mrb[243].mxu1  ;;  %7705 = vmatmul.mubr.bf16.gmra.mrb[236].mxu0 %v4429_v59  ;;  %v4376_v52 = vmax.f32 %v4176_v50, 0.0 }
 0x727   : > { %v4171_v3 = vadd.f32 %v9915_v11, %v4170_v37  ;;  %v4374_v30 = vmax.f32 %v4168_v61, 0.0 }
 0x728   : > { %v4377_v6 = vmax.f32 %v4179_v5, 0.0 }
 0x729   : > { %v4375_v20 = vmax.f32 %v4171_v3, 0.0 }
 0x72a   : > { %v4431_v55 = vpack.c.bf16 %v4377_v6, %v4376_v52 }
 0x72b   : > { %v4430_v0 = vpack.c.bf16 %v4375_v20, %v4374_v30  ;;  %v7634_v21 = vpop.f32.mrb[244].mxu1 }
 0x72c   : > { %v4192_v43 = vadd.f32 %v7634_v21, %v9915_v11  ;;  %v4183_v29 = vpop.f32.mrb[245].mxu1 }
 0x72d   : > { %v4184_v57 = vadd.f32 %v9915_v11, %v4183_v29  ;;  %v7635_v62 = vpop.f32.mrb[246].mxu1  ;;  %7708 = vmatprep.mubr.bf16.mxu0 %v4430_v0 }
 0x72e   : > { %v4195_v42 = vadd.f32 %v7635_v62, %v9915_v11  ;;  %v4186_v56 = vpop.f32.mrb[247].mxu1  ;;  %7709 = vmatmul.mubr.bf16.gmra.mrb[240].mxu0 %v4431_v55  ;;  %v4380_v50 = vmax.f32 %v4192_v43, 0.0 }
 0x72f   : > { %v4187_v59 = vadd.f32 %v9915_v11, %v4186_v56  ;;  %v4378_v61 = vmax.f32 %v4184_v57, 0.0 }
 0x730   : > { %v4381_v5 = vmax.f32 %v4195_v42, 0.0 }
 0x731   : > { %v4379_v37 = vmax.f32 %v4187_v59, 0.0 }
 0x732   : > { %v4433_v3 = vpack.c.bf16 %v4381_v5, %v4380_v50 }
 0x733   : > { %v4432_v52 = vpack.c.bf16 %v4379_v37, %v4378_v61  ;;  %v7638_v6 = vpop.f32.mrb[248].mxu1 }
 0x734   : > { %v4208_v30 = vadd.f32 %v7638_v6, %v9915_v11  ;;  %v4199_v20 = vpop.f32.mrb[249].mxu1 }
 0x735   : > { %v4200_v21 = vadd.f32 %v9915_v11, %v4199_v20  ;;  %v7639_v29 = vpop.f32.mrb[250].mxu1  ;;  %7712 = vmatprep.mubr.bf16.mxu0 %v4432_v52 }
 0x736   : > { %v4211_v0 = vadd.f32 %v7639_v29, %v9915_v11  ;;  %v4202_v62 = vpop.f32.mrb[251].mxu1  ;;  %7713 = vmatmul.mubr.bf16.gmra.mrb[244].mxu0 %v4433_v3  ;;  %v4384_v43 = vmax.f32 %v4208_v30, 0.0 }
 0x737   : > { %v4203_v55 = vadd.f32 %v9915_v11, %v4202_v62  ;;  %v4382_v57 = vmax.f32 %v4200_v21, 0.0 }
 0x738   : > { %v4385_v42 = vmax.f32 %v4211_v0, 0.0 }
 0x739   : > { %v4383_v56 = vmax.f32 %v4203_v55, 0.0 }
 0x73a   : > { %v4435_v59 = vpack.c.bf16 %v4385_v42, %v4384_v43 }
 0x73b   : > { %v4434_v50 = vpack.c.bf16 %v4383_v56, %v4382_v57  ;;  %v7642_v5 = vpop.f32.mrb[252].mxu1 }
 0x73c   : > { %v4224_v61 = vadd.f32 %v7642_v5, %v9915_v11  ;;  %v4215_v37 = vpop.f32.mrb[253].mxu1 }
 0x73d   : > { %v4216_v6 = vadd.f32 %v9915_v11, %v4215_v37  ;;  %v7643_v20 = vpop.f32.mrb[254].mxu1  ;;  %7716 = vmatprep.mubr.bf16.mxu0 %v4434_v50 }
 0x73e   : > { %v4227_v52 = vadd.f32 %v7643_v20, %v9915_v11  ;;  %v4218_v29 = vpop.f32.mrb[255].mxu1  ;;  %7717 = vmatmul.mubr.bf16.gmra.mrb[248].mxu0 %v4435_v59  ;;  %v4388_v30 = vmax.f32 %v4224_v61, 0.0 }
 0x73f   : > { %v4219_v3 = vadd.f32 %v9915_v11, %v4218_v29  ;;  %v4386_v21 = vmax.f32 %v4216_v6, 0.0 }
 0x740   : > { %v4389_v0 = vmax.f32 %v4227_v52, 0.0 }
 0x741   : > { %v4387_v62 = vmax.f32 %v4219_v3, 0.0 }
 0x742   : > { %v4437_v55 = vpack.c.bf16 %v4389_v0, %v4388_v30 }
 0x743   : > { %v4436_v43 = vpack.c.bf16 %v4387_v62, %v4386_v21  ;;  %v7646_v42 = vpop.f32.mrb[0].mxu1 }
 0x744   : > { %v4240_v57 = vadd.f32 %v7646_v42, %v9915_v11  ;;  %v4231_v56 = vpop.f32.mrb[1].mxu1 }
 0x745   : > { %v4232_v5 = vadd.f32 %v9915_v11, %v4231_v56  ;;  %v7647_v37 = vpop.f32.mrb[2].mxu1  ;;  %7720 = vmatprep.mubr.bf16.mxu0 %v4436_v43 }
 0x746   : > { %v4243_v50 = vadd.f32 %v7647_v37, %v9915_v11  ;;  %v4234_v20 = vpop.f32.mrb[3].mxu1  ;;  %7721 = vmatmul.mubr.bf16.gmra.mrb[252].mxu0 %v4437_v55  ;;  %v4392_v61 = vmax.f32 %v4240_v57, 0.0 }
 0x747   : > { %v4235_v59 = vadd.f32 %v9915_v11, %v4234_v20  ;;  %v4390_v6 = vmax.f32 %v4232_v5, 0.0 }
 0x748   : > { %v4393_v52 = vmax.f32 %v4243_v50, 0.0 }
 0x749   : > { %v4391_v29 = vmax.f32 %v4235_v59, 0.0 }
 0x74a   : > { %v4439_v3 = vpack.c.bf16 %v4393_v52, %v4392_v61 }
 0x74b   : > { %v4438_v30 = vpack.c.bf16 %v4391_v29, %v4390_v6  ;;  %v7650_v0 = vpop.f32.mrb[4].mxu1 }
 0x74c   : > { %v4256_v21 = vadd.f32 %v7650_v0, %v9915_v11  ;;  %v4247_v62 = vpop.f32.mrb[5].mxu1 }
 0x74d   : > { %v4248_v42 = vadd.f32 %v9915_v11, %v4247_v62  ;;  %v7651_v56 = vpop.f32.mrb[6].mxu1  ;;  %7724 = vmatprep.mubr.bf16.mxu0 %v4438_v30 }
 0x74e   : > { %v4259_v43 = vadd.f32 %v7651_v56, %v9915_v11  ;;  %v4250_v37 = vpop.f32.mrb[7].mxu1  ;;  %7725 = vmatmul.mubr.bf16.gmra.mrb[0].mxu0 %v4439_v3  ;;  %v4396_v57 = vmax.f32 %v4256_v21, 0.0 }
 0x74f   : > { %v4251_v55 = vadd.f32 %v9915_v11, %v4250_v37  ;;  %v4394_v5 = vmax.f32 %v4248_v42, 0.0 }
 0x750   : > { %v4397_v50 = vmax.f32 %v4259_v43, 0.0 }
 0x751   : > { %v4395_v20 = vmax.f32 %v4251_v55, 0.0 }
 0x752   : > { %v4441_v59 = vpack.c.bf16 %v4397_v50, %v4396_v57 }
 0x753   : > { %v4440_v61 = vpack.c.bf16 %v4395_v20, %v4394_v5  ;;  %v7654_v52 = vpop.f32.mrb[8].mxu1 }
 0x754   : > { %v4272_v6 = vadd.f32 %v7654_v52, %v9915_v11  ;;  %v4263_v29 = vpop.f32.mrb[9].mxu1 }
 0x755   : > { %v4264_v0 = vadd.f32 %v9915_v11, %v4263_v29  ;;  %v7655_v62 = vpop.f32.mrb[10].mxu1  ;;  %7728 = vmatprep.mubr.bf16.mxu0 %v4440_v61 }
 0x756   : > { %v4275_v30 = vadd.f32 %v7655_v62, %v9915_v11  ;;  %v4266_v56 = vpop.f32.mrb[11].mxu1  ;;  %7729 = vmatmul.mubr.bf16.gmra.mrb[4].mxu0 %v4441_v59  ;;  %v4400_v21 = vmax.f32 %v4272_v6, 0.0 }
 0x757   : > { %v4267_v3 = vadd.f32 %v9915_v11, %v4266_v56  ;;  %v4398_v42 = vmax.f32 %v4264_v0, 0.0 }
 0x758   : > { %v4401_v43 = vmax.f32 %v4275_v30, 0.0 }
 0x759   : > { %v4399_v37 = vmax.f32 %v4267_v3, 0.0 }
 0x75a   : > { %v4443_v55 = vpack.c.bf16 %v4401_v43, %v4400_v21 }
 0x75b   : > { %v4442_v57 = vpack.c.bf16 %v4399_v37, %v4398_v42  ;;  %v7658_v50 = vpop.f32.mrb[12].mxu1 }
 0x75c   : > { %v4288_v5 = vadd.f32 %v7658_v50, %v9915_v11  ;;  %v4279_v20 = vpop.f32.mrb[13].mxu1 }
 0x75d   : > { %v4280_v52 = vadd.f32 %v9915_v11, %v4279_v20  ;;  %v7659_v29 = vpop.f32.mrb[14].mxu1  ;;  %7732 = vmatprep.mubr.bf16.mxu0 %v4442_v57 }
 0x75e   : > { %v4291_v61 = vadd.f32 %v7659_v29, %v9915_v11  ;;  %v4282_v62 = vpop.f32.mrb[15].mxu1  ;;  %7733 = vmatmul.mubr.bf16.gmra.mrb[8].mxu0 %v4443_v55  ;;  %v4404_v6 = vmax.f32 %v4288_v5, 0.0 }
 0x75f   : > { %v4283_v59 = vadd.f32 %v9915_v11, %v4282_v62  ;;  %v4402_v0 = vmax.f32 %v4280_v52, 0.0 }
 0x760   : > { %v4405_v30 = vmax.f32 %v4291_v61, 0.0 }
 0x761   : > { %v4403_v56 = vmax.f32 %v4283_v59, 0.0 }
 0x762   : > { %v4445_v3 = vpack.c.bf16 %v4405_v30, %v4404_v6 }
 0x763   : > { %v4444_v21 = vpack.c.bf16 %v4403_v56, %v4402_v0  ;;  %v7662_v43 = vpop.f32.mrb[16].mxu1 }
 0x764   : > { %v4304_v42 = vadd.f32 %v7662_v43, %v9915_v11  ;;  %v4295_v37 = vpop.f32.mrb[17].mxu1 }
 0x765   : > { %v4296_v50 = vadd.f32 %v9915_v11, %v4295_v37  ;;  %v7663_v20 = vpop.f32.mrb[18].mxu1  ;;  %7736 = vmatprep.mubr.bf16.mxu0 %v4444_v21 }
 0x766   : > { %v4307_v57 = vadd.f32 %v7663_v20, %v9915_v11  ;;  %v4298_v29 = vpop.f32.mrb[19].mxu1  ;;  %7737 = vmatmul.mubr.bf16.gmra.mrb[12].mxu0 %v4445_v3  ;;  %v4408_v5 = vmax.f32 %v4304_v42, 0.0 }
 0x767   : > { %v4299_v55 = vadd.f32 %v9915_v11, %v4298_v29  ;;  %v4406_v52 = vmax.f32 %v4296_v50, 0.0 }
 0x768   : > { %v4409_v61 = vmax.f32 %v4307_v57, 0.0 }
 0x769   : > { %v4407_v62 = vmax.f32 %v4299_v55, 0.0 }
 0x76a   : > { %v4447_v59 = vpack.c.bf16 %v4409_v61, %v4408_v5 }
 0x76b   : > { %v4446_v6 = vpack.c.bf16 %v4407_v62, %v4406_v52  ;;  %v7666_v30 = vpop.f32.mrb[20].mxu1 }
 0x76c   : > { %v4320_v0 = vadd.f32 %v7666_v30, %v9915_v11  ;;  %v4311_v56 = vpop.f32.mrb[21].mxu1 }
 0x76d   : > { %v4312_v43 = vadd.f32 %v9915_v11, %v4311_v56  ;;  %v7667_v37 = vpop.f32.mrb[22].mxu1  ;;  %7740 = vmatprep.mubr.bf16.mxu0 %v4446_v6 }
 0x76e   : > { %v4323_v21 = vadd.f32 %v7667_v37, %v9915_v11  ;;  %v4314_v20 = vpop.f32.mrb[23].mxu1  ;;  %7741 = vmatmul.mubr.bf16.gmra.mrb[16].mxu0 %v4447_v59  ;;  %v4412_v42 = vmax.f32 %v4320_v0, 0.0 }
 0x76f   : > { %v4315_v3 = vadd.f32 %v9915_v11, %v4314_v20  ;;  %v4410_v50 = vmax.f32 %v4312_v43, 0.0 }
 0x770   : > { %v4413_v57 = vmax.f32 %v4323_v21, 0.0 }
 0x771   : > { %v4411_v29 = vmax.f32 %v4315_v3, 0.0 }
 0x772   : > { %v4449_v55 = vpack.c.bf16 %v4413_v57, %v4412_v42 }
 0x773   : > { %v4448_v5 = vpack.c.bf16 %v4411_v29, %v4410_v50  ;;  %v7670_v61 = vpop.f32.mrb[24].mxu1 }
 0x774   : > { %v4336_v52 = vadd.f32 %v7670_v61, %v9915_v11  ;;  %v4327_v62 = vpop.f32.mrb[25].mxu1 }
 0x775   : > { %v4328_v30 = vadd.f32 %v9915_v11, %v4327_v62  ;;  %v7671_v56 = vpop.f32.mrb[26].mxu1  ;;  %7744 = vmatprep.mubr.bf16.mxu0 %v4448_v5 }
 0x776   : > { %v4339_v6 = vadd.f32 %v7671_v56, %v9915_v11  ;;  %v4330_v37 = vpop.f32.mrb[27].mxu1  ;;  %7745 = vmatmul.mubr.bf16.gmra.mrb[20].mxu0 %v4449_v55  ;;  %v4416_v0 = vmax.f32 %v4336_v52, 0.0 }
 0x777   : > { %v4331_v59 = vadd.f32 %v9915_v11, %v4330_v37  ;;  %v4414_v43 = vmax.f32 %v4328_v30, 0.0 }
 0x778   : > { %v4417_v21 = vmax.f32 %v4339_v6, 0.0 }
 0x779   : > { %v4415_v20 = vmax.f32 %v4331_v59, 0.0 }
 0x77a   : > { %v4451_v3 = vpack.c.bf16 %v4417_v21, %v4416_v0  ;;  %v8031_v21 = vld [vmem:[%s10830_s5 + $0x100] sm:$0xff]  }
 0x77b   : > { %v4450_v42 = vpack.c.bf16 %v4415_v20, %v4414_v43  ;;  %v7674_v57 = vpop.f32.mrb[28].mxu1  ;;  %7836 = vmatprep.subr.bf16.mxu0 %v8031_v21  ;;  %v10008_v43 = vld [vmem:[%s10831_s6 + $0x3] ss:$0 sm:$0xff] }
 0x77c   : > { %v4352_v50 = vadd.f32 %v7674_v57, %v9915_v11  ;;  %v4343_v29 = vpop.f32.mrb[29].mxu1  ;;  %7837 = vmatpush3.bf16.msra.mxu0 %v8031_v21 }
 0x77d   : > { %v4344_v61 = vadd.f32 %v9915_v11, %v4343_v29  ;;  %v7675_v62 = vpop.f32.mrb[30].mxu1  ;;  %7748 = vmatprep.mubr.bf16.mxu0 %v4450_v42  ;;  %v8032_v42 = vld [vmem:[%s10830_s5 + $0x108] sm:$0xff]  }
 0x77e   : > { %v4355_v5 = vadd.f32 %v7675_v62, %v9915_v11  ;;  %v4346_v56 = vpop.f32.mrb[31].mxu1  ;;  %7749 = vmatmul.mubr.bf16.gmra.mrb[24].mxu0 %v4451_v3  ;;  %v4420_v52 = vmax.f32 %v4352_v50, 0.0  ;;  %7838 = vmatprep.subr.bf16.mxu0 %v8032_v42 }
 0x77f   : > { %v4347_v55 = vadd.f32 %v9915_v11, %v4346_v56  ;;  %v4418_v30 = vmax.f32 %v4344_v61, 0.0 }
 0x780   : > { %v4421_v6 = vmax.f32 %v4355_v5, 0.0  ;;  %7839 = vmatpush3.bf16.msra.mxu0 %v8032_v42 }
 0x781   : > { %v4419_v37 = vmax.f32 %v4347_v55, 0.0 }
 0x782   : > { %v4453_v59 = vpack.c.bf16 %v4421_v6, %v4420_v52  ;;  %v8033_v52 = vld [vmem:[%s10830_s5 + $0x110] sm:$0xff]   ;;  %v8034_v6 = vld [vmem:[%s10830_s5 + $0x118] sm:$0xff]  }
 0x783   : > { %v4452_v0 = vpack.c.bf16 %v4419_v37, %v4418_v30  ;;  %7840 = vmatprep.subr.bf16.mxu0 %v8033_v52 }
 0x784   : > { %7841 = vmatpush3.bf16.msra.mxu0 %v8033_v52 }
 0x785   : > { %7752 = vmatprep.mubr.bf16.mxu0 %v4452_v0  ;;  %7842 = vmatprep.subr.bf16.mxu0 %v8034_v6 }
 0x786   : > { %7753 = vmatmul.mubr.bf16.gmra.mrb[28].mxu0 %v4453_v59 }
 0x788   : > { %7843 = vmatpush3.bf16.msra.mxu0 %v8034_v6 }
 0x7e1   : > { %v7694_v11 = vpop.f32.mrb[224].mxu0 }
 0x7e2   : > { %v4570_v20 = vadd.f32 %v7694_v11, %v10008_v43  ;;  %v4561_v3 = vpop.f32.mrb[225].mxu0 }
 0x7e3   : > { %v4562_v57 = vadd.f32 %v10008_v43, %v4561_v3  ;;  %v7695_v50 = vpop.f32.mrb[226].mxu0 }
 0x7e4   : > { %v4573_v29 = vadd.f32 %v7695_v50, %v10008_v43  ;;  %v4564_v61 = vpop.f32.mrb[227].mxu0  ;;  %v10021_v56 = vadd.f32 %v4570_v20, %v9579_v15 }
 0x7e5   : > { %v10017_v62 = vadd.f32 %v4562_v57, %v9575_v33  ;;  %v4565_v5 = vadd.f32 %v10008_v43, %v4564_v61 }
 0x7e6   : > { %v10024_v55 = vadd.f32 %v4573_v29, %v9582_v49  ;;  %v4882_v59 = vmax.f32 %v10021_v56, 0.0 }
 0x7e7   : > { %v10033_v33 = vadd.f32 %v4565_v5, %v9591_v26  ;;  %v4880_v15 = vmax.f32 %v10017_v62, 0.0  ;;  %v8035_v26 = vld [vmem:[%s10830_s5 + $0x120] sm:$0xff]  }
 0x7e8   : > { %v4883_v30 = vmax.f32 %v10024_v55, 0.0  ;;  %7844 = vmatprep.subr.bf16.mxu0 %v8035_v26 }
 0x7e9   : > { %v4881_v37 = vmax.f32 %v10033_v33, 0.0  ;;  %v7698_v49 = vpop.f32.mrb[228].mxu0  ;;  %7845 = vmatpush3.bf16.msra.mxu0 %v8035_v26 }
 0x7ea   : > { %v4586_v0 = vadd.f32 %v7698_v49, %v10008_v43  ;;  %v4577_v21 = vpop.f32.mrb[229].mxu0  ;;  %v4945_v42 = vpack.c.bf16 %v4883_v30, %v4882_v59  ;;  %v8036_v30 = vld [vmem:[%s10830_s5 + $0x128] sm:$0xff]  }
 0x7eb   : > { %v4578_v11 = vadd.f32 %v10008_v43, %v4577_v21  ;;  %v7699_v20 = vpop.f32.mrb[230].mxu0  ;;  %v4944_v3 = vpack.c.bf16 %v4881_v37, %v4880_v15  ;;  %7846 = vmatprep.subr.bf16.mxu0 %v8036_v30 }
 0x7ec   : > { %v4589_v57 = vadd.f32 %v7699_v20, %v10008_v43  ;;  %v4580_v50 = vpop.f32.mrb[231].mxu0  ;;  %v10050_v5 = vadd.f32 %v4586_v0, %v9608_v38  ;;  %v8037_v0 = vld [vmem:[%s10830_s5 + $0x130] sm:$0xff]  }
 0x7ed   : > { %v10046_v29 = vadd.f32 %v4578_v11, %v9604_v4  ;;  %v4581_v61 = vadd.f32 %v10008_v43, %v4580_v50  ;;  %7772 = vmatprep.mubr.bf16.mxu1 %v4944_v3  ;;  %7847 = vmatpush3.bf16.msra.mxu0 %v8036_v30 }
 0x7ee   : > { %v10053_v52 = vadd.f32 %v4589_v57, %v9611_v12  ;;  %7773 = vmatmul.mubr.bf16.vlgmr.msra.gmra.mrb[32].mxu1 %v4945_v42  ;;  %v4886_v12 = vmax.f32 %v10050_v5, 0.0  ;;  %7848 = vmatprep.subr.bf16.mxu0 %v8037_v0 }
 0x7ef   : > { %v10059_v15 = vadd.f32 %v4581_v61, %v9617_v17  ;;  %v4884_v37 = vmax.f32 %v10046_v29, 0.0 }
 0x7f0   : > { %v4887_v4 = vmax.f32 %v10053_v52, 0.0 }
 0x7f1   : > { %v4885_v6 = vmax.f32 %v10059_v15, 0.0  ;;  %v7702_v38 = vpop.f32.mrb[232].mxu0  ;;  %7849 = vmatpush3.bf16.msra.mxu0 %v8037_v0 }
 0x7f2   : > { %v4602_v49 = vadd.f32 %v7702_v38, %v10008_v43  ;;  %v4593_v59 = vpop.f32.mrb[233].mxu0  ;;  %v4947_v20 = vpack.c.bf16 %v4887_v4, %v4886_v12  ;;  %v8038_v4 = vld [vmem:[%s10830_s5 + $0x138] sm:$0xff]  }
 0x7f3   : > { %v4594_v17 = vadd.f32 %v10008_v43, %v4593_v59  ;;  %v7703_v21 = vpop.f32.mrb[234].mxu0  ;;  %v4946_v11 = vpack.c.bf16 %v4885_v6, %v4884_v37  ;;  %7850 = vmatprep.subr.bf16.mxu0 %v8038_v4 }
 0x7f4   : > { %v4605_v3 = vadd.f32 %v7703_v21, %v10008_v43  ;;  %v4596_v42 = vpop.f32.mrb[235].mxu0  ;;  %v10076_v50 = vadd.f32 %v4602_v49, %v9634_v9 }
 0x7f5   : > { %v10072_v26 = vadd.f32 %v4594_v17, %v9630_v41  ;;  %v4597_v57 = vadd.f32 %v10008_v43, %v4596_v42  ;;  %7776 = vmatprep.mubr.bf16.mxu1 %v4946_v11  ;;  %7851 = vmatpush3.bf16.msra.mxu0 %v8038_v4 }
 0x7f6   : > { %v10079_v61 = vadd.f32 %v4605_v3, %v9637_v22  ;;  %7777 = vmatmul.mubr.bf16.gmra.mrb[36].mxu1 %v4947_v20  ;;  %v4890_v22 = vmax.f32 %v10076_v50, 0.0 }
 0x7f7   : > { %v10085_v37 = vadd.f32 %v4597_v57, %v9643_v16  ;;  %v4888_v6 = vmax.f32 %v10072_v26, 0.0 }
 0x7f8   : > { %v4891_v41 = vmax.f32 %v10079_v61, 0.0 }
 0x7f9   : > { %v4889_v30 = vmax.f32 %v10085_v37, 0.0  ;;  %v7706_v9 = vpop.f32.mrb[236].mxu0 }
 0x7fa   : > { %v4618_v38 = vadd.f32 %v7706_v9, %v10008_v43  ;;  %v4609_v12 = vpop.f32.mrb[237].mxu0  ;;  %v4949_v16 = vpack.c.bf16 %v4891_v41, %v4890_v22 }
 0x7fb   : > { %v4610_v49 = vadd.f32 %v10008_v43, %v4609_v12  ;;  %v7707_v59 = vpop.f32.mrb[238].mxu0  ;;  %v4948_v17 = vpack.c.bf16 %v4889_v30, %v4888_v6 }
 0x7fc   : > { %v4621_v21 = vadd.f32 %v7707_v59, %v10008_v43  ;;  %v4612_v11 = vpop.f32.mrb[239].mxu0  ;;  %v10099_v0 = vadd.f32 %v4618_v38, %v9657_v48 }
 0x7fd   : > { %v10095_v20 = vadd.f32 %v4610_v49, %v9653_v32  ;;  %v4613_v3 = vadd.f32 %v10008_v43, %v4612_v11  ;;  %7780 = vmatprep.mubr.bf16.mxu1 %v4948_v17 }
 0x7fe   : > { %v10102_v42 = vadd.f32 %v4621_v21, %v9660_v28  ;;  %7781 = vmatmul.mubr.bf16.gmra.mrb[40].mxu1 %v4949_v16  ;;  %v4894_v9 = vmax.f32 %v10099_v0, 0.0 }
 0x7ff   : > { %v10105_v57 = vadd.f32 %v4613_v3, %v9663_v47  ;;  %v4892_v6 = vmax.f32 %v10095_v20, 0.0 }
 0x800   : > { %v4895_v41 = vmax.f32 %v10102_v42, 0.0 }
 0x801   : > { %v4893_v32 = vmax.f32 %v10105_v57, 0.0  ;;  %v7710_v30 = vpop.f32.mrb[240].mxu0 }
 0x802   : > { %v4634_v4 = vadd.f32 %v7710_v30, %v10008_v43  ;;  %v4625_v48 = vpop.f32.mrb[241].mxu0  ;;  %v4951_v12 = vpack.c.bf16 %v4895_v41, %v4894_v9 }
 0x803   : > { %v4626_v22 = vadd.f32 %v10008_v43, %v4625_v48  ;;  %v7711_v28 = vpop.f32.mrb[242].mxu0  ;;  %v4950_v38 = vpack.c.bf16 %v4893_v32, %v4892_v6 }
 0x804   : > { %v4637_v47 = vadd.f32 %v7711_v28, %v10008_v43  ;;  %v4628_v49 = vpop.f32.mrb[243].mxu0  ;;  %v10119_v16 = vadd.f32 %v4634_v4, %v9677_v60 }
 0x805   : > { %v10115_v59 = vadd.f32 %v4626_v22, %v9673_v58  ;;  %v4629_v17 = vadd.f32 %v10008_v43, %v4628_v49  ;;  %7784 = vmatprep.mubr.bf16.mxu1 %v4950_v38 }
 0x806   : > { %v10122_v21 = vadd.f32 %v4637_v47, %v9680_v46  ;;  %7785 = vmatmul.mubr.bf16.gmra.mrb[44].mxu1 %v4951_v12  ;;  %v4898_v32 = vmax.f32 %v10119_v16, 0.0 }
 0x807   : > { %v10125_v11 = vadd.f32 %v4629_v17, %v9683_v40  ;;  %v4896_v41 = vmax.f32 %v10115_v59, 0.0 }
 0x808   : > { %v4899_v3 = vmax.f32 %v10122_v21, 0.0 }
 0x809   : > { %v4897_v58 = vmax.f32 %v10125_v11, 0.0  ;;  %v7714_v6 = vpop.f32.mrb[244].mxu0 }
 0x80a   : > { %v4650_v30 = vadd.f32 %v7714_v6, %v10008_v43  ;;  %v4641_v60 = vpop.f32.mrb[245].mxu0  ;;  %v4953_v48 = vpack.c.bf16 %v4899_v3, %v4898_v32 }
 0x80b   : > { %v4642_v9 = vadd.f32 %v10008_v43, %v4641_v60  ;;  %v7715_v46 = vpop.f32.mrb[246].mxu0  ;;  %v4952_v4 = vpack.c.bf16 %v4897_v58, %v4896_v41 }
 0x80c   : > { %v4653_v40 = vadd.f32 %v7715_v46, %v10008_v43  ;;  %v4644_v22 = vpop.f32.mrb[247].mxu0  ;;  %v10139_v12 = vadd.f32 %v4650_v30, %v9697_v45 }
 0x80d   : > { %v10135_v28 = vadd.f32 %v4642_v9, %v9693_v53  ;;  %v4645_v38 = vadd.f32 %v10008_v43, %v4644_v22  ;;  %7788 = vmatprep.mubr.bf16.mxu1 %v4952_v4 }
 0x80e   : > { %v10142_v47 = vadd.f32 %v4653_v40, %v9700_v39  ;;  %7789 = vmatmul.mubr.bf16.gmra.mrb[48].mxu1 %v4953_v48  ;;  %v4902_v58 = vmax.f32 %v10139_v12, 0.0  ;;  %v11075_v40 = vld [vmem:[#allocation22_spill] sm:$0xff] }
 0x80f   : > { %v10145_v49 = vadd.f32 %v4645_v38, %v9703_v36  ;;  %v4900_v3 = vmax.f32 %v10135_v28, 0.0  ;;  %v11076_v38 = vld [vmem:[#allocation18_spill] sm:$0xff] }
 0x810   : > { %v4903_v17 = vmax.f32 %v10142_v47, 0.0 }
 0x811   : > { %v4901_v53 = vmax.f32 %v10145_v49, 0.0  ;;  %v7718_v41 = vpop.f32.mrb[248].mxu0 }
 0x812   : > { %v4666_v6 = vadd.f32 %v7718_v41, %v10008_v43  ;;  %v4657_v45 = vpop.f32.mrb[249].mxu0  ;;  %v4955_v60 = vpack.c.bf16 %v4903_v17, %v4902_v58 }
 0x813   : > { %v4658_v32 = vadd.f32 %v10008_v43, %v4657_v45  ;;  %v7719_v39 = vpop.f32.mrb[250].mxu0  ;;  %v4954_v30 = vpack.c.bf16 %v4901_v53, %v4900_v3 }
 0x814   : > { %v4669_v36 = vadd.f32 %v7719_v39, %v10008_v43  ;;  %v4660_v9 = vpop.f32.mrb[251].mxu0  ;;  %v10159_v48 = vadd.f32 %v4666_v6, %v9717_v14 }
 0x815   : > { %v10155_v46 = vadd.f32 %v4658_v32, %v9713_v8  ;;  %v4661_v4 = vadd.f32 %v10008_v43, %v4660_v9  ;;  %7792 = vmatprep.mubr.bf16.mxu1 %v4954_v30 }
 0x816   : > { %v10162_v22 = vadd.f32 %v4669_v36, %v11075_v40  ;;  %7793 = vmatmul.mubr.bf16.gmra.mrb[52].mxu1 %v4955_v60  ;;  %v4906_v58 = vmax.f32 %v10159_v48, 0.0 }
 0x817   : > { %v10165_v41 = vadd.f32 %v4661_v4, %v11076_v38  ;;  %v4904_v3 = vmax.f32 %v10155_v46, 0.0 }
 0x818   : > { %v4907_v17 = vmax.f32 %v10162_v22, 0.0 }
 0x819   : > { %v4905_v8 = vmax.f32 %v10165_v41, 0.0  ;;  %v7722_v53 = vpop.f32.mrb[252].mxu0 }
 0x81a   : > { %v4682_v45 = vadd.f32 %v7722_v53, %v10008_v43  ;;  %v4673_v14 = vpop.f32.mrb[253].mxu0  ;;  %v4957_v30 = vpack.c.bf16 %v4907_v17, %v4906_v58  ;;  %v11077_v53 = vld [vmem:[#allocation3_spill] sm:$0xff] }
 0x81b   : > { %v4674_v6 = vadd.f32 %v10008_v43, %v4673_v14  ;;  %v7723_v32 = vpop.f32.mrb[254].mxu0  ;;  %v4956_v39 = vpack.c.bf16 %v4905_v8, %v4904_v3 }
 0x81c   : > { %v4685_v60 = vadd.f32 %v7723_v32, %v10008_v43  ;;  %v4676_v36 = vpop.f32.mrb[255].mxu0  ;;  %v10179_v40 = vadd.f32 %v4682_v45, %v9737_v19 }
 0x81d   : > { %v10175_v9 = vadd.f32 %v4674_v6, %v9733_v27  ;;  %v4677_v4 = vadd.f32 %v10008_v43, %v4676_v36  ;;  %7796 = vmatprep.mubr.bf16.mxu1 %v4956_v39 }
 0x81e   : > { %v10182_v38 = vadd.f32 %v4685_v60, %v9740_v25  ;;  %7797 = vmatmul.mubr.bf16.gmra.mrb[56].mxu1 %v4957_v30  ;;  %v4910_v58 = vmax.f32 %v10179_v40, 0.0 }
 0x81f   : > { %v10185_v14 = vadd.f32 %v4677_v4, %v11077_v53  ;;  %v4908_v3 = vmax.f32 %v10175_v9, 0.0 }
 0x820   : > { %v4911_v17 = vmax.f32 %v10182_v38, 0.0 }
 0x821   : > { %v4909_v27 = vmax.f32 %v10185_v14, 0.0  ;;  %v7726_v8 = vpop.f32.mrb[0].mxu0 }
 0x822   : > { %v4698_v6 = vadd.f32 %v7726_v8, %v10008_v43  ;;  %v4689_v19 = vpop.f32.mrb[1].mxu0  ;;  %v4959_v39 = vpack.c.bf16 %v4911_v17, %v4910_v58 }
 0x823   : > { %v4690_v45 = vadd.f32 %v10008_v43, %v4689_v19  ;;  %v7727_v25 = vpop.f32.mrb[2].mxu0  ;;  %v4958_v32 = vpack.c.bf16 %v4909_v27, %v4908_v3 }
 0x824   : > { %v4701_v30 = vadd.f32 %v7727_v25, %v10008_v43  ;;  %v4692_v60 = vpop.f32.mrb[3].mxu0  ;;  %v10199_v53 = vadd.f32 %v4698_v6, %v9757_v13 }
 0x825   : > { %v10195_v36 = vadd.f32 %v4690_v45, %v9753_v23  ;;  %v4693_v4 = vadd.f32 %v10008_v43, %v4692_v60  ;;  %7800 = vmatprep.mubr.bf16.mxu1 %v4958_v32 }
 0x826   : > { %v10202_v8 = vadd.f32 %v4701_v30, %v9760_v31  ;;  %7801 = vmatmul.mubr.bf16.gmra.mrb[60].mxu1 %v4959_v39  ;;  %v4914_v58 = vmax.f32 %v10199_v53, 0.0 }
 0x827   : > { %v10205_v19 = vadd.f32 %v4693_v4, %v9763_v35  ;;  %v4912_v3 = vmax.f32 %v10195_v36, 0.0 }
 0x828   : > { %v4915_v17 = vmax.f32 %v10202_v8, 0.0 }
 0x829   : > { %v4913_v23 = vmax.f32 %v10205_v19, 0.0  ;;  %v7730_v27 = vpop.f32.mrb[4].mxu0 }
 0x82a   : > { %v4714_v45 = vadd.f32 %v7730_v27, %v10008_v43  ;;  %v4705_v13 = vpop.f32.mrb[5].mxu0  ;;  %v4961_v32 = vpack.c.bf16 %v4915_v17, %v4914_v58 }
 0x82b   : > { %v4706_v6 = vadd.f32 %v10008_v43, %v4705_v13  ;;  %v7731_v31 = vpop.f32.mrb[6].mxu0  ;;  %v4960_v25 = vpack.c.bf16 %v4913_v23, %v4912_v3 }
 0x82c   : > { %v4717_v35 = vadd.f32 %v7731_v31, %v10008_v43  ;;  %v4708_v39 = vpop.f32.mrb[7].mxu0  ;;  %v10219_v4 = vadd.f32 %v4714_v45, %v9777_v1 }
 0x82d   : > { %v10215_v30 = vadd.f32 %v4706_v6, %v9773_v7  ;;  %v4709_v60 = vadd.f32 %v10008_v43, %v4708_v39  ;;  %7804 = vmatprep.mubr.bf16.mxu1 %v4960_v25 }
 0x82e   : > { %v10222_v27 = vadd.f32 %v4717_v35, %v9780_v51  ;;  %7805 = vmatmul.mubr.bf16.gmra.mrb[64].mxu1 %v4961_v32  ;;  %v4918_v58 = vmax.f32 %v10219_v4, 0.0 }
 0x82f   : > { %v10225_v13 = vadd.f32 %v4709_v60, %v9783_v10  ;;  %v4916_v3 = vmax.f32 %v10215_v30, 0.0 }
 0x830   : > { %v4919_v17 = vmax.f32 %v10222_v27, 0.0 }
 0x831   : > { %11078 = vst [vmem:[#allocation21_spill] sm:$0xff] %v10225_v13  ;;  %v4917_v7 = vmax.f32 %v10225_v13, 0.0  ;;  %v7734_v23 = vpop.f32.mrb[8].mxu0 }
 0x832   : > { %v4730_v6 = vadd.f32 %v7734_v23, %v10008_v43  ;;  %v4721_v1 = vpop.f32.mrb[9].mxu0  ;;  %v4963_v25 = vpack.c.bf16 %v4919_v17, %v4918_v58 }
 0x833   : > { %v4722_v45 = vadd.f32 %v10008_v43, %v4721_v1  ;;  %v7735_v51 = vpop.f32.mrb[10].mxu0  ;;  %v4962_v31 = vpack.c.bf16 %v4917_v7, %v4916_v3  ;;  %v11081_v1 = vld [vmem:[#allocation4_spill] sm:$0xff] }
 0x834   : > { %v4733_v10 = vadd.f32 %v7735_v51, %v10008_v43  ;;  %v4724_v32 = vpop.f32.mrb[11].mxu0  ;;  %v10239_v60 = vadd.f32 %v4730_v6, %v9797_v18 }
 0x835   : > { %v10235_v35 = vadd.f32 %v4722_v45, %v9793_v2  ;;  %v4725_v39 = vadd.f32 %v10008_v43, %v4724_v32  ;;  %7808 = vmatprep.mubr.bf16.mxu1 %v4962_v31 }
 0x836   : > { %v10242_v23 = vadd.f32 %v4733_v10, %v9800_v34  ;;  %7809 = vmatmul.mubr.bf16.gmra.mrb[68].mxu1 %v4963_v25  ;;  %v4922_v58 = vmax.f32 %v10239_v60, 0.0 }
 0x837   : > { %11079 = vst [vmem:[#allocation22_spill] sm:$0xff] %v10235_v35  ;;  %v10245_v13 = vadd.f32 %v4725_v39, %v11081_v1  ;;  %v4920_v3 = vmax.f32 %v10235_v35, 0.0  ;;  %v11084_v1 = vld [vmem:[#allocation5_spill] sm:$0xff] }
 0x838   : > { %11080 = vst [vmem:[#allocation18_spill] sm:$0xff] %v10242_v23  ;;  %v4923_v17 = vmax.f32 %v10242_v23, 0.0  ;;  %v11086_v23 = vld [vmem:[#allocation23_spill] sm:$0xff] }
 0x839   : > { %11082 = vst [vmem:[#allocation3_spill] sm:$0xff] %v10245_v13  ;;  %v4921_v2 = vmax.f32 %v10245_v13, 0.0  ;;  %v7738_v7 = vpop.f32.mrb[12].mxu0 }
 0x83a   : > { %v4746_v45 = vadd.f32 %v7738_v7, %v10008_v43  ;;  %v4737_v18 = vpop.f32.mrb[13].mxu0  ;;  %v4965_v31 = vpack.c.bf16 %v4923_v17, %v4922_v58 }
 0x83b   : > { %v4738_v6 = vadd.f32 %v10008_v43, %v4737_v18  ;;  %v7739_v34 = vpop.f32.mrb[14].mxu0  ;;  %v4964_v51 = vpack.c.bf16 %v4921_v2, %v4920_v3  ;;  %v11088_v18 = vld [vmem:[#allocation8_spill] sm:$0xff] }
 0x83c   : > { %v4749_v25 = vadd.f32 %v7739_v34, %v10008_v43  ;;  %v4740_v10 = vpop.f32.mrb[15].mxu0  ;;  %v10259_v13 = vadd.f32 %v4746_v45, %v11084_v1 }
 0x83d   : > { %v10255_v32 = vadd.f32 %v4738_v6, %v9813_v44  ;;  %v4741_v39 = vadd.f32 %v10008_v43, %v4740_v10  ;;  %7812 = vmatprep.mubr.bf16.mxu1 %v4964_v51 }
 0x83e   : > { %11085 = vst [vmem:[#allocation5_spill] sm:$0xff] %v10259_v13  ;;  %v10262_v7 = vadd.f32 %v4749_v25, %v11086_v23  ;;  %7813 = vmatmul.mubr.bf16.gmra.mrb[72].mxu1 %v4965_v31  ;;  %v4926_v58 = vmax.f32 %v10259_v13, 0.0 }
 0x83f   : > { %11083 = vst [vmem:[#allocation4_spill] sm:$0xff] %v10255_v32  ;;  %v10265_v35 = vadd.f32 %v4741_v39, %v11088_v18  ;;  %v4924_v3 = vmax.f32 %v10255_v32, 0.0  ;;  %v11090_v39 = vld [vmem:[#allocation9_spill] sm:$0xff]  ;;  %v11093_v32 = vld [vmem:[#allocation12_spill] sm:$0xff] }
 0x840   : > { %11087 = vst [vmem:[#allocation23_spill] sm:$0xff] %v10262_v7  ;;  %v4927_v17 = vmax.f32 %v10262_v7, 0.0 }
 0x841   : > { %11089 = vst [vmem:[#allocation8_spill] sm:$0xff] %v10265_v35  ;;  %v4925_v44 = vmax.f32 %v10265_v35, 0.0  ;;  %v7742_v2 = vpop.f32.mrb[16].mxu0  ;;  %v11092_v35 = vld [vmem:[#allocation6_spill] sm:$0xff] }
 0x842   : > { %v4762_v6 = vadd.f32 %v7742_v2, %v10008_v43  ;;  %v4753_v45 = vpop.f32.mrb[17].mxu0  ;;  %v4967_v31 = vpack.c.bf16 %v4927_v17, %v4926_v58 }
 0x843   : > { %v4754_v34 = vadd.f32 %v10008_v43, %v4753_v45  ;;  %v7743_v23 = vpop.f32.mrb[18].mxu0  ;;  %v4966_v51 = vpack.c.bf16 %v4925_v44, %v4924_v3  ;;  %v11095_v45 = vld [vmem:[#allocation13_spill] sm:$0xff] }
 0x844   : > { %v4765_v25 = vadd.f32 %v7743_v23, %v10008_v43  ;;  %v4756_v10 = vpop.f32.mrb[19].mxu0  ;;  %v10279_v7 = vadd.f32 %v4762_v6, %v11092_v35 }
 0x845   : > { %v10275_v1 = vadd.f32 %v4754_v34, %v11090_v39  ;;  %v4757_v18 = vadd.f32 %v10008_v43, %v4756_v10  ;;  %7816 = vmatprep.mubr.bf16.mxu1 %v4966_v51 }
 0x846   : > { %v10282_v2 = vadd.f32 %v4765_v25, %v11093_v32  ;;  %7817 = vmatmul.mubr.bf16.gmra.mrb[76].mxu1 %v4967_v31  ;;  %v4930_v34 = vmax.f32 %v10279_v7, 0.0 }
 0x847   : > { %11091 = vst [vmem:[#allocation9_spill] sm:$0xff] %v10275_v1  ;;  %v10285_v13 = vadd.f32 %v4757_v18, %v11095_v45  ;;  %v4928_v3 = vmax.f32 %v10275_v1, 0.0  ;;  %v11098_v45 = vld [vmem:[#allocation7_spill] sm:$0xff] }
 0x848   : > { %11094 = vst [vmem:[#allocation6_spill] sm:$0xff] %v10282_v2  ;;  %v4931_v17 = vmax.f32 %v10282_v2, 0.0  ;;  %v11099_v2 = vld [vmem:[#allocation10_spill] sm:$0xff] }
 0x849   : > { %11096 = vst [vmem:[#allocation12_spill] sm:$0xff] %v10285_v13  ;;  %v4929_v44 = vmax.f32 %v10285_v13, 0.0  ;;  %v7746_v58 = vpop.f32.mrb[20].mxu0 }
 0x84a   : > { %v4778_v23 = vadd.f32 %v7746_v58, %v10008_v43  ;;  %v4769_v35 = vpop.f32.mrb[21].mxu0  ;;  %v4969_v31 = vpack.c.bf16 %v4931_v17, %v4930_v34 }
 0x84b   : > { %v4770_v6 = vadd.f32 %v10008_v43, %v4769_v35  ;;  %v7747_v32 = vpop.f32.mrb[22].mxu0  ;;  %v4968_v51 = vpack.c.bf16 %v4929_v44, %v4928_v3  ;;  %v11101_v35 = vld [vmem:[#allocation11_spill] sm:$0xff] }
 0x84c   : > { %v4781_v25 = vadd.f32 %v7747_v32, %v10008_v43  ;;  %v4772_v10 = vpop.f32.mrb[23].mxu0  ;;  %v10299_v13 = vadd.f32 %v4778_v23, %v11098_v45 }
 0x84d   : > { %v10295_v39 = vadd.f32 %v4770_v6, %v9853_v63  ;;  %v4773_v18 = vadd.f32 %v10008_v43, %v4772_v10  ;;  %7820 = vmatprep.mubr.bf16.mxu1 %v4968_v51 }
 0x84e   : > { %v10302_v58 = vadd.f32 %v4781_v25, %v11099_v2  ;;  %7821 = vmatmul.mubr.bf16.gmra.mrb[80].mxu1 %v4969_v31  ;;  %v4934_v34 = vmax.f32 %v10299_v13, 0.0 }
 0x84f   : > { %11097 = vst [vmem:[#allocation13_spill] sm:$0xff] %v10295_v39  ;;  %v10305_v1 = vadd.f32 %v4773_v18, %v11101_v35  ;;  %v4932_v3 = vmax.f32 %v10295_v39, 0.0  ;;  %v11104_v35 = vld [vmem:[#allocation14_spill] sm:$0xff] }
 0x850   : > { %11100 = vst [vmem:[#allocation7_spill] sm:$0xff] %v10302_v58  ;;  %v4935_v17 = vmax.f32 %v10302_v58, 0.0  ;;  %v11105_v58 = vld [vmem:[#allocation15_spill] sm:$0xff] }
 0x851   : > { %11102 = vst [vmem:[#allocation10_spill] sm:$0xff] %v10305_v1  ;;  %v4933_v63 = vmax.f32 %v10305_v1, 0.0  ;;  %v7750_v44 = vpop.f32.mrb[24].mxu0 }
 0x852   : > { %v4794_v6 = vadd.f32 %v7750_v44, %v10008_v43  ;;  %v4785_v23 = vpop.f32.mrb[25].mxu0  ;;  %v4971_v31 = vpack.c.bf16 %v4935_v17, %v4934_v34 }
 0x853   : > { %v4786_v32 = vadd.f32 %v10008_v43, %v4785_v23  ;;  %v7751_v2 = vpop.f32.mrb[26].mxu0  ;;  %v4970_v51 = vpack.c.bf16 %v4933_v63, %v4932_v3  ;;  %v11107_v23 = vld [vmem:[#allocation19_spill] sm:$0xff] }
 0x854   : > { %v4797_v25 = vadd.f32 %v7751_v2, %v10008_v43  ;;  %v4788_v10 = vpop.f32.mrb[27].mxu0  ;;  %v10319_v1 = vadd.f32 %v4794_v6, %v11104_v35 }
 0x855   : > { %v10315_v18 = vadd.f32 %v4786_v32, %v9873_v24  ;;  %v4789_v45 = vadd.f32 %v10008_v43, %v4788_v10  ;;  %7824 = vmatprep.mubr.bf16.mxu1 %v4970_v51 }
 0x856   : > { %v10322_v44 = vadd.f32 %v4797_v25, %v11105_v58  ;;  %7825 = vmatmul.mubr.bf16.gmra.mrb[84].mxu1 %v4971_v31  ;;  %v4938_v34 = vmax.f32 %v10319_v1, 0.0 }
 0x857   : > { %11103 = vst [vmem:[#allocation11_spill] sm:$0xff] %v10315_v18  ;;  %v10325_v39 = vadd.f32 %v4789_v45, %v11107_v23  ;;  %v4936_v3 = vmax.f32 %v10315_v18, 0.0  ;;  %v11110_v23 = vld [vmem:[#allocation20_spill] sm:$0xff] }
 0x858   : > { %11106 = vst [vmem:[#allocation14_spill] sm:$0xff] %v10322_v44  ;;  %v4939_v17 = vmax.f32 %v10322_v44, 0.0  ;;  %v11111_v44 = vld [vmem:[#allocation16_spill] sm:$0xff] }
 0x859   : > { %11108 = vst [vmem:[#allocation15_spill] sm:$0xff] %v10325_v39  ;;  %v4937_v24 = vmax.f32 %v10325_v39, 0.0  ;;  %v7754_v63 = vpop.f32.mrb[28].mxu0 }
 0x85a   : > { %v4810_v32 = vadd.f32 %v7754_v63, %v10008_v43  ;;  %v4801_v6 = vpop.f32.mrb[29].mxu0  ;;  %v4973_v31 = vpack.c.bf16 %v4939_v17, %v4938_v34 }
 0x85b   : > { %v4802_v2 = vadd.f32 %v10008_v43, %v4801_v6  ;;  %v7755_v58 = vpop.f32.mrb[30].mxu0  ;;  %v4972_v51 = vpack.c.bf16 %v4937_v24, %v4936_v3  ;;  %v11113_v6 = vld [vmem:[#allocation17_spill] sm:$0xff] }
 0x85c   : > { %v4813_v25 = vadd.f32 %v7755_v58, %v10008_v43  ;;  %v4804_v10 = vpop.f32.mrb[31].mxu0  ;;  %v10339_v39 = vadd.f32 %v4810_v32, %v11110_v23 }
 0x85d   : > { %v10335_v45 = vadd.f32 %v4802_v2, %v9893_v54  ;;  %v4805_v35 = vadd.f32 %v10008_v43, %v4804_v10  ;;  %7828 = vmatprep.mubr.bf16.mxu1 %v4972_v51 }
 0x85e   : > { %v10342_v63 = vadd.f32 %v4813_v25, %v11111_v44  ;;  %7829 = vmatmul.mubr.bf16.gmra.mrb[88].mxu1 %v4973_v31  ;;  %v4942_v24 = vmax.f32 %v10339_v39, 0.0  ;;  %v10354_v44 = vld [vmem:[%s10829_s4 + $0x4] ss:$0 sm:$0xff] }
 0x85f   : > { %11109 = vst [vmem:[#allocation19_spill] sm:$0xff] %v10335_v45  ;;  %v10345_v18 = vadd.f32 %v4805_v35, %v11113_v6  ;;  %v4940_v3 = vmax.f32 %v10335_v45, 0.0 }
 0x860   : > { %11112 = vst [vmem:[#allocation20_spill] sm:$0xff] %v10342_v63  ;;  %v4943_v17 = vmax.f32 %v10342_v63, 0.0 }
 0x861   : > { %11114 = vst [vmem:[#allocation16_spill] sm:$0xff] %v10345_v18  ;;  %v4941_v54 = vmax.f32 %v10345_v18, 0.0 }
 0x862   : > { %v4975_v34 = vpack.c.bf16 %v4943_v17, %v4942_v24 }
 0x863   : > { %v4974_v43 = vpack.c.bf16 %v4941_v54, %v4940_v3 }
 0x865   : > { %7832 = vmatprep.mubr.bf16.mxu1 %v4974_v43 }
 0x866   : > { %7833 = vmatmul.mubr.bf16.gmra.mrb[92].mxu1 %v4975_v34 }
 0x8c1   : > { %v7774_v32 = vpop.f32.mrb[32].mxu1 }
 0x8c2   : > { %v5092_v2 = vadd.f32 %v7774_v32, %v10354_v44  ;;  %v5083_v58 = vpop.f32.mrb[33].mxu1 }
 0x8c3   : > { %v5084_v51 = vadd.f32 %v10354_v44, %v5083_v58  ;;  %v7775_v31 = vpop.f32.mrb[34].mxu1 }
 0x8c4   : > { %v5095_v25 = vadd.f32 %v7775_v31, %v10354_v44  ;;  %v5086_v10 = vpop.f32.mrb[35].mxu1  ;;  %v5340_v23 = vmax.f32 %v5092_v2, 0.0 }
 0x8c5   : > { %v5087_v35 = vadd.f32 %v10354_v44, %v5086_v10  ;;  %v5338_v17 = vmax.f32 %v5084_v51, 0.0 }
 0x8c6   : > { %v5341_v6 = vmax.f32 %v5095_v25, 0.0 }
 0x8c7   : > { %v5339_v3 = vmax.f32 %v5087_v35, 0.0 }
 0x8c8   : > { %v5403_v54 = vpack.c.bf16 %v5341_v6, %v5340_v23 }
 0x8c9   : > { %v5402_v24 = vpack.c.bf16 %v5339_v3, %v5338_v17  ;;  %v7778_v43 = vpop.f32.mrb[36].mxu1 }
 0x8ca   : > { %v5108_v34 = vadd.f32 %v7778_v43, %v10354_v44  ;;  %v5099_v18 = vpop.f32.mrb[37].mxu1 }
 0x8cb   : > { %v5100_v32 = vadd.f32 %v10354_v44, %v5099_v18  ;;  %v7779_v63 = vpop.f32.mrb[38].mxu1  ;;  %7852 = vmatprep.mubr.bf16.mxu0 %v5402_v24 }
 0x8cc   : > { %v5111_v58 = vadd.f32 %v7779_v63, %v10354_v44  ;;  %v5102_v31 = vpop.f32.mrb[39].mxu1  ;;  %7853 = vmatmul.mubr.bf16.vlgmr.msra.gmra.mrb[32].mxu0 %v5403_v54  ;;  %v5344_v2 = vmax.f32 %v5108_v34, 0.0 }
 0x8cd   : > { %v5103_v10 = vadd.f32 %v10354_v44, %v5102_v31  ;;  %v5342_v51 = vmax.f32 %v5100_v32, 0.0 }
 0x8ce   : > { %v5345_v25 = vmax.f32 %v5111_v58, 0.0 }
 0x8cf   : > { %v5343_v35 = vmax.f32 %v5103_v10, 0.0 }
 0x8d0   : > { %v5405_v23 = vpack.c.bf16 %v5345_v25, %v5344_v2 }
 0x8d1   : > { %v5404_v6 = vpack.c.bf16 %v5343_v35, %v5342_v51  ;;  %v7782_v17 = vpop.f32.mrb[40].mxu1 }
 0x8d2   : > { %v5124_v3 = vadd.f32 %v7782_v17, %v10354_v44  ;;  %v5115_v43 = vpop.f32.mrb[41].mxu1 }
 0x8d3   : > { %v5116_v18 = vadd.f32 %v10354_v44, %v5115_v43  ;;  %v7783_v45 = vpop.f32.mrb[42].mxu1  ;;  %7856 = vmatprep.mubr.bf16.mxu0 %v5404_v6 }
 0x8d4   : > { %v5127_v63 = vadd.f32 %v7783_v45, %v10354_v44  ;;  %v5118_v24 = vpop.f32.mrb[43].mxu1  ;;  %7857 = vmatmul.mubr.bf16.gmra.mrb[36].mxu0 %v5405_v23  ;;  %v5348_v34 = vmax.f32 %v5124_v3, 0.0 }
 0x8d5   : > { %v5119_v54 = vadd.f32 %v10354_v44, %v5118_v24  ;;  %v5346_v32 = vmax.f32 %v5116_v18, 0.0 }
 0x8d6   : > { %v5349_v58 = vmax.f32 %v5127_v63, 0.0 }
 0x8d7   : > { %v5347_v31 = vmax.f32 %v5119_v54, 0.0 }
 0x8d8   : > { %v5407_v10 = vpack.c.bf16 %v5349_v58, %v5348_v34 }
 0x8d9   : > { %v5406_v2 = vpack.c.bf16 %v5347_v31, %v5346_v32  ;;  %v7786_v25 = vpop.f32.mrb[44].mxu1 }
 0x8da   : > { %v5140_v51 = vadd.f32 %v7786_v25, %v10354_v44  ;;  %v5131_v35 = vpop.f32.mrb[45].mxu1 }
 0x8db   : > { %v5132_v17 = vadd.f32 %v10354_v44, %v5131_v35  ;;  %v7787_v43 = vpop.f32.mrb[46].mxu1  ;;  %7860 = vmatprep.mubr.bf16.mxu0 %v5406_v2 }
 0x8dc   : > { %v5143_v45 = vadd.f32 %v7787_v43, %v10354_v44  ;;  %v5134_v6 = vpop.f32.mrb[47].mxu1  ;;  %7861 = vmatmul.mubr.bf16.gmra.mrb[40].mxu0 %v5407_v10  ;;  %v5352_v3 = vmax.f32 %v5140_v51, 0.0 }
 0x8dd   : > { %v5135_v23 = vadd.f32 %v10354_v44, %v5134_v6  ;;  %v5350_v18 = vmax.f32 %v5132_v17, 0.0 }
 0x8de   : > { %v5353_v63 = vmax.f32 %v5143_v45, 0.0 }
 0x8df   : > { %v5351_v24 = vmax.f32 %v5135_v23, 0.0 }
 0x8e0   : > { %v5409_v54 = vpack.c.bf16 %v5353_v63, %v5352_v3 }
 0x8e1   : > { %v5408_v34 = vpack.c.bf16 %v5351_v24, %v5350_v18  ;;  %v7790_v58 = vpop.f32.mrb[48].mxu1 }
 0x8e2   : > { %v5156_v32 = vadd.f32 %v7790_v58, %v10354_v44  ;;  %v5147_v31 = vpop.f32.mrb[49].mxu1 }
 0x8e3   : > { %v5148_v25 = vadd.f32 %v10354_v44, %v5147_v31  ;;  %v7791_v35 = vpop.f32.mrb[50].mxu1  ;;  %7864 = vmatprep.mubr.bf16.mxu0 %v5408_v34 }
 0x8e4   : > { %v5159_v2 = vadd.f32 %v7791_v35, %v10354_v44  ;;  %v5150_v43 = vpop.f32.mrb[51].mxu1  ;;  %7865 = vmatmul.mubr.bf16.gmra.mrb[44].mxu0 %v5409_v54  ;;  %v5356_v51 = vmax.f32 %v5156_v32, 0.0 }
 0x8e5   : > { %v5151_v10 = vadd.f32 %v10354_v44, %v5150_v43  ;;  %v5354_v17 = vmax.f32 %v5148_v25, 0.0 }
 0x8e6   : > { %v5357_v45 = vmax.f32 %v5159_v2, 0.0 }
 0x8e7   : > { %v5355_v6 = vmax.f32 %v5151_v10, 0.0 }
 0x8e8   : > { %v5411_v23 = vpack.c.bf16 %v5357_v45, %v5356_v51 }
 0x8e9   : > { %v5410_v3 = vpack.c.bf16 %v5355_v6, %v5354_v17  ;;  %v7794_v63 = vpop.f32.mrb[52].mxu1 }
 0x8ea   : > { %v5172_v18 = vadd.f32 %v7794_v63, %v10354_v44  ;;  %v5163_v24 = vpop.f32.mrb[53].mxu1 }
 0x8eb   : > { %v5164_v58 = vadd.f32 %v10354_v44, %v5163_v24  ;;  %v7795_v31 = vpop.f32.mrb[54].mxu1  ;;  %7868 = vmatprep.mubr.bf16.mxu0 %v5410_v3 }
 0x8ec   : > { %v5175_v34 = vadd.f32 %v7795_v31, %v10354_v44  ;;  %v5166_v35 = vpop.f32.mrb[55].mxu1  ;;  %7869 = vmatmul.mubr.bf16.gmra.mrb[48].mxu0 %v5411_v23  ;;  %v5360_v32 = vmax.f32 %v5172_v18, 0.0 }
 0x8ed   : > { %v5167_v54 = vadd.f32 %v10354_v44, %v5166_v35  ;;  %v5358_v25 = vmax.f32 %v5164_v58, 0.0 }
 0x8ee   : > { %v5361_v2 = vmax.f32 %v5175_v34, 0.0 }
 0x8ef   : > { %v5359_v43 = vmax.f32 %v5167_v54, 0.0 }
 0x8f0   : > { %v5413_v10 = vpack.c.bf16 %v5361_v2, %v5360_v32 }
 0x8f1   : > { %v5412_v51 = vpack.c.bf16 %v5359_v43, %v5358_v25  ;;  %v7798_v45 = vpop.f32.mrb[56].mxu1 }
 0x8f2   : > { %v5188_v17 = vadd.f32 %v7798_v45, %v10354_v44  ;;  %v5179_v6 = vpop.f32.mrb[57].mxu1 }
 0x8f3   : > { %v5180_v63 = vadd.f32 %v10354_v44, %v5179_v6  ;;  %v7799_v24 = vpop.f32.mrb[58].mxu1  ;;  %7872 = vmatprep.mubr.bf16.mxu0 %v5412_v51 }
 0x8f4   : > { %v5191_v3 = vadd.f32 %v7799_v24, %v10354_v44  ;;  %v5182_v31 = vpop.f32.mrb[59].mxu1  ;;  %7873 = vmatmul.mubr.bf16.gmra.mrb[52].mxu0 %v5413_v10  ;;  %v5364_v18 = vmax.f32 %v5188_v17, 0.0 }
 0x8f5   : > { %v5183_v23 = vadd.f32 %v10354_v44, %v5182_v31  ;;  %v5362_v58 = vmax.f32 %v5180_v63, 0.0 }
 0x8f6   : > { %v5365_v34 = vmax.f32 %v5191_v3, 0.0 }
 0x8f7   : > { %v5363_v35 = vmax.f32 %v5183_v23, 0.0 }
 0x8f8   : > { %v5415_v54 = vpack.c.bf16 %v5365_v34, %v5364_v18 }
 0x8f9   : > { %v5414_v32 = vpack.c.bf16 %v5363_v35, %v5362_v58  ;;  %v7802_v2 = vpop.f32.mrb[60].mxu1 }
 0x8fa   : > { %v5204_v25 = vadd.f32 %v7802_v2, %v10354_v44  ;;  %v5195_v43 = vpop.f32.mrb[61].mxu1 }
 0x8fb   : > { %v5196_v45 = vadd.f32 %v10354_v44, %v5195_v43  ;;  %v7803_v6 = vpop.f32.mrb[62].mxu1  ;;  %7876 = vmatprep.mubr.bf16.mxu0 %v5414_v32 }
 0x8fc   : > { %v5207_v51 = vadd.f32 %v7803_v6, %v10354_v44  ;;  %v5198_v24 = vpop.f32.mrb[63].mxu1  ;;  %7877 = vmatmul.mubr.bf16.gmra.mrb[56].mxu0 %v5415_v54  ;;  %v5368_v17 = vmax.f32 %v5204_v25, 0.0 }
 0x8fd   : > { %v5199_v10 = vadd.f32 %v10354_v44, %v5198_v24  ;;  %v5366_v63 = vmax.f32 %v5196_v45, 0.0 }
 0x8fe   : > { %v5369_v3 = vmax.f32 %v5207_v51, 0.0 }
 0x8ff   : > { %v5367_v31 = vmax.f32 %v5199_v10, 0.0 }
 0x900   : > { %v5417_v23 = vpack.c.bf16 %v5369_v3, %v5368_v17 }
 0x901   : > { %v5416_v18 = vpack.c.bf16 %v5367_v31, %v5366_v63  ;;  %v7806_v34 = vpop.f32.mrb[64].mxu1 }
 0x902   : > { %v5220_v58 = vadd.f32 %v7806_v34, %v10354_v44  ;;  %v5211_v35 = vpop.f32.mrb[65].mxu1 }
 0x903   : > { %v5212_v2 = vadd.f32 %v10354_v44, %v5211_v35  ;;  %v7807_v43 = vpop.f32.mrb[66].mxu1  ;;  %7880 = vmatprep.mubr.bf16.mxu0 %v5416_v18 }
 0x904   : > { %v5223_v32 = vadd.f32 %v7807_v43, %v10354_v44  ;;  %v5214_v6 = vpop.f32.mrb[67].mxu1  ;;  %7881 = vmatmul.mubr.bf16.gmra.mrb[60].mxu0 %v5417_v23  ;;  %v5372_v25 = vmax.f32 %v5220_v58, 0.0 }
 0x905   : > { %v5215_v54 = vadd.f32 %v10354_v44, %v5214_v6  ;;  %v5370_v45 = vmax.f32 %v5212_v2, 0.0 }
 0x906   : > { %v5373_v51 = vmax.f32 %v5223_v32, 0.0 }
 0x907   : > { %v5371_v24 = vmax.f32 %v5215_v54, 0.0 }
 0x908   : > { %v5419_v10 = vpack.c.bf16 %v5373_v51, %v5372_v25 }
 0x909   : > { %v5418_v17 = vpack.c.bf16 %v5371_v24, %v5370_v45  ;;  %v7810_v3 = vpop.f32.mrb[68].mxu1 }
 0x90a   : > { %v5236_v63 = vadd.f32 %v7810_v3, %v10354_v44  ;;  %v5227_v31 = vpop.f32.mrb[69].mxu1 }
 0x90b   : > { %v5228_v34 = vadd.f32 %v10354_v44, %v5227_v31  ;;  %v7811_v35 = vpop.f32.mrb[70].mxu1  ;;  %7884 = vmatprep.mubr.bf16.mxu0 %v5418_v17 }
 0x90c   : > { %v5239_v18 = vadd.f32 %v7811_v35, %v10354_v44  ;;  %v5230_v43 = vpop.f32.mrb[71].mxu1  ;;  %7885 = vmatmul.mubr.bf16.gmra.mrb[64].mxu0 %v5419_v10  ;;  %v5376_v58 = vmax.f32 %v5236_v63, 0.0 }
 0x90d   : > { %v5231_v23 = vadd.f32 %v10354_v44, %v5230_v43  ;;  %v5374_v2 = vmax.f32 %v5228_v34, 0.0 }
 0x90e   : > { %v5377_v32 = vmax.f32 %v5239_v18, 0.0 }
 0x90f   : > { %v5375_v6 = vmax.f32 %v5231_v23, 0.0 }
 0x910   : > { %v5421_v54 = vpack.c.bf16 %v5377_v32, %v5376_v58 }
 0x911   : > { %v5420_v25 = vpack.c.bf16 %v5375_v6, %v5374_v2  ;;  %v7814_v51 = vpop.f32.mrb[72].mxu1 }
 0x912   : > { %v5252_v45 = vadd.f32 %v7814_v51, %v10354_v44  ;;  %v5243_v24 = vpop.f32.mrb[73].mxu1 }
 0x913   : > { %v5244_v3 = vadd.f32 %v10354_v44, %v5243_v24  ;;  %v7815_v31 = vpop.f32.mrb[74].mxu1  ;;  %7888 = vmatprep.mubr.bf16.mxu0 %v5420_v25 }
 0x914   : > { %v5255_v17 = vadd.f32 %v7815_v31, %v10354_v44  ;;  %v5246_v35 = vpop.f32.mrb[75].mxu1  ;;  %7889 = vmatmul.mubr.bf16.gmra.mrb[68].mxu0 %v5421_v54  ;;  %v5380_v63 = vmax.f32 %v5252_v45, 0.0 }
 0x915   : > { %v5247_v10 = vadd.f32 %v10354_v44, %v5246_v35  ;;  %v5378_v34 = vmax.f32 %v5244_v3, 0.0 }
 0x916   : > { %v5381_v18 = vmax.f32 %v5255_v17, 0.0 }
 0x917   : > { %v5379_v43 = vmax.f32 %v5247_v10, 0.0 }
 0x918   : > { %v5423_v23 = vpack.c.bf16 %v5381_v18, %v5380_v63 }
 0x919   : > { %v5422_v58 = vpack.c.bf16 %v5379_v43, %v5378_v34  ;;  %v7818_v32 = vpop.f32.mrb[76].mxu1 }
 0x91a   : > { %v5268_v2 = vadd.f32 %v7818_v32, %v10354_v44  ;;  %v5259_v6 = vpop.f32.mrb[77].mxu1 }
 0x91b   : > { %v5260_v51 = vadd.f32 %v10354_v44, %v5259_v6  ;;  %v7819_v24 = vpop.f32.mrb[78].mxu1  ;;  %7892 = vmatprep.mubr.bf16.mxu0 %v5422_v58 }
 0x91c   : > { %v5271_v25 = vadd.f32 %v7819_v24, %v10354_v44  ;;  %v5262_v31 = vpop.f32.mrb[79].mxu1  ;;  %7893 = vmatmul.mubr.bf16.gmra.mrb[72].mxu0 %v5423_v23  ;;  %v5384_v45 = vmax.f32 %v5268_v2, 0.0 }
 0x91d   : > { %v5263_v54 = vadd.f32 %v10354_v44, %v5262_v31  ;;  %v5382_v3 = vmax.f32 %v5260_v51, 0.0 }
 0x91e   : > { %v5385_v17 = vmax.f32 %v5271_v25, 0.0 }
 0x91f   : > { %v5383_v35 = vmax.f32 %v5263_v54, 0.0 }
 0x920   : > { %v5425_v10 = vpack.c.bf16 %v5385_v17, %v5384_v45 }
 0x921   : > { %v5424_v63 = vpack.c.bf16 %v5383_v35, %v5382_v3  ;;  %v7822_v18 = vpop.f32.mrb[80].mxu1 }
 0x922   : > { %v5284_v34 = vadd.f32 %v7822_v18, %v10354_v44  ;;  %v5275_v43 = vpop.f32.mrb[81].mxu1 }
 0x923   : > { %v5276_v32 = vadd.f32 %v10354_v44, %v5275_v43  ;;  %v7823_v6 = vpop.f32.mrb[82].mxu1  ;;  %7896 = vmatprep.mubr.bf16.mxu0 %v5424_v63 }
 0x924   : > { %v5287_v58 = vadd.f32 %v7823_v6, %v10354_v44  ;;  %v5278_v24 = vpop.f32.mrb[83].mxu1  ;;  %7897 = vmatmul.mubr.bf16.gmra.mrb[76].mxu0 %v5425_v10  ;;  %v5388_v2 = vmax.f32 %v5284_v34, 0.0 }
 0x925   : > { %v5279_v23 = vadd.f32 %v10354_v44, %v5278_v24  ;;  %v5386_v51 = vmax.f32 %v5276_v32, 0.0 }
 0x926   : > { %v5389_v25 = vmax.f32 %v5287_v58, 0.0 }
 0x927   : > { %v5387_v31 = vmax.f32 %v5279_v23, 0.0 }
 0x928   : > { %v5427_v54 = vpack.c.bf16 %v5389_v25, %v5388_v2 }
 0x929   : > { %v5426_v45 = vpack.c.bf16 %v5387_v31, %v5386_v51  ;;  %v7826_v17 = vpop.f32.mrb[84].mxu1 }
 0x92a   : > { %v5300_v3 = vadd.f32 %v7826_v17, %v10354_v44  ;;  %v5291_v35 = vpop.f32.mrb[85].mxu1 }
 0x92b   : > { %v5292_v18 = vadd.f32 %v10354_v44, %v5291_v35  ;;  %v7827_v43 = vpop.f32.mrb[86].mxu1  ;;  %7900 = vmatprep.mubr.bf16.mxu0 %v5426_v45 }
 0x92c   : > { %v5303_v63 = vadd.f32 %v7827_v43, %v10354_v44  ;;  %v5294_v6 = vpop.f32.mrb[87].mxu1  ;;  %7901 = vmatmul.mubr.bf16.gmra.mrb[80].mxu0 %v5427_v54  ;;  %v5392_v34 = vmax.f32 %v5300_v3, 0.0 }
 0x92d   : > { %v5295_v10 = vadd.f32 %v10354_v44, %v5294_v6  ;;  %v5390_v32 = vmax.f32 %v5292_v18, 0.0 }
 0x92e   : > { %v5393_v58 = vmax.f32 %v5303_v63, 0.0 }
 0x92f   : > { %v5391_v24 = vmax.f32 %v5295_v10, 0.0 }
 0x930   : > { %v5429_v23 = vpack.c.bf16 %v5393_v58, %v5392_v34 }
 0x931   : > { %v5428_v2 = vpack.c.bf16 %v5391_v24, %v5390_v32  ;;  %v7830_v25 = vpop.f32.mrb[88].mxu1 }
 0x932   : > { %v5316_v51 = vadd.f32 %v7830_v25, %v10354_v44  ;;  %v5307_v31 = vpop.f32.mrb[89].mxu1 }
 0x933   : > { %v5308_v17 = vadd.f32 %v10354_v44, %v5307_v31  ;;  %v7831_v35 = vpop.f32.mrb[90].mxu1  ;;  %7904 = vmatprep.mubr.bf16.mxu0 %v5428_v2 }
 0x934   : > { %v5319_v45 = vadd.f32 %v7831_v35, %v10354_v44  ;;  %v5310_v43 = vpop.f32.mrb[91].mxu1  ;;  %7905 = vmatmul.mubr.bf16.gmra.mrb[84].mxu0 %v5429_v23  ;;  %v5396_v3 = vmax.f32 %v5316_v51, 0.0 }
 0x935   : > { %v5311_v54 = vadd.f32 %v10354_v44, %v5310_v43  ;;  %v5394_v18 = vmax.f32 %v5308_v17, 0.0 }
 0x936   : > { %v5397_v63 = vmax.f32 %v5319_v45, 0.0 }
 0x937   : > { %v5395_v6 = vmax.f32 %v5311_v54, 0.0 }
 0x938   : > { %v5431_v10 = vpack.c.bf16 %v5397_v63, %v5396_v3  ;;  %v5926_v63 = vlaneseq }
 0x939   : > { %v5430_v34 = vpack.c.bf16 %v5395_v6, %v5394_v18  ;;  %v7834_v58 = vpop.f32.mrb[92].mxu1  ;;  %v5924_v6 = vld [vmem:[%s10832_s7] sm:$0x1] }
 0x93a   : > { %v5332_v32 = vadd.f32 %v7834_v58, %v10354_v44  ;;  %v5323_v24 = vpop.f32.mrb[93].mxu1  ;;  %v5927_v18 = vshrl.u32 %v5926_v63, 7 }
 0x93b   : > { %v5324_v25 = vadd.f32 %v10354_v44, %v5323_v24  ;;  %v7835_v31 = vpop.f32.mrb[94].mxu1  ;;  %7908 = vmatprep.mubr.bf16.mxu0 %v5430_v34 }
 0x93c   : > { %v5335_v2 = vadd.f32 %v7835_v31, %v10354_v44  ;;  %v5326_v35 = vpop.f32.mrb[95].mxu1  ;;  %7909 = vmatmul.mubr.bf16.gmra.mrb[88].mxu0 %v5431_v10  ;;  %v5400_v51 = vmax.f32 %v5332_v32, 0.0  ;;  %v10426_v10 = vld [vmem:[%s10831_s6 + $0x4] ss:$0 sm:$0xff]  ;;  %v5928_v34 = vsub.s32 0, %v5927_v18 }
 0x93d   : > { %v5327_v23 = vadd.f32 %v10354_v44, %v5326_v35  ;;  %v5398_v17 = vmax.f32 %v5324_v25, 0.0  ;;  %v5925_v44 = vunpack.c.l.bf16 %v5924_v6 }
 0x93e   : > { %v5401_v45 = vmax.f32 %v5335_v2, 0.0 }
 0x93f   : > { %v5399_v43 = vmax.f32 %v5327_v23, 0.0 }
 0x940   : > { %v5433_v54 = vpack.c.bf16 %v5401_v45, %v5400_v51  ;;  %v10432_v51 = vrot.slane %v5925_v44, %v5928_v34 }
 0x941   : > { %v5432_v3 = vpack.c.bf16 %v5399_v43, %v5398_v17 }
 0x943   : > { %7912 = vmatprep.mubr.bf16.mxu0 %v5432_v3 }
 0x944   : > { %7913 = vmatmul.mubr.bf16.gmra.mrb[92].mxu0 %v5433_v54 }
 0x99f   : > { %v7854_v58 = vpop.f32.mrb[32].mxu0 }
 0x9a0   : > { %v5550_v32 = vadd.f32 %v7854_v58, %v10426_v10  ;;  %v5541_v24 = vpop.f32.mrb[33].mxu0 }
 0x9a1   : > { %v5542_v25 = vadd.f32 %v10426_v10, %v5541_v24  ;;  %v7855_v31 = vpop.f32.mrb[34].mxu0 }
 0x9a2   : > { %v5553_v2 = vadd.f32 %v7855_v31, %v10426_v10  ;;  %v5544_v35 = vpop.f32.mrb[35].mxu0  ;;  %v5798_v23 = vadd.f32 %v5550_v32, %v10021_v56 }
 0x9a3   : > { %v5545_v45 = vadd.f32 %v10426_v10, %v5544_v35  ;;  %v5796_v17 = vadd.f32 %v5542_v25, %v10017_v62 }
 0x9a4   : > { %v5799_v43 = vadd.f32 %v5553_v2, %v10024_v55  ;;  %v5862_v54 = vmax.f32 %v5798_v23, 0.0 }
 0x9a5   : > { %v5797_v3 = vadd.f32 %v5545_v45, %v10033_v33  ;;  %v5860_v63 = vmax.f32 %v5796_v17, 0.0 }
 0x9a6   : > { %v5863_v18 = vmax.f32 %v5799_v43, 0.0  ;;  %v5932_v6 = vmul.f32 %v10432_v51, %v5862_v54 }
 0x9a7   : > { %v5861_v58 = vmax.f32 %v5797_v3, 0.0  ;;  %v7858_v24 = vpop.f32.mrb[36].mxu0  ;;  %v5930_v31 = vmul.f32 %v10432_v51, %v5860_v63 }
 0x9a8   : > { %v5566_v56 = vadd.f32 %v7858_v24, %v10426_v10  ;;  %5998 = vadd.xlane.f32.xlu1 %v5932_v6  ;;  %v5557_v44 = vpop.f32.mrb[37].mxu0  ;;  %v5933_v25 = vmul.f32 %v10432_v51, %v5863_v18 }
 0x9a9   : > { %v5558_v34 = vadd.f32 %v10426_v10, %v5557_v44  ;;  %v7859_v62 = vpop.f32.mrb[38].mxu0  ;;  %5994 = vadd.xlane.f32.xlu0 %v5930_v31  ;;  %v5931_v23 = vmul.f32 %v10432_v51, %v5861_v58 }
 0x9aa   : > { %v5802_v55 = vadd.f32 %v5566_v56, %v10050_v5  ;;  %v5569_v33 = vadd.f32 %v7859_v62, %v10426_v10  ;;  %v5560_v32 = vpop.f32.mrb[39].mxu0 }
 0x9ab   : > { %v5800_v2 = vadd.f32 %v5558_v34, %v10046_v29  ;;  %v5561_v35 = vadd.f32 %v10426_v10, %v5560_v32 }
 0x9ac   : > { %v5866_v45 = vmax.f32 %v5802_v55, 0.0  ;;  %v5803_v17 = vadd.f32 %v5569_v33, %v10053_v52  ;;  %6000 = vadd.xlane.f32.xlu1 %v5933_v25 }
 0x9ad   : > { %v5801_v43 = vadd.f32 %v5561_v35, %v10059_v15  ;;  %5996 = vadd.xlane.f32.xlu0 %v5931_v23  ;;  %v5864_v3 = vmax.f32 %v5800_v2, 0.0 }
 0x9ae   : > { %v5867_v54 = vmax.f32 %v5803_v17, 0.0  ;;  %v5936_v5 = vmul.f32 %v10432_v51, %v5866_v45 }
 0x9af   : > { %v7862_v63 = vpop.f32.mrb[40].mxu0  ;;  %v5865_v6 = vmax.f32 %v5801_v43, 0.0  ;;  %v5934_v62 = vmul.f32 %v10432_v51, %v5864_v3 }
 0x9b0   : > { %v5582_v18 = vadd.f32 %v7862_v63, %v10426_v10  ;;  %v5573_v29 = vpop.f32.mrb[41].mxu0  ;;  %v5937_v24 = vmul.f32 %v10432_v51, %v5867_v54 }
 0x9b1   : > { %v5574_v58 = vadd.f32 %v10426_v10, %v5573_v29  ;;  %v7863_v31 = vpop.f32.mrb[42].mxu0  ;;  %6006 = vadd.xlane.f32.xlu0 %v5936_v5  ;;  %v5935_v32 = vmul.f32 %v10432_v51, %v5865_v6 }
 0x9b2   : > { %v5806_v52 = vadd.f32 %v5582_v18, %v10076_v50  ;;  %v5585_v15 = vadd.f32 %v7863_v31, %v10426_v10  ;;  %6008 = vadd.xlane.f32.xlu1 %v5937_v24  ;;  %v5576_v56 = vpop.f32.mrb[43].mxu0 }
 0x9b3   : > { %v5804_v44 = vadd.f32 %v5574_v58, %v10072_v26  ;;  %v5577_v34 = vadd.f32 %v10426_v10, %v5576_v56 }
 0x9b4   : > { %v5870_v55 = vmax.f32 %v5806_v52, 0.0  ;;  %v5807_v33 = vadd.f32 %v5585_v15, %v10079_v61 }
 0x9b5   : > { %v5805_v25 = vadd.f32 %v5577_v34, %v10085_v37  ;;  %6002 = vadd.xlane.f32.xlu0 %v5934_v62  ;;  %v5868_v35 = vmax.f32 %v5804_v44, 0.0 }
 0x9b6   : > { %v5871_v2 = vmax.f32 %v5807_v33, 0.0  ;;  %6004 = vadd.xlane.f32.xlu1 %v5935_v32  ;;  %v5940_v50 = vmul.f32 %v10432_v51, %v5870_v55 }
 0x9b7   : > { %v7866_v23 = vpop.f32.mrb[44].mxu0  ;;  %v5869_v45 = vmax.f32 %v5805_v25, 0.0  ;;  %v5938_v18 = vmul.f32 %v10432_v51, %v5868_v35 }
 0x9b8   : > { %v5598_v26 = vadd.f32 %v7866_v23, %v10426_v10  ;;  %v5589_v17 = vpop.f32.mrb[45].mxu0  ;;  %v5941_v43 = vmul.f32 %v10432_v51, %v5871_v2 }
 0x9b9   : > { %v5590_v54 = vadd.f32 %v10426_v10, %v5589_v17  ;;  %v7867_v61 = vpop.f32.mrb[46].mxu0  ;;  %6014 = vadd.xlane.f32.xlu0 %v5940_v50  ;;  %v5939_v58 = vmul.f32 %v10432_v51, %v5869_v45 }
 0x9ba   : > { %v5810_v5 = vadd.f32 %v5598_v26, %v10099_v0  ;;  %v5601_v37 = vadd.f32 %v7867_v61, %v10426_v10  ;;  %v5592_v3 = vpop.f32.mrb[47].mxu0  ;;  %6016 = vadd.xlane.f32.xlu1 %v5941_v43 }
 0x9bb   : > { %v5808_v63 = vadd.f32 %v5590_v54, %v10095_v20  ;;  %v5593_v6 = vadd.f32 %v10426_v10, %v5592_v3 }
 0x9bc   : > { %v5874_v29 = vmax.f32 %v5810_v5, 0.0  ;;  %v5811_v24 = vadd.f32 %v5601_v37, %v10102_v42 }
 0x9bd   : > { %v5809_v31 = vadd.f32 %v5593_v6, %v10105_v57  ;;  %6010 = vadd.xlane.f32.xlu0 %v5938_v18  ;;  %v5872_v15 = vmax.f32 %v5808_v63, 0.0 }
 0x9be   : > { %v5875_v52 = vmax.f32 %v5811_v24, 0.0  ;;  %6012 = vadd.xlane.f32.xlu1 %v5939_v58  ;;  %v5944_v0 = vmul.f32 %v10432_v51, %v5874_v29 }
 0x9bf   : > { %v7870_v56 = vpop.f32.mrb[48].mxu0  ;;  %v5873_v44 = vmax.f32 %v5809_v31, 0.0  ;;  %v5942_v50 = vmul.f32 %v10432_v51, %v5872_v15 }
 0x9c0   : > { %v5614_v20 = vadd.f32 %v7870_v56, %v10426_v10  ;;  %v5605_v34 = vpop.f32.mrb[49].mxu0  ;;  %v5945_v62 = vmul.f32 %v10432_v51, %v5875_v52 }
 0x9c1   : > { %v5606_v55 = vadd.f32 %v10426_v10, %v5605_v34  ;;  %v7871_v42 = vpop.f32.mrb[50].mxu0  ;;  %6022 = vadd.xlane.f32.xlu0 %v5944_v0  ;;  %v5943_v45 = vmul.f32 %v10432_v51, %v5873_v44 }
 0x9c2   : > { %v5814_v33 = vadd.f32 %v5614_v20, %v10119_v16  ;;  %v5617_v57 = vadd.f32 %v7871_v42, %v10426_v10  ;;  %v5608_v32 = vpop.f32.mrb[51].mxu0  ;;  %6024 = vadd.xlane.f32.xlu1 %v5945_v62 }
 0x9c3   : > { %v5812_v25 = vadd.f32 %v5606_v55, %v10115_v59  ;;  %v5609_v2 = vadd.f32 %v10426_v10, %v5608_v32 }
 0x9c4   : > { %v5878_v35 = vmax.f32 %v5814_v33, 0.0  ;;  %v5815_v23 = vadd.f32 %v5617_v57, %v10122_v21 }
 0x9c5   : > { %v5813_v26 = vadd.f32 %v5609_v2, %v10125_v11  ;;  %6018 = vadd.xlane.f32.xlu0 %v5942_v50  ;;  %v5876_v43 = vmax.f32 %v5812_v25, 0.0 }
 0x9c6   : > { %v5879_v17 = vmax.f32 %v5815_v23, 0.0  ;;  %6020 = vadd.xlane.f32.xlu1 %v5943_v45  ;;  %v5948_v16 = vmul.f32 %v10432_v51, %v5878_v35 }
 0x9c7   : > { %v7874_v54 = vpop.f32.mrb[52].mxu0  ;;  %v5877_v61 = vmax.f32 %v5813_v26, 0.0  ;;  %v5946_v24 = vmul.f32 %v10432_v51, %v5876_v43 }
 0x9c8   : > { %v5630_v59 = vadd.f32 %v7874_v54, %v10426_v10  ;;  %v5621_v5 = vpop.f32.mrb[53].mxu0  ;;  %v5949_v37 = vmul.f32 %v10432_v51, %v5879_v17 }
 0x9c9   : > { %v5622_v3 = vadd.f32 %v10426_v10, %v5621_v5  ;;  %v7875_v21 = vpop.f32.mrb[54].mxu0  ;;  %6030 = vadd.xlane.f32.xlu0 %v5948_v16  ;;  %v5947_v52 = vmul.f32 %v10432_v51, %v5877_v61 }
 0x9ca   : > { %v5818_v63 = vadd.f32 %v5630_v59, %v10139_v12  ;;  %v5633_v11 = vadd.f32 %v7875_v21, %v10426_v10  ;;  %v5624_v6 = vpop.f32.mrb[55].mxu0  ;;  %6032 = vadd.xlane.f32.xlu1 %v5949_v37 }
 0x9cb   : > { %v5816_v18 = vadd.f32 %v5622_v3, %v10135_v28  ;;  %v5625_v29 = vadd.f32 %v10426_v10, %v5624_v6 }
 0x9cc   : > { %v5882_v58 = vmax.f32 %v5818_v63, 0.0  ;;  %v5819_v31 = vadd.f32 %v5633_v11, %v10142_v47 }
 0x9cd   : > { %v5817_v0 = vadd.f32 %v5625_v29, %v10145_v49  ;;  %6026 = vadd.xlane.f32.xlu0 %v5946_v24  ;;  %v5880_v56 = vmax.f32 %v5816_v18, 0.0 }
 0x9ce   : > { %v5883_v15 = vmax.f32 %v5819_v31, 0.0  ;;  %6028 = vadd.xlane.f32.xlu1 %v5947_v52  ;;  %v5952_v12 = vmul.f32 %v10432_v51, %v5882_v58 }
 0x9cf   : > { %v7878_v44 = vpop.f32.mrb[56].mxu0  ;;  %v5881_v20 = vmax.f32 %v5817_v0, 0.0  ;;  %v5950_v25 = vmul.f32 %v10432_v51, %v5880_v56 }
 0x9d0   : > { %v5646_v28 = vadd.f32 %v7878_v44, %v10426_v10  ;;  %v5637_v34 = vpop.f32.mrb[57].mxu0  ;;  %v5953_v62 = vmul.f32 %v10432_v51, %v5883_v15 }
 0x9d1   : > { %v5638_v55 = vadd.f32 %v10426_v10, %v5637_v34  ;;  %v7879_v47 = vpop.f32.mrb[58].mxu0  ;;  %6038 = vadd.xlane.f32.xlu0 %v5952_v12  ;;  %v5951_v35 = vmul.f32 %v10432_v51, %v5881_v20 }
 0x9d2   : > { %v5822_v42 = vadd.f32 %v5646_v28, %v10159_v48  ;;  %v5649_v49 = vadd.f32 %v7879_v47, %v10426_v10  ;;  %v5640_v33 = vpop.f32.mrb[59].mxu0  ;;  %6040 = vadd.xlane.f32.xlu1 %v5953_v62 }
 0x9d3   : > { %v5820_v57 = vadd.f32 %v5638_v55, %v10155_v46  ;;  %v5641_v32 = vadd.f32 %v10426_v10, %v5640_v33 }
 0x9d4   : > { %v5886_v2 = vmax.f32 %v5822_v42, 0.0  ;;  %v5823_v50 = vadd.f32 %v5649_v49, %v10162_v22 }
 0x9d5   : > { %v5821_v23 = vadd.f32 %v5641_v32, %v10165_v41  ;;  %6034 = vadd.xlane.f32.xlu0 %v5950_v25  ;;  %v5884_v26 = vmax.f32 %v5820_v57, 0.0 }
 0x9d6   : > { %v5887_v45 = vmax.f32 %v5823_v50, 0.0  ;;  %6036 = vadd.xlane.f32.xlu1 %v5951_v35  ;;  %v5956_v48 = vmul.f32 %v10432_v51, %v5886_v2 }
 0x9d7   : > { %v7882_v17 = vpop.f32.mrb[60].mxu0  ;;  %v5885_v16 = vmax.f32 %v5821_v23, 0.0  ;;  %v5954_v21 = vmul.f32 %v10432_v51, %v5884_v26 }
 0x9d8   : > { %v5662_v46 = vadd.f32 %v7882_v17, %v10426_v10  ;;  %v5653_v43 = vpop.f32.mrb[61].mxu0  ;;  %v5957_v54 = vmul.f32 %v10432_v51, %v5887_v45 }
 0x9d9   : > { %v5654_v61 = vadd.f32 %v10426_v10, %v5653_v43  ;;  %v7883_v22 = vpop.f32.mrb[62].mxu0  ;;  %6046 = vadd.xlane.f32.xlu0 %v5956_v48  ;;  %v5955_v6 = vmul.f32 %v10432_v51, %v5885_v16 }
 0x9da   : > { %v5826_v59 = vadd.f32 %v5662_v46, %v10179_v40  ;;  %v5665_v41 = vadd.f32 %v7883_v22, %v10426_v10  ;;  %v5656_v5 = vpop.f32.mrb[63].mxu0  ;;  %6048 = vadd.xlane.f32.xlu1 %v5957_v54  ;;  %v11115_v46 = vld [vmem:[#allocation21_spill] sm:$0xff] }
 0x9db   : > { %v5824_v37 = vadd.f32 %v5654_v61, %v10175_v9  ;;  %v5657_v3 = vadd.f32 %v10426_v10, %v5656_v5 }
 0x9dc   : > { %v5890_v63 = vmax.f32 %v5826_v59, 0.0  ;;  %v5827_v11 = vadd.f32 %v5665_v41, %v10182_v38 }
 0x9dd   : > { %v5825_v18 = vadd.f32 %v5657_v3, %v10185_v14  ;;  %6042 = vadd.xlane.f32.xlu0 %v5954_v21  ;;  %v5888_v24 = vmax.f32 %v5824_v37, 0.0 }
 0x9de   : > { %v5891_v29 = vmax.f32 %v5827_v11, 0.0  ;;  %6044 = vadd.xlane.f32.xlu1 %v5955_v6  ;;  %v5960_v40 = vmul.f32 %v10432_v51, %v5890_v63  ;;  %v11116_v11 = vld [vmem:[#allocation22_spill] sm:$0xff] }
 0x9df   : > { %v7886_v58 = vpop.f32.mrb[64].mxu0  ;;  %v5889_v31 = vmax.f32 %v5825_v18, 0.0  ;;  %v5958_v28 = vmul.f32 %v10432_v51, %v5888_v24  ;;  %v11117_v24 = vld [vmem:[#allocation18_spill] sm:$0xff] }
 0x9e0   : > { %v5678_v9 = vadd.f32 %v7886_v58, %v10426_v10  ;;  %v5669_v52 = vpop.f32.mrb[65].mxu0  ;;  %v5961_v0 = vmul.f32 %v10432_v51, %v5891_v29 }
 0x9e1   : > { %v5670_v15 = vadd.f32 %v10426_v10, %v5669_v52  ;;  %v7887_v38 = vpop.f32.mrb[66].mxu0  ;;  %6054 = vadd.xlane.f32.xlu0 %v5960_v40  ;;  %v5959_v55 = vmul.f32 %v10432_v51, %v5889_v31 }
 0x9e2   : > { %v5830_v12 = vadd.f32 %v5678_v9, %v10199_v53  ;;  %v5681_v14 = vadd.f32 %v7887_v38, %v10426_v10  ;;  %v5672_v56 = vpop.f32.mrb[67].mxu0  ;;  %6056 = vadd.xlane.f32.xlu1 %v5961_v0  ;;  %v11118_v9 = vld [vmem:[#allocation3_spill] sm:$0xff] }
 0x9e3   : > { %v5828_v44 = vadd.f32 %v5670_v15, %v10195_v36  ;;  %v5673_v20 = vadd.f32 %v10426_v10, %v5672_v56 }
 0x9e4   : > { %v5894_v34 = vmax.f32 %v5830_v12, 0.0  ;;  %v5831_v62 = vadd.f32 %v5681_v14, %v10202_v8 }
 0x9e5   : > { %v5829_v47 = vadd.f32 %v5673_v20, %v10205_v19  ;;  %6050 = vadd.xlane.f32.xlu0 %v5958_v28  ;;  %v5892_v49 = vmax.f32 %v5828_v44, 0.0 }
 0x9e6   : > { %v5895_v42 = vmax.f32 %v5831_v62, 0.0  ;;  %6052 = vadd.xlane.f32.xlu1 %v5959_v55  ;;  %v5964_v53 = vmul.f32 %v10432_v51, %v5894_v34  ;;  %v11119_v34 = vld [vmem:[#allocation5_spill] sm:$0xff] }
 0x9e7   : > { %v7890_v33 = vpop.f32.mrb[68].mxu0  ;;  %v5893_v57 = vmax.f32 %v5829_v47, 0.0  ;;  %v5962_v48 = vmul.f32 %v10432_v51, %v5892_v49 }
 0x9e8   : > { %v5694_v36 = vadd.f32 %v7890_v33, %v10426_v10  ;;  %v5685_v32 = vpop.f32.mrb[69].mxu0  ;;  %v5965_v25 = vmul.f32 %v10432_v51, %v5895_v42  ;;  %v11120_v42 = vld [vmem:[#allocation4_spill] sm:$0xff] }
 0x9e9   : > { %v5686_v2 = vadd.f32 %v10426_v10, %v5685_v32  ;;  %v7891_v8 = vpop.f32.mrb[70].mxu0  ;;  %6062 = vadd.xlane.f32.xlu0 %v5964_v53  ;;  %v5963_v16 = vmul.f32 %v10432_v51, %v5893_v57 }
 0x9ea   : > { %v5834_v50 = vadd.f32 %v5694_v36, %v10219_v4  ;;  %v5697_v19 = vadd.f32 %v7891_v8, %v10426_v10  ;;  %v5688_v35 = vpop.f32.mrb[71].mxu0  ;;  %6064 = vadd.xlane.f32.xlu1 %v5965_v25  ;;  %v11121_v36 = vld [vmem:[#allocation23_spill] sm:$0xff] }
 0x9eb   : > { %v5832_v23 = vadd.f32 %v5686_v2, %v10215_v30  ;;  %v5689_v45 = vadd.f32 %v10426_v10, %v5688_v35  ;;  %v11122_v2 = vld [vmem:[#allocation8_spill] sm:$0xff] }
 0x9ec   : > { %v5898_v26 = vmax.f32 %v5834_v50, 0.0  ;;  %v5835_v17 = vadd.f32 %v5697_v19, %v10222_v27 }
 0x9ed   : > { %v5833_v43 = vadd.f32 %v5689_v45, %v11115_v46  ;;  %6058 = vadd.xlane.f32.xlu0 %v5962_v48  ;;  %v5896_v61 = vmax.f32 %v5832_v23, 0.0 }
 0x9ee   : > { %v5899_v54 = vmax.f32 %v5835_v17, 0.0  ;;  %6060 = vadd.xlane.f32.xlu1 %v5963_v16  ;;  %v5968_v4 = vmul.f32 %v10432_v51, %v5898_v26 }
 0x9ef   : > { %v7894_v22 = vpop.f32.mrb[72].mxu0  ;;  %v5897_v59 = vmax.f32 %v5833_v43, 0.0  ;;  %v5966_v29 = vmul.f32 %v10432_v51, %v5896_v61  ;;  %v11123_v61 = vld [vmem:[#allocation9_spill] sm:$0xff] }
 0x9f0   : > { %v5710_v30 = vadd.f32 %v7894_v22, %v10426_v10  ;;  %v5701_v41 = vpop.f32.mrb[73].mxu0  ;;  %v5969_v5 = vmul.f32 %v10432_v51, %v5899_v54 }
 0x9f1   : > { %v5702_v37 = vadd.f32 %v10426_v10, %v5701_v41  ;;  %v7895_v27 = vpop.f32.mrb[74].mxu0  ;;  %6070 = vadd.xlane.f32.xlu0 %v5968_v4  ;;  %v5967_v31 = vmul.f32 %v10432_v51, %v5897_v59 }
 0x9f2   : > { %v5838_v3 = vadd.f32 %v5710_v30, %v10239_v60  ;;  %v5713_v21 = vadd.f32 %v7895_v27, %v10426_v10  ;;  %v5704_v63 = vpop.f32.mrb[75].mxu0  ;;  %6072 = vadd.xlane.f32.xlu1 %v5969_v5  ;;  %v11124_v5 = vld [vmem:[#allocation6_spill] sm:$0xff] }
 0x9f3   : > { %v5836_v6 = vadd.f32 %v5702_v37, %v11116_v11  ;;  %v5705_v18 = vadd.f32 %v10426_v10, %v5704_v63 }
 0x9f4   : > { %v5902_v40 = vmax.f32 %v5838_v3, 0.0  ;;  %v5839_v58 = vadd.f32 %v5713_v21, %v11117_v24  ;;  %v11125_v3 = vld [vmem:[#allocation12_spill] sm:$0xff] }
 0x9f5   : > { %v5837_v52 = vadd.f32 %v5705_v18, %v11118_v9  ;;  %6066 = vadd.xlane.f32.xlu0 %v5966_v29  ;;  %v5900_v15 = vmax.f32 %v5836_v6, 0.0 }
 0x9f6   : > { %v5903_v0 = vmax.f32 %v5839_v58, 0.0  ;;  %6068 = vadd.xlane.f32.xlu1 %v5967_v31  ;;  %v5972_v60 = vmul.f32 %v10432_v51, %v5902_v40 }
 0x9f7   : > { %v7898_v38 = vpop.f32.mrb[76].mxu0  ;;  %v5901_v12 = vmax.f32 %v5837_v52, 0.0  ;;  %v5970_v33 = vmul.f32 %v10432_v51, %v5900_v15 }
 0x9f8   : > { %v5726_v14 = vadd.f32 %v7898_v38, %v10426_v10  ;;  %v5717_v56 = vpop.f32.mrb[77].mxu0  ;;  %v5973_v44 = vmul.f32 %v10432_v51, %v5903_v0 }
 0x9f9   : > { %v5718_v20 = vadd.f32 %v10426_v10, %v5717_v56  ;;  %v7899_v28 = vpop.f32.mrb[78].mxu0  ;;  %6078 = vadd.xlane.f32.xlu0 %v5972_v60  ;;  %v5971_v25 = vmul.f32 %v10432_v51, %v5901_v12  ;;  %v11126_v60 = vld [vmem:[#allocation13_spill] sm:$0xff]  ;;  %v11127_v56 = vld [vmem:[#allocation7_spill] sm:$0xff] }
 0x9fa   : > { %v5842_v62 = vadd.f32 %v5726_v14, %v11119_v34  ;;  %v5729_v55 = vadd.f32 %v7899_v28, %v10426_v10  ;;  %v5720_v47 = vpop.f32.mrb[79].mxu0  ;;  %6080 = vadd.xlane.f32.xlu1 %v5973_v44  ;;  %v11128_v28 = vld [vmem:[#allocation10_spill] sm:$0xff] }
 0x9fb   : > { %v5840_v53 = vadd.f32 %v5718_v20, %v11120_v42  ;;  %v5721_v49 = vadd.f32 %v10426_v10, %v5720_v47 }
 0x9fc   : > { %v5906_v57 = vmax.f32 %v5842_v62, 0.0  ;;  %v5843_v32 = vadd.f32 %v5729_v55, %v11121_v36 }
 0x9fd   : > { %v5841_v8 = vadd.f32 %v5721_v49, %v11122_v2  ;;  %6074 = vadd.xlane.f32.xlu0 %v5970_v33  ;;  %v5904_v35 = vmax.f32 %v5840_v53, 0.0 }
 0x9fe   : > { %v5907_v50 = vmax.f32 %v5843_v32, 0.0  ;;  %6076 = vadd.xlane.f32.xlu1 %v5971_v25  ;;  %v5976_v19 = vmul.f32 %v10432_v51, %v5906_v57 }
 0x9ff   : > { %v7902_v23 = vpop.f32.mrb[80].mxu0  ;;  %v5905_v45 = vmax.f32 %v5841_v8, 0.0  ;;  %v5974_v30 = vmul.f32 %v10432_v51, %v5904_v35  ;;  %v11129_v8 = vld [vmem:[#allocation11_spill] sm:$0xff] }
 0xa00   : > { %v5742_v48 = vadd.f32 %v7902_v23, %v10426_v10  ;;  %v5733_v26 = vpop.f32.mrb[81].mxu0  ;;  %v5977_v17 = vmul.f32 %v10432_v51, %v5907_v50 }
 0xa01   : > { %v5734_v16 = vadd.f32 %v10426_v10, %v5733_v26  ;;  %v7903_v46 = vpop.f32.mrb[82].mxu0  ;;  %6086 = vadd.xlane.f32.xlu0 %v5976_v19  ;;  %v5975_v27 = vmul.f32 %v10432_v51, %v5905_v45  ;;  %v11130_v45 = vld [vmem:[#allocation14_spill] sm:$0xff] }
 0xa02   : > { %v5846_v43 = vadd.f32 %v5742_v48, %v10279_v7  ;;  %v5745_v54 = vadd.f32 %v7903_v46, %v10426_v10  ;;  %v5736_v4 = vpop.f32.mrb[83].mxu0  ;;  %6088 = vadd.xlane.f32.xlu1 %v5977_v17  ;;  %v11131_v17 = vld [vmem:[#allocation15_spill] sm:$0xff] }
 0xa03   : > { %v5844_v22 = vadd.f32 %v5734_v16, %v11123_v61  ;;  %v5737_v59 = vadd.f32 %v10426_v10, %v5736_v4 }
 0xa04   : > { %v5910_v41 = vmax.f32 %v5846_v43, 0.0  ;;  %v5847_v37 = vadd.f32 %v5745_v54, %v11124_v5 }
 0xa05   : > { %v5845_v21 = vadd.f32 %v5737_v59, %v11125_v3  ;;  %6082 = vadd.xlane.f32.xlu0 %v5974_v30  ;;  %v5908_v11 = vmax.f32 %v5844_v22, 0.0  ;;  %v11132_v3 = vld [vmem:[#allocation19_spill] sm:$0xff] }
 0xa06   : > { %v5911_v63 = vmax.f32 %v5847_v37, 0.0  ;;  %6084 = vadd.xlane.f32.xlu1 %v5975_v27  ;;  %v5980_v7 = vmul.f32 %v10432_v51, %v5910_v41 }
 0xa07   : > { %v7906_v6 = vpop.f32.mrb[84].mxu0  ;;  %v5909_v18 = vmax.f32 %v5845_v21, 0.0  ;;  %v5978_v12 = vmul.f32 %v10432_v51, %v5908_v11 }
 0xa08   : > { %v5758_v29 = vadd.f32 %v7906_v6, %v10426_v10  ;;  %v5749_v40 = vpop.f32.mrb[85].mxu0  ;;  %v5981_v24 = vmul.f32 %v10432_v51, %v5911_v63 }
 0xa09   : > { %v5750_v58 = vadd.f32 %v10426_v10, %v5749_v40  ;;  %v7907_v31 = vpop.f32.mrb[86].mxu0  ;;  %6094 = vadd.xlane.f32.xlu0 %v5980_v7  ;;  %v5979_v20 = vmul.f32 %v10432_v51, %v5909_v18  ;;  %v11133_v18 = vld [vmem:[#allocation20_spill] sm:$0xff] }
 0xa0a   : > { %v5850_v9 = vadd.f32 %v5758_v29, %v10299_v13  ;;  %v5761_v52 = vadd.f32 %v7907_v31, %v10426_v10  ;;  %v5752_v0 = vpop.f32.mrb[87].mxu0  ;;  %6096 = vadd.xlane.f32.xlu1 %v5981_v24  ;;  %v11134_v40 = vld [vmem:[#allocation16_spill] sm:$0xff] }
 0xa0b   : > { %v5848_v15 = vadd.f32 %v5750_v58, %v11126_v60  ;;  %v5753_v38 = vadd.f32 %v10426_v10, %v5752_v0  ;;  %v10623_v60 = vld [vmem:[#allocation2] ss:$0 sm:$0xff] }
 0xa0c   : > { %v5914_v14 = vmax.f32 %v5850_v9, 0.0  ;;  %v5851_v44 = vadd.f32 %v5761_v52, %v11127_v56 }
 0xa0d   : > { %v5849_v34 = vadd.f32 %v5753_v38, %v11128_v28  ;;  %6090 = vadd.xlane.f32.xlu0 %v5978_v12  ;;  %v5912_v55 = vmax.f32 %v5848_v15, 0.0 }
 0xa0e   : > { %v5915_v62 = vmax.f32 %v5851_v44, 0.0  ;;  %6092 = vadd.xlane.f32.xlu1 %v5979_v20  ;;  %v5984_v13 = vmul.f32 %v10432_v51, %v5914_v14 }
 0xa0f   : > { %v7910_v47 = vpop.f32.mrb[88].mxu0  ;;  %v5913_v42 = vmax.f32 %v5849_v34, 0.0  ;;  %v5982_v35 = vmul.f32 %v10432_v51, %v5912_v55 }
 0xa10   : > { %v5774_v53 = vadd.f32 %v7910_v47, %v10426_v10  ;;  %v5765_v49 = vpop.f32.mrb[89].mxu0  ;;  %v5985_v33 = vmul.f32 %v10432_v51, %v5915_v62 }
 0xa11   : > { %v5766_v57 = vadd.f32 %v10426_v10, %v5765_v49  ;;  %v7911_v36 = vpop.f32.mrb[90].mxu0  ;;  %6102 = vadd.xlane.f32.xlu0 %v5984_v13  ;;  %v5983_v26 = vmul.f32 %v10432_v51, %v5913_v42 }
 0xa12   : > { %v5854_v32 = vadd.f32 %v5774_v53, %v10319_v1  ;;  %v5777_v25 = vadd.f32 %v7911_v36, %v10426_v10  ;;  %v5768_v2 = vpop.f32.mrb[91].mxu0  ;;  %6104 = vadd.xlane.f32.xlu1 %v5985_v33 }
 0xa13   : > { %v5852_v50 = vadd.f32 %v5766_v57, %v11129_v8  ;;  %v5769_v19 = vadd.f32 %v10426_v10, %v5768_v2 }
 0xa14   : > { %v5918_v23 = vmax.f32 %v5854_v32, 0.0  ;;  %v5855_v48 = vadd.f32 %v5777_v25, %v11130_v45 }
 0xa15   : > { %v5853_v16 = vadd.f32 %v5769_v19, %v11131_v17  ;;  %6098 = vadd.xlane.f32.xlu0 %v5982_v35  ;;  %v5916_v43 = vmax.f32 %v5852_v50, 0.0 }
 0xa16   : > { %v5919_v46 = vmax.f32 %v5855_v48, 0.0  ;;  %6100 = vadd.xlane.f32.xlu1 %v5983_v26  ;;  %v5988_v1 = vmul.f32 %v10432_v51, %v5918_v23 }
 0xa17   : > { %v7914_v54 = vpop.f32.mrb[92].mxu0  ;;  %v5917_v4 = vmax.f32 %v5853_v16, 0.0  ;;  %v5986_v7 = vmul.f32 %v10432_v51, %v5916_v43 }
 0xa18   : > { %v5790_v61 = vadd.f32 %v7914_v54, %v10426_v10  ;;  %v5781_v22 = vpop.f32.mrb[93].mxu0  ;;  %v5989_v59 = vmul.f32 %v10432_v51, %v5919_v46 }
 0xa19   : > { %v5782_v30 = vadd.f32 %v10426_v10, %v5781_v22  ;;  %v7915_v41 = vpop.f32.mrb[94].mxu0  ;;  %6110 = vadd.xlane.f32.xlu0 %v5988_v1  ;;  %v5987_v11 = vmul.f32 %v10432_v51, %v5917_v4 }
 0xa1a   : > { %v5793_v5 = vadd.f32 %v7915_v41, %v10426_v10  ;;  %v5784_v37 = vpop.f32.mrb[95].mxu0  ;;  %6112 = vadd.xlane.f32.xlu1 %v5989_v59  ;;  %v5858_v27 = vadd.f32 %v5790_v61, %v10339_v39 }
 0xa1b   : > { %v5856_v21 = vadd.f32 %v5782_v30, %v11132_v3  ;;  %v5785_v63 = vadd.f32 %v10426_v10, %v5784_v37 }
 0xa1c   : > { %v5859_v29 = vadd.f32 %v5793_v5, %v11133_v18  ;;  %v5922_v58 = vmax.f32 %v5858_v27, 0.0 }
 0xa1d   : > { %v5920_v6 = vmax.f32 %v5856_v21, 0.0  ;;  %v5857_v24 = vadd.f32 %v5785_v63, %v11134_v40  ;;  %6106 = vadd.xlane.f32.xlu0 %v5986_v7 }
 0xa1e   : > { %6108 = vadd.xlane.f32.xlu1 %v5987_v11  ;;  %v5923_v9 = vmax.f32 %v5859_v29, 0.0  ;;  %v5992_v52 = vmul.f32 %v10432_v51, %v5922_v58 }
 0xa1f   : > { %v5921_v31 = vmax.f32 %v5857_v24, 0.0  ;;  %v5990_v39 = vmul.f32 %v10432_v51, %v5920_v6 }
 0xa20   : > { %v5993_v0 = vmul.f32 %v10432_v51, %v5923_v9 }
 0xa21   : > { %6114 = vadd.xlane.f32.xlu0 %v5990_v39  ;;  %v5991_v10 = vmul.f32 %v10432_v51, %v5921_v31 }
 0xa23   : > { %6116 = vadd.xlane.f32.xlu1 %v5991_v10 }
 0xa25   : > { %6118 = vadd.xlane.f32.xlu0 %v5992_v52 }
 0xa27   : > { %6120 = vadd.xlane.f32.xlu1 %v5993_v0 }
 0xa35   : > { %v5999_v15 = vpop.xlane.xlu1 %5998 }
 0xa36   : > { %v6131_v38 = vadd.f32 %v10623_v60, %v5999_v15  ;;  %v5995_v51 = vpop.xlane.xlu0 %5994 }
 0xa37   : > { %v6129_v12 = vadd.f32 %v10623_v60, %v5995_v51 }
 0xa38   : > { %6196 = vst.msk [vmem:[%s10628_s26 + $0x10] sm:$0xff] %vm6193_vm3, %v6131_v38 }
 0xa39   : > { %6194 = vst.msk [vmem:[%s10628_s26] sm:$0xff] %vm6193_vm3, %v6129_v12  ;;  %v6001_v14 = vpop.xlane.xlu1 %6000 }
 0xa3a   : > { %v6132_v56 = vadd.f32 %v10623_v60, %v6001_v14  ;;  %v5997_v44 = vpop.xlane.xlu0 %5996 }
 0xa3b   : > { %v6130_v20 = vadd.f32 %v10623_v60, %v5997_v44 }
 0xa3c   : > { %6197 = vst.msk [vmem:[%s10628_s26 + $0x18] sm:$0xff] %vm6193_vm3, %v6132_v56 }
 0xa3d   : > { %6195 = vst.msk [vmem:[%s10628_s26 + $0x8] sm:$0xff] %vm6193_vm3, %v6130_v20 }
 0xa3e   : > { %v6007_v28 = vpop.xlane.xlu0 %6006 }
 0xa3f   : > { %v6135_v34 = vadd.f32 %v10623_v60, %v6007_v28  ;;  %v6009_v62 = vpop.xlane.xlu1 %6008 }
 0xa40   : > { %v6136_v13 = vadd.f32 %v10623_v60, %v6009_v62 }
 0xa41   : > { %6200 = vst.msk [vmem:[%s10628_s26 + $0x30] sm:$0xff] %vm6193_vm3, %v6135_v34 }
 0xa42   : > { %6201 = vst.msk [vmem:[%s10628_s26 + $0x38] sm:$0xff] %vm6193_vm3, %v6136_v13  ;;  %v6003_v55 = vpop.xlane.xlu0 %6002 }
 0xa43   : > { %v6133_v47 = vadd.f32 %v10623_v60, %v6003_v55  ;;  %v6005_v42 = vpop.xlane.xlu1 %6004 }
 0xa44   : > { %v6134_v53 = vadd.f32 %v10623_v60, %v6005_v42 }
 0xa45   : > { %6198 = vst.msk [vmem:[%s10628_s26 + $0x20] sm:$0xff] %vm6193_vm3, %v6133_v47 }
 0xa46   : > { %6199 = vst.msk [vmem:[%s10628_s26 + $0x28] sm:$0xff] %vm6193_vm3, %v6134_v53  ;;  %v6015_v49 = vpop.xlane.xlu0 %6014 }
 0xa47   : > { %v6139_v33 = vadd.f32 %v10623_v60, %v6015_v49  ;;  %v6017_v57 = vpop.xlane.xlu1 %6016 }
 0xa48   : > { %v6140_v36 = vadd.f32 %v10623_v60, %v6017_v57 }
 0xa49   : > { %6204 = vst.msk [vmem:[%s10628_s26 + $0x50] sm:$0xff] %vm6193_vm3, %v6139_v33 }
 0xa4a   : > { %6205 = vst.msk [vmem:[%s10628_s26 + $0x58] sm:$0xff] %vm6193_vm3, %v6140_v36  ;;  %v6011_v32 = vpop.xlane.xlu0 %6010 }
 0xa4b   : > { %v6137_v25 = vadd.f32 %v10623_v60, %v6011_v32  ;;  %v6013_v2 = vpop.xlane.xlu1 %6012 }
 0xa4c   : > { %v6138_v8 = vadd.f32 %v10623_v60, %v6013_v2 }
 0xa4d   : > { %6202 = vst.msk [vmem:[%s10628_s26 + $0x40] sm:$0xff] %vm6193_vm3, %v6137_v25 }
 0xa4e   : > { %6203 = vst.msk [vmem:[%s10628_s26 + $0x48] sm:$0xff] %vm6193_vm3, %v6138_v8  ;;  %v6023_v50 = vpop.xlane.xlu0 %6022 }
 0xa4f   : > { %v6143_v19 = vadd.f32 %v10623_v60, %v6023_v50  ;;  %v6025_v35 = vpop.xlane.xlu1 %6024 }
 0xa50   : > { %v6144_v23 = vadd.f32 %v10623_v60, %v6025_v35 }
 0xa51   : > { %6208 = vst.msk [vmem:[%s10628_s26 + $0x70] sm:$0xff] %vm6193_vm3, %v6143_v19 }
 0xa52   : > { %6209 = vst.msk [vmem:[%s10628_s26 + $0x78] sm:$0xff] %vm6193_vm3, %v6144_v23  ;;  %v6019_v45 = vpop.xlane.xlu0 %6018 }
 0xa53   : > { %v6141_v48 = vadd.f32 %v10623_v60, %v6019_v45  ;;  %v6021_v26 = vpop.xlane.xlu1 %6020 }
 0xa54   : > { %v6142_v17 = vadd.f32 %v10623_v60, %v6021_v26 }
 0xa55   : > { %6206 = vst.msk [vmem:[%s10628_s26 + $0x60] sm:$0xff] %vm6193_vm3, %v6141_v48 }
 0xa56   : > { %6207 = vst.msk [vmem:[%s10628_s26 + $0x68] sm:$0xff] %vm6193_vm3, %v6142_v17  ;;  %v6031_v16 = vpop.xlane.xlu0 %6030 }
 0xa57   : > { %v6147_v46 = vadd.f32 %v10623_v60, %v6031_v16  ;;  %v6033_v1 = vpop.xlane.xlu1 %6032 }
 0xa58   : > { %v6148_v43 = vadd.f32 %v10623_v60, %v6033_v1 }
 0xa59   : > { %6212 = vst.msk [vmem:[%s10628_s26 + $0x90] sm:$0xff] %vm6193_vm3, %v6147_v46 }
 0xa5a   : > { %6213 = vst.msk [vmem:[%s10628_s26 + $0x98] sm:$0xff] %vm6193_vm3, %v6148_v43  ;;  %v6027_v54 = vpop.xlane.xlu0 %6026 }
 0xa5b   : > { %v6145_v4 = vadd.f32 %v10623_v60, %v6027_v54  ;;  %v6029_v61 = vpop.xlane.xlu1 %6028 }
 0xa5c   : > { %v6146_v22 = vadd.f32 %v10623_v60, %v6029_v61 }
 0xa5d   : > { %6210 = vst.msk [vmem:[%s10628_s26 + $0x80] sm:$0xff] %vm6193_vm3, %v6145_v4 }
 0xa5e   : > { %6211 = vst.msk [vmem:[%s10628_s26 + $0x88] sm:$0xff] %vm6193_vm3, %v6146_v22  ;;  %v6039_v59 = vpop.xlane.xlu0 %6038 }
 0xa5f   : > { %v6151_v30 = vadd.f32 %v10623_v60, %v6039_v59  ;;  %v6041_v41 = vpop.xlane.xlu1 %6040 }
 0xa60   : > { %v6152_v5 = vadd.f32 %v10623_v60, %v6041_v41 }
 0xa61   : > { %6216 = vst.msk [vmem:[%s10628_s26 + $0xb0] sm:$0xff] %vm6193_vm3, %v6151_v30 }
 0xa62   : > { %6217 = vst.msk [vmem:[%s10628_s26 + $0xb8] sm:$0xff] %vm6193_vm3, %v6152_v5  ;;  %v6035_v37 = vpop.xlane.xlu0 %6034 }
 0xa63   : > { %v6149_v27 = vadd.f32 %v10623_v60, %v6035_v37  ;;  %v6037_v3 = vpop.xlane.xlu1 %6036 }
 0xa64   : > { %v6150_v21 = vadd.f32 %v10623_v60, %v6037_v3 }
 0xa65   : > { %6214 = vst.msk [vmem:[%s10628_s26 + $0xa0] sm:$0xff] %vm6193_vm3, %v6149_v27 }
 0xa66   : > { %6215 = vst.msk [vmem:[%s10628_s26 + $0xa8] sm:$0xff] %vm6193_vm3, %v6150_v21  ;;  %v6047_v63 = vpop.xlane.xlu0 %6046 }
 0xa67   : > { %v6155_v7 = vadd.f32 %v10623_v60, %v6047_v63  ;;  %v6049_v11 = vpop.xlane.xlu1 %6048 }
 0xa68   : > { %v6156_v6 = vadd.f32 %v10623_v60, %v6049_v11 }
 0xa69   : > { %6220 = vst.msk [vmem:[%s10628_s26 + $0xd0] sm:$0xff] %vm6193_vm3, %v6155_v7 }
 0xa6a   : > { %6221 = vst.msk [vmem:[%s10628_s26 + $0xd8] sm:$0xff] %vm6193_vm3, %v6156_v6  ;;  %v6043_v18 = vpop.xlane.xlu0 %6042 }
 0xa6b   : > { %v6153_v29 = vadd.f32 %v10623_v60, %v6043_v18  ;;  %v6045_v40 = vpop.xlane.xlu1 %6044 }
 0xa6c   : > { %v6154_v24 = vadd.f32 %v10623_v60, %v6045_v40 }
 0xa6d   : > { %6218 = vst.msk [vmem:[%s10628_s26 + $0xc0] sm:$0xff] %vm6193_vm3, %v6153_v29 }
 0xa6e   : > { %6219 = vst.msk [vmem:[%s10628_s26 + $0xc8] sm:$0xff] %vm6193_vm3, %v6154_v24  ;;  %v6055_v58 = vpop.xlane.xlu0 %6054 }
 0xa6f   : > { %v6159_v31 = vadd.f32 %v10623_v60, %v6055_v58  ;;  %v6057_v39 = vpop.xlane.xlu1 %6056 }
 0xa70   : > { %v6160_v9 = vadd.f32 %v10623_v60, %v6057_v39 }
 0xa71   : > { %6224 = vst.msk [vmem:[%s10628_s26 + $0xf0] sm:$0xff] %vm6193_vm3, %v6159_v31 }
 0xa72   : > { %6225 = vst.msk [vmem:[%s10628_s26 + $0xf8] sm:$0xff] %vm6193_vm3, %v6160_v9  ;;  %v6051_v10 = vpop.xlane.xlu0 %6050 }
 0xa73   : > { %v6157_v52 = vadd.f32 %v10623_v60, %v6051_v10  ;;  %v6053_v0 = vpop.xlane.xlu1 %6052 }
 0xa74   : > { %v6158_v15 = vadd.f32 %v10623_v60, %v6053_v0 }
 0xa75   : > { %6222 = vst.msk [vmem:[%s10628_s26 + $0xe0] sm:$0xff] %vm6193_vm3, %v6157_v52 }
 0xa76   : > { %6223 = vst.msk [vmem:[%s10628_s26 + $0xe8] sm:$0xff] %vm6193_vm3, %v6158_v15  ;;  %v6063_v38 = vpop.xlane.xlu0 %6062 }
 0xa77   : > { %v6163_v51 = vadd.f32 %v10623_v60, %v6063_v38  ;;  %v6065_v12 = vpop.xlane.xlu1 %6064 }
 0xa78   : > { %v6164_v14 = vadd.f32 %v10623_v60, %v6065_v12 }
 0xa79   : > { %6228 = vst.msk [vmem:[%s10628_s26 + $0x110] sm:$0xff] %vm6193_vm3, %v6163_v51 }
 0xa7a   : > { %6229 = vst.msk [vmem:[%s10628_s26 + $0x118] sm:$0xff] %vm6193_vm3, %v6164_v14  ;;  %v6059_v56 = vpop.xlane.xlu0 %6058 }
 0xa7b   : > { %v6161_v44 = vadd.f32 %v10623_v60, %v6059_v56  ;;  %v6061_v20 = vpop.xlane.xlu1 %6060 }
 0xa7c   : > { %v6162_v28 = vadd.f32 %v10623_v60, %v6061_v20 }
 0xa7d   : > { %6226 = vst.msk [vmem:[%s10628_s26 + $0x100] sm:$0xff] %vm6193_vm3, %v6161_v44 }
 0xa7e   : > { %6227 = vst.msk [vmem:[%s10628_s26 + $0x108] sm:$0xff] %vm6193_vm3, %v6162_v28  ;;  %v6071_v34 = vpop.xlane.xlu0 %6070 }
 0xa7f   : > { %v6167_v62 = vadd.f32 %v10623_v60, %v6071_v34  ;;  %v6073_v13 = vpop.xlane.xlu1 %6072 }
 0xa80   : > { %v6168_v55 = vadd.f32 %v10623_v60, %v6073_v13 }
 0xa81   : > { %6232 = vst.msk [vmem:[%s10628_s26 + $0x130] sm:$0xff] %vm6193_vm3, %v6167_v62 }
 0xa82   : > { %6233 = vst.msk [vmem:[%s10628_s26 + $0x138] sm:$0xff] %vm6193_vm3, %v6168_v55  ;;  %v6067_v47 = vpop.xlane.xlu0 %6066 }
 0xa83   : > { %v6165_v42 = vadd.f32 %v10623_v60, %v6067_v47  ;;  %v6069_v53 = vpop.xlane.xlu1 %6068 }
 0xa84   : > { %v6166_v49 = vadd.f32 %v10623_v60, %v6069_v53 }
 0xa85   : > { %6230 = vst.msk [vmem:[%s10628_s26 + $0x120] sm:$0xff] %vm6193_vm3, %v6165_v42 }
 0xa86   : > { %6231 = vst.msk [vmem:[%s10628_s26 + $0x128] sm:$0xff] %vm6193_vm3, %v6166_v49  ;;  %v6079_v33 = vpop.xlane.xlu0 %6078 }
 0xa87   : > { %v6171_v57 = vadd.f32 %v10623_v60, %v6079_v33  ;;  %v6081_v36 = vpop.xlane.xlu1 %6080 }
 0xa88   : > { %v6172_v32 = vadd.f32 %v10623_v60, %v6081_v36 }
 0xa89   : > { %6236 = vst.msk [vmem:[%s10628_s26 + $0x150] sm:$0xff] %vm6193_vm3, %v6171_v57 }
 0xa8a   : > { %6237 = vst.msk [vmem:[%s10628_s26 + $0x158] sm:$0xff] %vm6193_vm3, %v6172_v32  ;;  %v6075_v25 = vpop.xlane.xlu0 %6074 }
 0xa8b   : > { %v6169_v2 = vadd.f32 %v10623_v60, %v6075_v25  ;;  %v6077_v8 = vpop.xlane.xlu1 %6076 }
 0xa8c   : > { %v6170_v50 = vadd.f32 %v10623_v60, %v6077_v8 }
 0xa8d   : > { %6234 = vst.msk [vmem:[%s10628_s26 + $0x140] sm:$0xff] %vm6193_vm3, %v6169_v2 }
 0xa8e   : > { %6235 = vst.msk [vmem:[%s10628_s26 + $0x148] sm:$0xff] %vm6193_vm3, %v6170_v50  ;;  %v6087_v19 = vpop.xlane.xlu0 %6086 }
 0xa8f   : > { %v6175_v35 = vadd.f32 %v10623_v60, %v6087_v19  ;;  %v6089_v23 = vpop.xlane.xlu1 %6088 }
 0xa90   : > { %v6176_v45 = vadd.f32 %v10623_v60, %v6089_v23 }
 0xa91   : > { %6240 = vst.msk [vmem:[%s10628_s26 + $0x170] sm:$0xff] %vm6193_vm3, %v6175_v35 }
 0xa92   : > { %6241 = vst.msk [vmem:[%s10628_s26 + $0x178] sm:$0xff] %vm6193_vm3, %v6176_v45  ;;  %v6083_v48 = vpop.xlane.xlu0 %6082 }
 0xa93   : > { %v6173_v26 = vadd.f32 %v10623_v60, %v6083_v48  ;;  %v6085_v17 = vpop.xlane.xlu1 %6084 }
 0xa94   : > { %v6174_v16 = vadd.f32 %v10623_v60, %v6085_v17 }
 0xa95   : > { %6238 = vst.msk [vmem:[%s10628_s26 + $0x160] sm:$0xff] %vm6193_vm3, %v6173_v26 }
 0xa96   : > { %6239 = vst.msk [vmem:[%s10628_s26 + $0x168] sm:$0xff] %vm6193_vm3, %v6174_v16  ;;  %v6095_v46 = vpop.xlane.xlu0 %6094 }
 0xa97   : > { %v6179_v1 = vadd.f32 %v10623_v60, %v6095_v46  ;;  %v6097_v43 = vpop.xlane.xlu1 %6096 }
 0xa98   : > { %v6180_v54 = vadd.f32 %v10623_v60, %v6097_v43 }
 0xa99   : > { %6244 = vst.msk [vmem:[%s10628_s26 + $0x190] sm:$0xff] %vm6193_vm3, %v6179_v1 }
 0xa9a   : > { %6245 = vst.msk [vmem:[%s10628_s26 + $0x198] sm:$0xff] %vm6193_vm3, %v6180_v54  ;;  %v6091_v4 = vpop.xlane.xlu0 %6090 }
 0xa9b   : > { %v6177_v61 = vadd.f32 %v10623_v60, %v6091_v4  ;;  %v6093_v22 = vpop.xlane.xlu1 %6092 }
 0xa9c   : > { %v6178_v59 = vadd.f32 %v10623_v60, %v6093_v22 }
 0xa9d   : > { %6242 = vst.msk [vmem:[%s10628_s26 + $0x180] sm:$0xff] %vm6193_vm3, %v6177_v61 }
 0xa9e   : > { %6243 = vst.msk [vmem:[%s10628_s26 + $0x188] sm:$0xff] %vm6193_vm3, %v6178_v59  ;;  %v6103_v30 = vpop.xlane.xlu0 %6102 }
 0xa9f   : > { %v6183_v41 = vadd.f32 %v10623_v60, %v6103_v30  ;;  %v6105_v5 = vpop.xlane.xlu1 %6104 }
 0xaa0   : > { %v6184_v37 = vadd.f32 %v10623_v60, %v6105_v5 }
 0xaa1   : > { %6248 = vst.msk [vmem:[%s10628_s26 + $0x1b0] sm:$0xff] %vm6193_vm3, %v6183_v41 }
 0xaa2   : > { %6249 = vst.msk [vmem:[%s10628_s26 + $0x1b8] sm:$0xff] %vm6193_vm3, %v6184_v37  ;;  %v6099_v27 = vpop.xlane.xlu0 %6098 }
 0xaa3   : > { %v6181_v3 = vadd.f32 %v10623_v60, %v6099_v27  ;;  %v6101_v21 = vpop.xlane.xlu1 %6100 }
 0xaa4   : > { %v6182_v63 = vadd.f32 %v10623_v60, %v6101_v21 }
 0xaa5   : > { %6246 = vst.msk [vmem:[%s10628_s26 + $0x1a0] sm:$0xff] %vm6193_vm3, %v6181_v3 }
 0xaa6   : > { %6247 = vst.msk [vmem:[%s10628_s26 + $0x1a8] sm:$0xff] %vm6193_vm3, %v6182_v63  ;;  %v6111_v7 = vpop.xlane.xlu0 %6110 }
 0xaa7   : > { %v6187_v11 = vadd.f32 %v10623_v60, %v6111_v7  ;;  %v6113_v6 = vpop.xlane.xlu1 %6112 }
 0xaa8   : > { %v6188_v18 = vadd.f32 %v10623_v60, %v6113_v6 }
 0xaa9   : > { %6252 = vst.msk [vmem:[%s10628_s26 + $0x1d0] sm:$0xff] %vm6193_vm3, %v6187_v11 }
 0xaaa   : > { %6253 = vst.msk [vmem:[%s10628_s26 + $0x1d8] sm:$0xff] %vm6193_vm3, %v6188_v18  ;;  %v6107_v29 = vpop.xlane.xlu0 %6106 }
 0xaab   : > { %v6185_v40 = vadd.f32 %v10623_v60, %v6107_v29  ;;  %v6109_v24 = vpop.xlane.xlu1 %6108 }
 0xaac   : > { %v6186_v58 = vadd.f32 %v10623_v60, %v6109_v24 }
 0xaad   : > { %6250 = vst.msk [vmem:[%s10628_s26 + $0x1c0] sm:$0xff] %vm6193_vm3, %v6185_v40 }
 0xaae   : > { %6251 = vst.msk [vmem:[%s10628_s26 + $0x1c8] sm:$0xff] %vm6193_vm3, %v6186_v58  ;;  %v6115_v31 = vpop.xlane.xlu0 %6114 }
 0xaaf   : > { %v6189_v39 = vadd.f32 %v10623_v60, %v6115_v31 }
 0xab0   : > { %v6117_v9 = vpop.xlane.xlu1 %6116 }
 0xab1   : > { %6254 = vst.msk [vmem:[%s10628_s26 + $0x1e0] sm:$0xff] %vm6193_vm3, %v6189_v39  ;;  %v6190_v10 = vadd.f32 %v10623_v60, %v6117_v9 }
 0xab2   : > { %v6119_v52 = vpop.xlane.xlu0 %6118 }
 0xab3   : > { %6255 = vst.msk [vmem:[%s10628_s26 + $0x1e8] sm:$0xff] %vm6193_vm3, %v6190_v10  ;;  %v6191_v0 = vadd.f32 %v10623_v60, %v6119_v52 }
 0xab4   : > { %v6121_v15 = vpop.xlane.xlu1 %6120 }
 0xab5   : > { %6256 = vst.msk [vmem:[%s10628_s26 + $0x1f0] sm:$0xff] %vm6193_vm3, %v6191_v0  ;;  %v6192_v38 = vadd.f32 %v10623_v60, %v6121_v15 }
 0xab7   : > { %6257 = vst.msk [vmem:[%s10628_s26 + $0x1f8] sm:$0xff] %vm6193_vm3, %v6192_v38 }
 0xab8 PF: > { %s21_s11 = sadd.s32 1, %s8045_s11  }
 0xab9   : > { %p18_p4 = scmp.ge.s32.totalorder %s21_s11, 6  }
 0xabb   :  { %20 = sbr.rel (!%p18_p4) target bundleno = 3 (0x3), region = 102 }

</bundles_post_ra>
